<compile_context>
chip_gen: v6e
topology: v6e:2x2x1
jax: 0.10.0
libtpu: 0.0.40
codegen_flags: <defaults>
</compile_context>

<pallas_src>
import jax
import jax.numpy as jnp
from jax.experimental import pallas as pl
from jax.experimental.pallas import tpu as pltpu


def _round_up(v, m):
    return (v + m - 1) // m * m


# --------------------------------- kernel ---------------------------------- #

def _fused_basic_block_kernel(x_ref, w1_ref, b1_ref, w2_ref, b2_ref, o_ref,
                              xpad_ref):
    """Fused conv-bn-relu -> conv-bn-add-relu for one batch element.

    x_ref    : (1, H, W, Cp)   bf16 channel-padded input (also the residual)
    w1_ref   : (9*Cp, Cp)      bf16 conv1 weights with BN1 scale folded in
    b1_ref   : (1, Cp)         f32 folded BN1 bias
    w2_ref   : (9*Cp, Cp)      bf16 conv2 weights with BN2 scale folded in
    b2_ref   : (1, Cp)         f32 folded BN2 bias
    o_ref    : (1, H, W, Cp)   f32 output
    xpad_ref : (H+2, W+2, Cp)  f32 VMEM scratch: spatially padded activation
    """
    H, W, Cp = o_ref.shape[1], o_ref.shape[2], o_ref.shape[3]

    def conv3x3(w_ref):
        # im2col: one big-K matmul instead of 9 tiny K=Cin matmuls.
        xp = xpad_ref[...]                                       # (H+2, W+2, Cp)
        cols = [xp[kh:kh + H, kw:kw + W, :].reshape(H * W, Cp)
                for kh in range(3) for kw in range(3)]
        patches = jnp.concatenate(cols, axis=-1)                 # (H*W, 9*Cp)
        return jnp.dot(patches.astype(jnp.bfloat16), w_ref[...],
                       preferred_element_type=jnp.float32)       # (H*W, Cp) f32

    x = x_ref[0]                                                 # (H, W, Cp) bf16

    # ---- conv1 + folded BN1 + ReLU; intermediate never leaves VMEM --------- #
    xpad_ref[...] = jnp.zeros_like(xpad_ref)                     # zero halo
    xpad_ref[1:H + 1, 1:W + 1, :] = x.astype(jnp.float32)
    y1 = jnp.maximum(conv3x3(w1_ref) + b1_ref[...], 0.0)         # (H*W, Cp) f32

    # ---- conv2 + folded BN2 + residual add + ReLU --------------------------- #
    xpad_ref[1:H + 1, 1:W + 1, :] = y1.reshape(H, W, Cp)         # halo stays zero
    y2 = (conv3x3(w2_ref) + b2_ref[...]
          + x.astype(jnp.float32).reshape(H * W, Cp))
    o_ref[0] = jnp.maximum(y2, 0.0).reshape(H, W, Cp).astype(o_ref.dtype)


# -------------------------------- wrappers --------------------------------- #

def _fold_bn(gamma, beta, running_mean, running_var, eps=1e-5):
    scale = gamma / jnp.sqrt(running_var + eps)
    bias = beta - running_mean * scale
    return scale, bias


def _prep_weight(w_oihw, scale, cp):
    """PyTorch (Cout,Cin,3,3) weight -> (9*Cp, Cp) bf16 with BN scale folded in."""
    cout, cin = w_oihw.shape[0], w_oihw.shape[1]
    w = jnp.transpose(w_oihw, (2, 3, 1, 0))                      # (3,3,Cin,Cout)
    w = w * scale[None, None, None, :]                           # fold BN (f32)
    w = jnp.pad(w, ((0, 0), (0, 0), (0, cp - cin), (0, cp - cout)))
    return w.reshape(9 * cp, cp).astype(jnp.bfloat16)


def basic_block_forward(x_nchw, params):
    """BasicBlock forward (stride=1, downsample=None). NCHW in / NCHW out."""
    N, C, H, W = x_nchw.shape
    Cp = _round_up(C, 128)                                       # lane-dense channels

    s1, b1 = _fold_bn(params["bn1_gamma"], params["bn1_beta"],
                      params["bn1_mean"], params["bn1_var"])
    s2, b2 = _fold_bn(params["bn2_gamma"], params["bn2_beta"],
                      params["bn2_mean"], params["bn2_var"])

    w1 = _prep_weight(params["conv1_w"], s1, Cp)
    w2 = _prep_weight(params["conv2_w"], s2, Cp)
    b1p = jnp.pad(b1, (0, Cp - C)).reshape(1, Cp).astype(jnp.float32)
    b2p = jnp.pad(b2, (0, Cp - C)).reshape(1, Cp).astype(jnp.float32)

    # NCHW -> NHWC, zero-pad channels to Cp, bf16 at the kernel boundary.
    x = jnp.transpose(x_nchw, (0, 2, 3, 1))
    x = jnp.pad(x, ((0, 0), (0, 0), (0, 0), (0, Cp - C))).astype(jnp.bfloat16)

    out = pl.pallas_call(
        _fused_basic_block_kernel,
        out_shape=jax.ShapeDtypeStruct((N, H, W, Cp), jnp.float32),
        grid=(N,),
        in_specs=[
            pl.BlockSpec((1, H, W, Cp), lambda n: (n, 0, 0, 0)),
            pl.BlockSpec((9 * Cp, Cp), lambda n: (0, 0)),   # constant idx: resident
            pl.BlockSpec((1, Cp), lambda n: (0, 0)),
            pl.BlockSpec((9 * Cp, Cp), lambda n: (0, 0)),
            pl.BlockSpec((1, Cp), lambda n: (0, 0)),
        ],
        out_specs=pl.BlockSpec((1, H, W, Cp), lambda n: (n, 0, 0, 0)),
        scratch_shapes=[pltpu.VMEM((H + 2, W + 2, Cp), jnp.float32)],
        compiler_params=pltpu.CompilerParams(
            dimension_semantics=("parallel",)),
    )(x, w1, b1p, w2, b2p)

    out = out[..., :C]                                           # drop channel pad
    return jnp.transpose(out, (0, 3, 1, 2))                      # NHWC -> NCHW


# ------------------------------ pure-JAX ref -------------------------------- #

def _reference_basic_block(x, params, eps=1e-5):
    def conv(x, w):
        return jax.lax.conv_general_dilated(
            x, w, window_strides=(1, 1), padding=((1, 1), (1, 1)),
            dimension_numbers=("NCHW", "OIHW", "NCHW"))

    def bn(x, g, b, m, v):
        inv = g / jnp.sqrt(v + eps)
        return x * inv[None, :, None, None] + (b - m * inv)[None, :, None, None]

    out = conv(x, params["conv1_w"])
    out = jax.nn.relu(bn(out, params["bn1_gamma"], params["bn1_beta"],
                         params["bn1_mean"], params["bn1_var"]))
    out = conv(out, params["conv2_w"])
    out = bn(out, params["bn2_gamma"], params["bn2_beta"],
             params["bn2_mean"], params["bn2_var"]) + x
    return jax.nn.relu(out)


# ---------------------------------- main ------------------------------------ #

if __name__ == "__main__":
    N, C, H, W = 2, 4, 16, 16          # inplanes = planes = 4, stride = 1
    inplanes = planes = C

    key = jax.random.PRNGKey(0)
    keys = jax.random.split(key, 8)

    x = jax.random.normal(keys[0], (N, C, H, W), jnp.float32)

    params = {
        "conv1_w": 0.1 * jax.random.normal(keys[1], (planes, inplanes, 3, 3), jnp.float32),
        "conv2_w": 0.1 * jax.random.normal(keys[2], (planes, planes, 3, 3), jnp.float32),
        "bn1_gamma": 1.0 + 0.05 * jax.random.normal(keys[3], (planes,), jnp.float32),
        "bn1_beta": 0.05 * jax.random.normal(keys[4], (planes,), jnp.float32),
        "bn1_mean": 0.01 * jnp.arange(planes, dtype=jnp.float32),
        "bn1_var": jnp.ones((planes,), jnp.float32),
        "bn2_gamma": 1.0 + 0.05 * jax.random.normal(keys[5], (planes,), jnp.float32),
        "bn2_beta": 0.05 * jax.random.normal(keys[6], (planes,), jnp.float32),
        "bn2_mean": 0.02 * jnp.arange(planes, dtype=jnp.float32),
        "bn2_var": jnp.ones((planes,), jnp.float32),
    }

    out = jax.block_until_ready(basic_block_forward(x, params))
    assert out.shape == (N, planes, H, W), out.shape
    assert out.dtype == jnp.float32

    # Sanity check vs an f32 XLA reference (bf16 MXU inputs, f32 accumulation).
    ref = _reference_basic_block(x, params)
    max_err = float(jnp.max(jnp.abs(out - ref)))
    assert max_err < 1e-1, f"max abs error {max_err}"

    print("KERNEL_OK")
</pallas_src>

<mosaic_0001>
module attributes {stable_mosaic.version = 11 : i64} {
  func.func @_fused_basic_block_kernel(%arg0: i32, %arg1: memref<1x16x16x128xbf16, #tpu.memory_space<vmem>>, %arg2: memref<1152x128xbf16, #tpu.memory_space<vmem>>, %arg3: memref<1x128xf32, #tpu.memory_space<vmem>>, %arg4: memref<1152x128xbf16, #tpu.memory_space<vmem>>, %arg5: memref<1x128xf32, #tpu.memory_space<vmem>>, %arg6: memref<1x16x16x128xf32, #tpu.memory_space<vmem>>, %arg7: memref<18x18x128xf32, #tpu.memory_space<vmem>>) attributes {dimension_semantics = [#tpu.dimension_semantics<parallel>], iteration_bounds = array<i64: 2>, scalar_prefetch = 0 : i64, scratch_operands = 1 : i64, tpu.core_type = #tpu.core_type<tc>, window_params = [{transform_indices = @transform_0, window_bounds = array<i64: 1, 16, 16, 128>}, {pipeline_mode = #tpu.pipeline_mode<synchronous>, transform_indices = @transform_1, window_bounds = array<i64: 1152, 128>}, {pipeline_mode = #tpu.pipeline_mode<synchronous>, transform_indices = @transform_2, window_bounds = array<i64: 1, 128>}, {pipeline_mode = #tpu.pipeline_mode<synchronous>, transform_indices = @transform_3, window_bounds = array<i64: 1152, 128>}, {pipeline_mode = #tpu.pipeline_mode<synchronous>, transform_indices = @transform_4, window_bounds = array<i64: 1, 128>}, {transform_indices = @transform_5, window_bounds = array<i64: 1, 16, 16, 128>}]} {
    %c0 = arith.constant 0 : index
    %c0_0 = arith.constant 0 : index
    %c0_1 = arith.constant 0 : index
    %c0_2 = arith.constant 0 : index
    %0 = vector.load %arg1[%c0, %c0_0, %c0_1, %c0_2] : memref<1x16x16x128xbf16, #tpu.memory_space<vmem>>, vector<1x16x16x128xbf16>
    %1 = vector.shape_cast %0 : vector<1x16x16x128xbf16> to vector<16x16x128xbf16>
    %cst = arith.constant 0.000000e+00 : f32
    %2 = vector.broadcast %cst : f32 to vector<18x18x128xf32>
    %c0_3 = arith.constant 0 : index
    %c0_4 = arith.constant 0 : index
    %c0_5 = arith.constant 0 : index
    %3 = vector.load %arg7[%c0_3, %c0_4, %c0_5] : memref<18x18x128xf32, #tpu.memory_space<vmem>>, vector<18x18x128xf32>
    tpu.vector_store %arg7[%c0_3, %c0_4, %c0_5], %2 {strides = array<i32>} : memref<18x18x128xf32, #tpu.memory_space<vmem>>, vector<18x18x128xf32>,
    %4 = arith.extf %1 : vector<16x16x128xbf16> to vector<16x16x128xf32>
    %c1 = arith.constant 1 : index
    %c1_6 = arith.constant 1 : index
    %c0_7 = arith.constant 0 : index
    %5 = vector.load %arg7[%c1, %c1_6, %c0_7] : memref<18x18x128xf32, #tpu.memory_space<vmem>>, vector<16x16x128xf32>
    tpu.vector_store %arg7[%c1, %c1_6, %c0_7], %4 {strides = array<i32>} : memref<18x18x128xf32, #tpu.memory_space<vmem>>, vector<16x16x128xf32>,
    %c0_8 = arith.constant 0 : index
    %c0_9 = arith.constant 0 : index
    %c0_10 = arith.constant 0 : index
    %6 = vector.load %arg7[%c0_8, %c0_9, %c0_10] : memref<18x18x128xf32, #tpu.memory_space<vmem>>, vector<18x18x128xf32>
    %7 = vector.extract_strided_slice %6 {offsets = [0, 0, 0], sizes = [16, 16, 128], strides = [1, 1, 1]} : vector<18x18x128xf32> to vector<16x16x128xf32>
    %8 = vector.shape_cast %7 : vector<16x16x128xf32> to vector<256x128xf32>
    %9 = vector.extract_strided_slice %6 {offsets = [0, 1, 0], sizes = [16, 16, 128], strides = [1, 1, 1]} : vector<18x18x128xf32> to vector<16x16x128xf32>
    %10 = vector.shape_cast %9 : vector<16x16x128xf32> to vector<256x128xf32>
    %11 = vector.extract_strided_slice %6 {offsets = [0, 2, 0], sizes = [16, 16, 128], strides = [1, 1, 1]} : vector<18x18x128xf32> to vector<16x16x128xf32>
    %12 = vector.shape_cast %11 : vector<16x16x128xf32> to vector<256x128xf32>
    %13 = vector.extract_strided_slice %6 {offsets = [1, 0, 0], sizes = [16, 16, 128], strides = [1, 1, 1]} : vector<18x18x128xf32> to vector<16x16x128xf32>
    %14 = vector.shape_cast %13 : vector<16x16x128xf32> to vector<256x128xf32>
    %15 = vector.extract_strided_slice %6 {offsets = [1, 1, 0], sizes = [16, 16, 128], strides = [1, 1, 1]} : vector<18x18x128xf32> to vector<16x16x128xf32>
    %16 = vector.shape_cast %15 : vector<16x16x128xf32> to vector<256x128xf32>
    %17 = vector.extract_strided_slice %6 {offsets = [1, 2, 0], sizes = [16, 16, 128], strides = [1, 1, 1]} : vector<18x18x128xf32> to vector<16x16x128xf32>
    %18 = vector.shape_cast %17 : vector<16x16x128xf32> to vector<256x128xf32>
    %19 = vector.extract_strided_slice %6 {offsets = [2, 0, 0], sizes = [16, 16, 128], strides = [1, 1, 1]} : vector<18x18x128xf32> to vector<16x16x128xf32>
    %20 = vector.shape_cast %19 : vector<16x16x128xf32> to vector<256x128xf32>
    %21 = vector.extract_strided_slice %6 {offsets = [2, 1, 0], sizes = [16, 16, 128], strides = [1, 1, 1]} : vector<18x18x128xf32> to vector<16x16x128xf32>
    %22 = vector.shape_cast %21 : vector<16x16x128xf32> to vector<256x128xf32>
    %23 = vector.extract_strided_slice %6 {offsets = [2, 2, 0], sizes = [16, 16, 128], strides = [1, 1, 1]} : vector<18x18x128xf32> to vector<16x16x128xf32>
    %24 = vector.shape_cast %23 : vector<16x16x128xf32> to vector<256x128xf32>
    %25 = tpu.concatenate %8, %10, %12, %14, %16, %18, %20, %22, %24 in 1 : vector<256x128xf32>, vector<256x128xf32>, vector<256x128xf32>, vector<256x128xf32>, vector<256x128xf32>, vector<256x128xf32>, vector<256x128xf32>, vector<256x128xf32>, vector<256x128xf32> -> vector<256x1152xf32>
    %26 = arith.truncf %25 : vector<256x1152xf32> to vector<256x1152xbf16>
    %c0_11 = arith.constant 0 : index
    %c0_12 = arith.constant 0 : index
    %27 = vector.load %arg2[%c0_11, %c0_12] : memref<1152x128xbf16, #tpu.memory_space<vmem>>, vector<1152x128xbf16>
    %cst_13 = arith.constant dense<0.000000e+00> : vector<256x128xf32>
    %28 = tpu.matmul %26, %27, %cst_13 {dimension_numbers = #tpu.dot_dimension_numbers<[1], [0], [0], [1], [0, 0, 1, 1], [], []>} : vector<256x1152xbf16>, vector<1152x128xbf16>, vector<256x128xf32> -> vector<256x128xf32>
    %c0_14 = arith.constant 0 : index
    %c0_15 = arith.constant 0 : index
    %29 = vector.load %arg3[%c0_14, %c0_15] : memref<1x128xf32, #tpu.memory_space<vmem>>, vector<1x128xf32>
    %30 = vector.broadcast %29 : vector<1x128xf32> to vector<256x128xf32>
    %31 = arith.addf %28, %30 : vector<256x128xf32>
    %cst_16 = arith.constant 0.000000e+00 : f32
    %32 = vector.broadcast %cst_16 : f32 to vector<256x128xf32>
    %33 = arith.maximumf %31, %32 : vector<256x128xf32>
    %34 = vector.shape_cast %33 : vector<256x128xf32> to vector<16x16x128xf32>
    %c1_17 = arith.constant 1 : index
    %c1_18 = arith.constant 1 : index
    %c0_19 = arith.constant 0 : index
    %35 = vector.load %arg7[%c1_17, %c1_18, %c0_19] : memref<18x18x128xf32, #tpu.memory_space<vmem>>, vector<16x16x128xf32>
    tpu.vector_store %arg7[%c1_17, %c1_18, %c0_19], %34 {strides = array<i32>} : memref<18x18x128xf32, #tpu.memory_space<vmem>>, vector<16x16x128xf32>,
    %c0_20 = arith.constant 0 : index
    %c0_21 = arith.constant 0 : index
    %c0_22 = arith.constant 0 : index
    %36 = vector.load %arg7[%c0_20, %c0_21, %c0_22] : memref<18x18x128xf32, #tpu.memory_space<vmem>>, vector<18x18x128xf32>
    %37 = vector.extract_strided_slice %36 {offsets = [0, 0, 0], sizes = [16, 16, 128], strides = [1, 1, 1]} : vector<18x18x128xf32> to vector<16x16x128xf32>
    %38 = vector.shape_cast %37 : vector<16x16x128xf32> to vector<256x128xf32>
    %39 = vector.extract_strided_slice %36 {offsets = [0, 1, 0], sizes = [16, 16, 128], strides = [1, 1, 1]} : vector<18x18x128xf32> to vector<16x16x128xf32>
    %40 = vector.shape_cast %39 : vector<16x16x128xf32> to vector<256x128xf32>
    %41 = vector.extract_strided_slice %36 {offsets = [0, 2, 0], sizes = [16, 16, 128], strides = [1, 1, 1]} : vector<18x18x128xf32> to vector<16x16x128xf32>
    %42 = vector.shape_cast %41 : vector<16x16x128xf32> to vector<256x128xf32>
    %43 = vector.extract_strided_slice %36 {offsets = [1, 0, 0], sizes = [16, 16, 128], strides = [1, 1, 1]} : vector<18x18x128xf32> to vector<16x16x128xf32>
    %44 = vector.shape_cast %43 : vector<16x16x128xf32> to vector<256x128xf32>
    %45 = vector.extract_strided_slice %36 {offsets = [1, 1, 0], sizes = [16, 16, 128], strides = [1, 1, 1]} : vector<18x18x128xf32> to vector<16x16x128xf32>
    %46 = vector.shape_cast %45 : vector<16x16x128xf32> to vector<256x128xf32>
    %47 = vector.extract_strided_slice %36 {offsets = [1, 2, 0], sizes = [16, 16, 128], strides = [1, 1, 1]} : vector<18x18x128xf32> to vector<16x16x128xf32>
    %48 = vector.shape_cast %47 : vector<16x16x128xf32> to vector<256x128xf32>
    %49 = vector.extract_strided_slice %36 {offsets = [2, 0, 0], sizes = [16, 16, 128], strides = [1, 1, 1]} : vector<18x18x128xf32> to vector<16x16x128xf32>
    %50 = vector.shape_cast %49 : vector<16x16x128xf32> to vector<256x128xf32>
    %51 = vector.extract_strided_slice %36 {offsets = [2, 1, 0], sizes = [16, 16, 128], strides = [1, 1, 1]} : vector<18x18x128xf32> to vector<16x16x128xf32>
    %52 = vector.shape_cast %51 : vector<16x16x128xf32> to vector<256x128xf32>
    %53 = vector.extract_strided_slice %36 {offsets = [2, 2, 0], sizes = [16, 16, 128], strides = [1, 1, 1]} : vector<18x18x128xf32> to vector<16x16x128xf32>
    %54 = vector.shape_cast %53 : vector<16x16x128xf32> to vector<256x128xf32>
    %55 = tpu.concatenate %38, %40, %42, %44, %46, %48, %50, %52, %54 in 1 : vector<256x128xf32>, vector<256x128xf32>, vector<256x128xf32>, vector<256x128xf32>, vector<256x128xf32>, vector<256x128xf32>, vector<256x128xf32>, vector<256x128xf32>, vector<256x128xf32> -> vector<256x1152xf32>
    %56 = arith.truncf %55 : vector<256x1152xf32> to vector<256x1152xbf16>
    %c0_23 = arith.constant 0 : index
    %c0_24 = arith.constant 0 : index
    %57 = vector.load %arg4[%c0_23, %c0_24] : memref<1152x128xbf16, #tpu.memory_space<vmem>>, vector<1152x128xbf16>
    %cst_25 = arith.constant dense<0.000000e+00> : vector<256x128xf32>
    %58 = tpu.matmul %56, %57, %cst_25 {dimension_numbers = #tpu.dot_dimension_numbers<[1], [0], [0], [1], [0, 0, 1, 1], [], []>} : vector<256x1152xbf16>, vector<1152x128xbf16>, vector<256x128xf32> -> vector<256x128xf32>
    %c0_26 = arith.constant 0 : index
    %c0_27 = arith.constant 0 : index
    %59 = vector.load %arg5[%c0_26, %c0_27] : memref<1x128xf32, #tpu.memory_space<vmem>>, vector<1x128xf32>
    %60 = vector.broadcast %59 : vector<1x128xf32> to vector<256x128xf32>
    %61 = arith.addf %58, %60 : vector<256x128xf32>
    %62 = arith.extf %1 : vector<16x16x128xbf16> to vector<16x16x128xf32>
    %63 = vector.shape_cast %62 : vector<16x16x128xf32> to vector<256x128xf32>
    %64 = arith.addf %61, %63 : vector<256x128xf32>
    %cst_28 = arith.constant 0.000000e+00 : f32
    %65 = vector.broadcast %cst_28 : f32 to vector<256x128xf32>
    %66 = arith.maximumf %64, %65 : vector<256x128xf32>
    %67 = vector.shape_cast %66 : vector<256x128xf32> to vector<16x16x128xf32>
    %c0_29 = arith.constant 0 : index
    %c0_30 = arith.constant 0 : index
    %c0_31 = arith.constant 0 : index
    %c0_32 = arith.constant 0 : index
    %68 = vector.load %arg6[%c0_29, %c0_30, %c0_31, %c0_32] : memref<1x16x16x128xf32, #tpu.memory_space<vmem>>, vector<1x16x16x128xf32>
    %69 = vector.shape_cast %68 : vector<1x16x16x128xf32> to vector<16x16x128xf32>
    %70 = vector.shape_cast %67 : vector<16x16x128xf32> to vector<1x16x16x128xf32>
    tpu.vector_store %arg6[%c0_29, %c0_30, %c0_31, %c0_32], %70 {strides = array<i32>} : memref<1x16x16x128xf32, #tpu.memory_space<vmem>>, vector<1x16x16x128xf32>,
    return
  }
  func.func @transform_0(%arg0: i32) -> (i32, i32, i32, i32) {
    %c0_i32 = arith.constant 0 : i32
    %c0_i32_0 = arith.constant 0 : i32
    %c0_i32_1 = arith.constant 0 : i32
    %c0_i32_2 = arith.constant 0 : i32
    return %arg0, %c0_i32, %c0_i32_0, %c0_i32_1 : i32, i32, i32, i32
  }
  func.func @transform_1(%arg0: i32) -> (i32, i32) {
    %c0_i32 = arith.constant 0 : i32
    %c0_i32_0 = arith.constant 0 : i32
    %c0_i32_1 = arith.constant 0 : i32
    return %c0_i32, %c0_i32_0 : i32, i32
  }
  func.func @transform_2(%arg0: i32) -> (i32, i32) {
    %c0_i32 = arith.constant 0 : i32
    %c0_i32_0 = arith.constant 0 : i32
    %c0_i32_1 = arith.constant 0 : i32
    return %c0_i32, %c0_i32_0 : i32, i32
  }
  func.func @transform_3(%arg0: i32) -> (i32, i32) {
    %c0_i32 = arith.constant 0 : i32
    %c0_i32_0 = arith.constant 0 : i32
    %c0_i32_1 = arith.constant 0 : i32
    return %c0_i32, %c0_i32_0 : i32, i32
  }
  func.func @transform_4(%arg0: i32) -> (i32, i32) {
    %c0_i32 = arith.constant 0 : i32
    %c0_i32_0 = arith.constant 0 : i32
    %c0_i32_1 = arith.constant 0 : i32
    return %c0_i32, %c0_i32_0 : i32, i32
  }
  func.func @transform_5(%arg0: i32) -> (i32, i32, i32, i32) {
    %c0_i32 = arith.constant 0 : i32
    %c0_i32_0 = arith.constant 0 : i32
    %c0_i32_1 = arith.constant 0 : i32
    %c0_i32_2 = arith.constant 0 : i32
    return %arg0, %c0_i32, %c0_i32_0, %c0_i32_1 : i32, i32, i32, i32
  }
}

</mosaic_0001>

<bundles_post_ra>
// kernel: tpu_custom_call.1
= control target key start
LH: loop header
LB: loop body
LE: loop exit
PB: predicated region body
PF: predicated region fallthrough
CT: control target
= control target key end

     0   :  { %10 = vsyncpa [#allocation4], 0  ;;  %s8308_s0 = inlined_call_operand.hbm [shape: bf16[2,16,16,128], index: 0, kind: input, shape index: {}]   ;;  %s8309_s1 = inlined_call_operand.hbm [shape: bf16[1152,128], index: 1, kind: input, shape index: {}]   ;;  %s8310_s2 = inlined_call_operand.vmem [shape: f32[1,128], index: 2, kind: input, shape index: {}]   ;;  %s8311_s3 = inlined_call_operand.hbm [shape: bf16[1152,128], index: 3, kind: input, shape index: {}]   ;;  %s8312_s4 = inlined_call_operand.vmem [shape: f32[1,128], index: 4, kind: input, shape index: {}]   ;;  %s8313_s5 = inlined_call_operand.hbm [shape: f32[2,16,16,128], index: 5, kind: output, shape index: {}]  }
   0x1   :  { %12 = vsyncpa [#allocation4 + $0x1], 0 }
   0x2   :  { %13 = vsyncpa [#allocation7], 0 }
   0x3   :  { %14 = vsyncpa [#allocation5], 0 }
   0x4   :  { %16 = vsyncpa [#allocation5 + $0x1], 0  ;;  %s5989_s18 = smov 0   ;;  %s5991_s19 = smov 0  }
   0x5   :  { %s5993_s20 = smov 0   ;;  %s5995_s21 = smov 0  }
   0x6 LB: > { %s6010_s22 = sadd.s32 4294967295, %s5947_s21   ;;  %s4296_s23 = sadd.s32 4294967294, %s5947_s21   ;;  %s5947_s21 = sphi %s5995_s21, %s8634_s21   ;;  %s5943_s20 = sphi %s5993_s20, %s8633_s20   ;;  %s5939_s19 = sphi %s5991_s19, %s8632_s19   ;;  %s5935_s18 = sphi %s5989_s18, %s8631_s18  }
   0x7   : > { %p42_p0 = scmp.ne.s32.totalorder %s5939_s19, %s5935_s18  ;;  %p8314_p1 = scmp.eq.s32.totalorder %s6010_s22, 0 }
   0x8   : > { %p150_p2 = scmp.eq.s32.totalorder %s6010_s22, 1  ;;  %p156_p3 = scmp.eq.s32.totalorder %s4296_s23, 1 }
   0x9   : > { %p6019_p4 = por %p8314_p1, %p42_p0  ;;  %p4297_p5 = scmp.ge.s32.totalorder %s5947_s21, 1 }
   0xa   : > { %p6024_p6 = por %p156_p3, %p42_p0  ;;  %p163_p7 = scmp.lt.s32.totalorder %s5947_s21, 3 }
   0xb   : > { %s8384_s24 = scalar_select %p6019_p4, 1, 0 }
   0xc   : > { %s8385_s25 = scalar_select %p6024_p6, 1, 0 }
   0xd   : > { %p6029_p8 = pnand %p4297_p5, %p163_p7  ;;  %s5949_s27 = smov [#allocation6]  }
   0xe   : > { %s175_s28 = sshll.u32 %s5949_s27, 4  ;;  %s5950_s30 = smov [#allocation8]   ;;  %s176_s28 = int_to_ptr.vmem [resolvable:$true] %s175_s28 }
   0xf   : > { %s8386_s26 = scalar_select %p6029_p8, 1, 0 }
  0x10   : > { %p5593_p9 = pneg %p6029_p8  ;;  %s191_s6 = sshll.u32 %s5950_s30, 4  ;;  %s192_s6 = int_to_ptr.vmem [resolvable:$true] %s191_s6 }
  0x11   : > { %s5810_s7 = scalar_lea.vmem %s176_s28, 9216  ;;  %p5818_p5 = scmp.lt.s32.totalorder %s176_s28, %s176_s28 }
  0x12   : > { %p6038_p11 = pnand %p5593_p9, %p8314_p1  ;;  %p5811_p13 = scmp.ne.s32.totalorder %s176_s28, %s5810_s7 }
  0x13   : > { %p5819_p7 = scmp.lt.s32.totalorder %s5810_s7, %s5810_s7 }
  0x14   : > { %p5801_p12 = pneg %p6038_p11 }
  0x15   : > { %p5820_p10 = por %p5819_p7, %p5818_p5 }
  0x16   : > { %p5813_p0 = pnand %p5811_p13, %p5801_p12 }
  0x18   : > { %p5814_p3 = pneg %p5813_p0 }
  0x1a   : > { %p5821_p9 = pnand %p5820_p10, %p5814_p3 }
  0x1c   : > { %5824 = shalt.err (!%p5821_p9)
}
  0x1d   : > { %s8315_s8 = smov 64   ;;  %s5952_s9 = smov 4  }
  0x1e   : > { %5596 = dma.hbm_to_vmem [thread:$0]  (!%p6038_p11), %s8309_s1, 9216, %s176_s28, [#allocation7], %s8315_s8, %s8315_s8, %s5952_s9  }
  0x1f   : > { %s5836_s12 = scalar_lea.vmem %s192_s6, 9216  ;;  %p5844_p10 = scmp.lt.s32.totalorder %s192_s6, %s192_s6 }
  0x20   : > { %p5837_p13 = scmp.ne.s32.totalorder %s192_s6, %s5836_s12  ;;  %p5845_p3 = scmp.lt.s32.totalorder %s5836_s12, %s5836_s12 }
  0x22   : > { %p5839_p0 = pnand %p5837_p13, %p5801_p12  ;;  %p5846_p7 = por %p5845_p3, %p5844_p10 }
  0x24   : > { %p5840_p5 = pneg %p5839_p0 }
  0x26   : > { %p5847_p9 = pnand %p5846_p7, %p5840_p5 }
  0x28   : > { %5850 = shalt.err (!%p5847_p9)
}
  0x29   : > { %5599 = dma.hbm_to_vmem [thread:$0]  (!%p6038_p11), %s8311_s3, 9216, %s192_s6, [#allocation7], %s8315_s8, %s8315_s8, %s5952_s9  }
  0x2a   : > { %s6067_s15 = sadd.s32 1, %s5947_s21   ;;  %s29_s16 = sadd.s32 1, %s5943_s20 }
  0x2b   : > { %s26_s17 = ssub.s32 %s5947_s21, %s6067_s15  ;;  %p36_p12 = scmp.ne.s32.totalorder %s5943_s20, %s5939_s19 }
  0x2c   : > { %p27_p13 = scmp.eq.s32.totalorder %s26_s17, 0  ;;  %p37_p0 = scmp.eq.s32.totalorder %s5947_s21, 0 }
  0x2d   : > { %p6077_p5 = por %p150_p2, %p36_p12  ;;  %p5610_p10 = scmp.lt.s32.totalorder %s5947_s21, 2 }
  0x2e   : > { %s6083_s27 = scalar_select %p27_p13, %s5943_s20, %s29_s16  }
  0x2f   : > { %s8388_s23 = scalar_select %p6077_p5, 1, 0 }
  0x30   : > { %p38_p3 = por %p37_p0, %p36_p12  ;;  %s208_s28 = sand.u32 1, %s5943_s20  }
  0x31   : > { %s4301_s29 = sshll.u32 %s208_s28, 7  ;;  %s4460_s30 = sshll.u32 %s5947_s21, 11 }
  0x32   : > { %s6090_s10 = scalar_lea.hbm %s8308_s0, %s4460_s30  ;;  %s212_s11 = scalar_lea.vmem [#allocation3], %s4301_s29 }
  0x33   : > { %s219_s12 = sshll.u32 %s212_s11, 4  ;;  %p6094_p2 = pnand %p5610_p10, %p38_p3  ;;  %s6092_s12 = int_to_ptr.vmem [resolvable:$true] %s219_s12 }
  0x34   : > { %s6098_s14 = scalar_lea.sflag [#allocation4], %s208_s28  ;;  %s5851_s16 = scalar_lea.hbm %s6090_s10, 2048 }
  0x35   : > { %p5852_p11 = scmp.ne.s32.totalorder %s6090_s10, %s5851_s16  ;;  %p5853_p7 = pneg %p6094_p2 }
  0x36   : > { %s5856_s29 = scalar_lea.hbm %s8308_s0, 4096  ;;  %p5857_p13 = scmp.lt.s32.totalorder %s6090_s10, %s8308_s0 }
  0x37   : > { %p5854_p9 = pnand %p5853_p7, %p5852_p11  ;;  %p5858_p0 = scmp.lt.s32.totalorder %s5856_s29, %s5851_s16 }
  0x39   : > { %p5855_p12 = pneg %p5854_p9  ;;  %p5859_p10 = por %p5858_p0, %p5857_p13 }
  0x3b   : > { %p5860_p3 = pnand %p5859_p10, %p5855_p12 }
  0x3d   : > { %5863 = shalt.err (!%p5860_p3)
}
  0x3e   : > { %s5864_s28 = scalar_lea.vmem %s6092_s12, 2048  ;;  %s5953_s11 = smov [#allocation3]  }
  0x3f   : > { %p5865_p1 = scmp.ne.s32.totalorder %s6092_s12, %s5864_s28  ;;  %s5869_s8 = sshll.u32 %s5953_s11, 4  ;;  %s5870_s8 = int_to_ptr.vmem [resolvable:$false] %s5869_s8 }
  0x40   : > { %s5871_s17 = scalar_lea.vmem %s5870_s8, 4096  ;;  %p5872_p9 = scmp.lt.s32.totalorder %s6092_s12, %s5870_s8 }
  0x41   : > { %p5867_p6 = pnand %p5865_p1, %p5853_p7  ;;  %p5873_p5 = scmp.lt.s32.totalorder %s5871_s17, %s5864_s28 }
  0x43   : > { %p5868_p11 = pneg %p5867_p6  ;;  %p5874_p4 = por %p5873_p5, %p5872_p9 }
  0x45   : > { %p5875_p8 = pnand %p5874_p4, %p5868_p11 }
  0x47   : > { %5878 = shalt.err (!%p5875_p8)
}
  0x48   : > { %s8390_s16 = smov 64   ;;  %p8391_p1 = scmp.ne.s32.totalorder %s8386_s26, 0 }
  0x49   : > { %5603 = dma.hbm_to_vmem [thread:$0]  (!%p6094_p2), %s6090_s10, 2048, %s6092_s12, %s6098_s14, %s8390_s16, %s8390_s16, %s5952_s9  }
  0x4a   : > { %231 = sbr.rel (%p8391_p1) target bundleno = 1118 (0x45e), region = 40 }
  0x4f   : > { %s6125_s30 = sand.u32 1, %s5939_s19   ;;  %p8392_p4 = scmp.ne.s32.totalorder %s8384_s24, 0 }
  0x50   : > { %s4305_s8 = sshll.u32 %s6125_s30, 7  ;;  %s234_s29 = scalar_lea.sflag [#allocation4], %s6125_s30 }
  0x51   : > { %s6129_s6 = scalar_lea.vmem [#allocation3], %s4305_s8 }
  0x52   : > { %5922 = dma.done.wait (%p8392_p4), %s234_s29, 2048  }
  0x53   : > { %5924 = vsyncadd (%p8392_p4), %s234_s29, 4294965248  ;;  %p8393_p6 = scmp.eq.s32.totalorder %s6010_s22, 0 }
  0x55   : > { %5926 = dma.done.wait (%p8393_p6), [#allocation7], 18432   ;;  %p8394_p8 = pmov %p8393_p6 }
  0x56   : > { %v5954_v0 = vmov 0.0   ;;  %v5653_v1 = vld [vmem:[#allocation6 + $0x78] sm:$0xff]   ;;  %v5657_v5 = vld [vmem:[#allocation6 + $0x70] sm:$0xff]   ;;  %v5661_v9 = vld [vmem:[#allocation6 + $0x68] sm:$0xff]   ;;  %vm526_vm0 = vcmask 1046528   ;;  %vm639_vm1 = vcmask 1045504  }
  0x57   : > { %5928 = vsyncadd (%p8394_p8), [#allocation7], 4294948864  ;;  %305 = vst [vmem:[#allocation2] sm:$0xff] %v5954_v0  ;;  %v5654_v2 = vld [vmem:[#allocation6 + $0x38] sm:$0xff]   ;;  %4541 = vmatprep.subr.bf16.mxu0 %v5653_v1  ;;  %v5658_v6 = vld [vmem:[#allocation6 + $0x30] sm:$0xff]   ;;  %v527_v30 = vrot.slane %v5954_v0, 1 }
  0x58   : > { %307 = vst [vmem:[#allocation2 + $0x10] sm:$0x3] %v5954_v0  ;;  %308 = vst [vmem:[#allocation2 + $0x18] sm:$0xff] %v5954_v0  ;;  %v5655_v3 = vld [vmem:[#allocation6 + $0xf8] sm:$0xff]   ;;  %4542 = vmatpush3.bf16.msra.mxu0 %v5654_v2  ;;  %v5659_v7 = vld [vmem:[#allocation6 + $0xf0] sm:$0xff]   ;;  %v6201_v44 = vrot.slane %v5954_v0, 2 }
  0x59   : > { %309 = vst [vmem:[#allocation2 + $0x20] sm:$0xff] %v5954_v0  ;;  %310 = vst [vmem:[#allocation2 + $0x28] sm:$0x3] %v5954_v0  ;;  %v5656_v4 = vld [vmem:[#allocation6 + $0xb8] sm:$0xff]   ;;  %4653 = vmatprep.subr.bf16.mxu1 %v5655_v3  ;;  %4543 = vmatprep.subr.bf16.mxu0 %v5657_v5  ;;  %v5660_v8 = vld [vmem:[#allocation6 + $0xb0] sm:$0xff]   ;;  %v5955_v53 = vmov 0.0|0.0  }
  0x5a   : > { %311 = vst [vmem:[#allocation2 + $0x30] sm:$0xff] %v5954_v0  ;;  %312 = vst [vmem:[#allocation2 + $0x38] sm:$0xff] %v5954_v0  ;;  %4654 = vmatpush3.bf16.msra.mxu1 %v5656_v4  ;;  %v5662_v10 = vld [vmem:[#allocation6 + $0x28] sm:$0xff]   ;;  %v5665_v13 = vld [vmem:[#allocation6 + $0x60] sm:$0xff]   ;;  %s4308_s12 = sshll.u32 %s6125_s30, 8  ;;  %s4461_s14 = sshll.u32 %s6010_s22, 12 }
  0x5b   : > { %313 = vst [vmem:[#allocation2 + $0x40] sm:$0x3] %v5954_v0  ;;  %314 = vst [vmem:[#allocation2 + $0x48] sm:$0xff] %v5954_v0  ;;  %4655 = vmatprep.subr.bf16.mxu1 %v5659_v7  ;;  %v5663_v11 = vld [vmem:[#allocation6 + $0xe8] sm:$0xff]   ;;  %v5666_v14 = vld [vmem:[#allocation6 + $0x20] sm:$0xff]   ;;  %s8070_s13 = scalar_lea.vmem [#allocation9], %s4308_s12  ;;  %s8261_s17 = scalar_lea.hbm %s8313_s5, %s4461_s14 }
  0x5c   : > { %315 = vst [vmem:[#allocation2 + $0x50] sm:$0xff] %v5954_v0  ;;  %316 = vst [vmem:[#allocation2 + $0x58] sm:$0x3] %v5954_v0  ;;  %4544 = vmatpush3.bf16.msra.mxu0 %v5658_v6  ;;  %v5664_v12 = vld [vmem:[#allocation6 + $0xa8] sm:$0xff]   ;;  %v5667_v15 = vld [vmem:[#allocation6 + $0xe0] sm:$0xff]   ;;  %s4204_s7 = sshll.u32 %s8070_s13, 4  ;;  %s8263_s7 = int_to_ptr.vmem [resolvable:$true] %s4204_s7 }
  0x5d   : > { %317 = vst [vmem:[#allocation2 + $0x60] sm:$0xff] %v5954_v0  ;;  %318 = vst [vmem:[#allocation2 + $0x68] sm:$0xff] %v5954_v0  ;;  %4545 = vmatprep.subr.bf16.mxu0 %v5661_v9  ;;  %v5668_v16 = vld [vmem:[#allocation6 + $0xa0] sm:$0xff]   ;;  %v5669_v17 = vld [vmem:[#allocation6 + $0x58] sm:$0xff]   ;;  %s4191_s22 = scalar_lea.sflag [#allocation5], %s6125_s30  ;;  %s5879_s16 = scalar_lea.vmem %s8263_s7, 4096 }
  0x5e   : > { %319 = vst [vmem:[#allocation2 + $0x70] sm:$0x3] %v5954_v0  ;;  %320 = vst [vmem:[#allocation2 + $0x78] sm:$0xff] %v5954_v0  ;;  %4656 = vmatpush3.bf16.msra.mxu1 %v5660_v8  ;;  %v5670_v18 = vld [vmem:[#allocation6 + $0x18] sm:$0xff]   ;;  %v5673_v21 = vld [vmem:[#allocation6 + $0x50] sm:$0xff]   ;;  %p5880_p5 = scmp.ne.s32.totalorder %s8263_s7, %s5879_s16  ;;  %p8628_p2 = scmp.ne.s32.totalorder %s8388_s23, 0 }
  0x5f   : > { %321 = vst [vmem:[#allocation2 + $0x80] sm:$0xff] %v5954_v0  ;;  %322 = vst [vmem:[#allocation2 + $0x88] sm:$0x3] %v5954_v0  ;;  %4657 = vmatprep.subr.bf16.mxu1 %v5663_v11  ;;  %v5671_v19 = vld [vmem:[#allocation6 + $0xd8] sm:$0xff]   ;;  %v5674_v22 = vld [vmem:[#allocation6 + $0x10] sm:$0xff]   ;;  %s5956_s8 = smov [#allocation9]  }
  0x60   : > { %323 = vst [vmem:[#allocation2 + $0x90] sm:$0xff] %v5954_v0  ;;  %324 = vst [vmem:[#allocation2 + $0x98] sm:$0xff] %v5954_v0  ;;  %4546 = vmatpush3.bf16.msra.mxu0 %v5662_v10  ;;  %v5672_v20 = vld [vmem:[#allocation6 + $0x98] sm:$0xff]   ;;  %v5675_v23 = vld [vmem:[#allocation6 + $0xd0] sm:$0xff]   ;;  %p5881_p7 = pnand %p5880_p5, %p8628_p2  ;;  %s5883_s29 = sshll.u32 %s5956_s8, 4  ;;  %s5884_s29 = int_to_ptr.vmem [resolvable:$false] %s5883_s29 }
  0x61   : > { %325 = vst [vmem:[#allocation2 + $0xa0] sm:$0x3] %v5954_v0  ;;  %326 = vst [vmem:[#allocation2 + $0xa8] sm:$0xff] %v5954_v0  ;;  %4547 = vmatprep.subr.bf16.mxu0 %v5665_v13  ;;  %v5676_v24 = vld [vmem:[#allocation6 + $0x90] sm:$0xff]   ;;  %v5677_v25 = vld [vmem:[#allocation6 + $0x48] sm:$0xff]   ;;  %p5886_p13 = scmp.lt.s32.totalorder %s8263_s7, %s5884_s29 }
  0x62   : > { %327 = vst [vmem:[#allocation2 + $0xb0] sm:$0xff] %v5954_v0  ;;  %328 = vst [vmem:[#allocation2 + $0xb8] sm:$0x3] %v5954_v0  ;;  %4658 = vmatpush3.bf16.msra.mxu1 %v5664_v12  ;;  %v5678_v26 = vld [vmem:[#allocation6 + $0x8] sm:$0xff]   ;;  %v5681_v29 = vld [vmem:[#allocation6 + $0x40] sm:$0xff]   ;;  %p5882_p12 = pneg %p5881_p7 }
  0x63   : > { %329 = vst [vmem:[#allocation2 + $0xc0] sm:$0xff] %v5954_v0  ;;  %330 = vst [vmem:[#allocation2 + $0xc8] sm:$0xff] %v5954_v0  ;;  %4659 = vmatprep.subr.bf16.mxu1 %v5667_v15  ;;  %v5679_v27 = vld [vmem:[#allocation6 + $0xc8] sm:$0xff]   ;;  %v5682_v31 = vld [vmem:[#allocation6] sm:$0xff]  }
  0x64   : > { %331 = vst [vmem:[#allocation2 + $0xd0] sm:$0x3] %v5954_v0  ;;  %332 = vst [vmem:[#allocation2 + $0xd8] sm:$0xff] %v5954_v0  ;;  %4548 = vmatpush3.bf16.msra.mxu0 %v5666_v14  ;;  %v5680_v28 = vld [vmem:[#allocation6 + $0x88] sm:$0xff]   ;;  %v5683_v32 = vld [vmem:[#allocation6 + $0xc0] sm:$0xff]  }
  0x65   : > { %333 = vst [vmem:[#allocation2 + $0xe0] sm:$0xff] %v5954_v0  ;;  %334 = vst [vmem:[#allocation2 + $0xe8] sm:$0x3] %v5954_v0  ;;  %4549 = vmatprep.subr.bf16.mxu0 %v5669_v17  ;;  %v426_v33 = vld [vmem:[#allocation2 + $0x10] sm:$0x3]  ;;  %v5685_v36 = vld [vmem:[#allocation6 + $0x178] sm:$0xff]  }
  0x66   : > { %335 = vst [vmem:[#allocation2 + $0xf0] sm:$0xff] %v5954_v0  ;;  %336 = vst [vmem:[#allocation2 + $0xf8] sm:$0xff] %v5954_v0  ;;  %4660 = vmatpush3.bf16.msra.mxu1 %v5668_v16  ;;  %v530_v34 = vrot.slane %v426_v33, 1  ;;  %v5684_v35 = vld [vmem:[#allocation6 + $0x80] sm:$0xff]   ;;  %v5686_v41 = vld [vmem:[#allocation6 + $0x138] sm:$0xff]   ;;  %v643_v48 = vrot.slane %v426_v33, 2 }
  0x67   : > { %337 = vst [vmem:[#allocation2 + $0x100] sm:$0x3] %v5954_v0  ;;  %338 = vst [vmem:[#allocation2 + $0x108] sm:$0xff] %v5954_v0  ;;  %4661 = vmatprep.subr.bf16.mxu1 %v5671_v19  ;;  %v6192_v37 = vld [vmem:[%s6129_s6] sm:$0xff]   ;;  %v6198_v42 = vld [vmem:[%s6129_s6 + $0x8] sm:$0xff]  }
  0x68   : > { %339 = vst [vmem:[#allocation2 + $0x110] sm:$0xff] %v5954_v0  ;;  %340 = vst [vmem:[#allocation2 + $0x118] sm:$0x3] %v5954_v0  ;;  %4550 = vmatpush3.bf16.msra.mxu0 %v5670_v18  ;;  %v531_v38 = vsel %vm526_vm0, %v527_v30, %v530_v34  ;;  %v8349_v39 = vunpack.c.l.bf16 %v6192_v37  ;;  %v8347_v40 = vunpack.c.h.bf16 %v6192_v37  ;;  %v8350_v45 = vunpack.c.l.bf16 %v6198_v42  ;;  %v5687_v47 = vld [vmem:[#allocation6 + $0x170] sm:$0xff]   ;;  %v6219_v52 = vld [vmem:[%s6129_s6 + $0x18] sm:$0xff]  }
  0x69   : > { %341 = vst [vmem:[#allocation2 + $0x120] sm:$0xff] %v5954_v0  ;;  %342 = vst [vmem:[#allocation2 + $0x128] sm:$0xff] %v5954_v0  ;;  %4551 = vmatprep.subr.bf16.mxu0 %v5673_v21  ;;  %v787_v43 = vpack.c.bf16 %v531_v38, %v527_v30  ;;  %v8348_v46 = vunpack.c.h.bf16 %v6198_v42  ;;  %v6210_v49 = vld [vmem:[%s6129_s6 + $0x10] sm:$0xff]   ;;  %v8346_v55 = vunpack.c.l.bf16 %v6219_v52  ;;  %v8344_v56 = vunpack.c.h.bf16 %v6219_v52  ;;  %v6224_v57 = vld [vmem:[%s6129_s6 + $0x20] sm:$0xff]  }
  0x6a   : > { %343 = vst [vmem:[#allocation2 + $0x130] sm:$0x3] %v5954_v0  ;;  %344 = vst [vmem:[#allocation2 + $0x138] sm:$0xff] %v5954_v0  ;;  %4662 = vmatpush3.bf16.msra.mxu1 %v5672_v20  ;;  %v8345_v50 = vunpack.c.l.bf16 %v6210_v49  ;;  %v8343_v51 = vunpack.c.h.bf16 %v6210_v49  ;;  %v5688_v54 = vld [vmem:[#allocation6 + $0x130] sm:$0xff]   ;;  %v5689_v58 = vld [vmem:[#allocation6 + $0x168] sm:$0xff]   ;;  %v8341_v59 = vunpack.c.l.bf16 %v6224_v57  ;;  %v8337_v60 = vunpack.c.h.bf16 %v6224_v57 }
  0x6b   : > { %345 = vst [vmem:[#allocation2 + $0x140] sm:$0xff] %v5954_v0  ;;  %346 = vst [vmem:[#allocation2 + $0x148] sm:$0x3] %v5954_v0  ;;  %4663 = vmatprep.subr.bf16.mxu1 %v5675_v23  ;;  %1455 = vmatprep.mubr.bf16.mxu0 %v787_v43  ;;  %v644_v61 = vsel %vm639_vm1, %v6201_v44, %v643_v48  ;;  %v6239_v62 = vld [vmem:[%s6129_s6 + $0x28] sm:$0xff]   ;;  %v6248_v1 = vld [vmem:[%s6129_s6 + $0x30] sm:$0xff]  }
  0x6c   : > { %347 = vst [vmem:[#allocation2 + $0x150] sm:$0xff] %v5954_v0  ;;  %348 = vst [vmem:[#allocation2 + $0x158] sm:$0xff] %v5954_v0  ;;  %4552 = vmatpush3.bf16.msra.mxu0 %v5674_v22  ;;  %v8342_v63 = vunpack.c.l.bf16 %v6239_v62  ;;  %v5690_v2 = vld [vmem:[#allocation6 + $0x128] sm:$0xff]   ;;  %v8324_v3 = vunpack.c.l.bf16 %v6248_v1  ;;  %v8322_v4 = vunpack.c.h.bf16 %v6248_v1  ;;  %v6253_v5 = vld [vmem:[%s6129_s6 + $0x38] sm:$0xff]   ;;  %v788_v8 = vpack.c.bf16 %v644_v61, %v6201_v44 }
  0x6d   : > { %349 = vst [vmem:[#allocation2 + $0x160] sm:$0x3] %v5954_v0  ;;  %350 = vst [vmem:[#allocation2 + $0x168] sm:$0xff] %v5954_v0  ;;  %4553 = vmatprep.subr.bf16.mxu0 %v5677_v25  ;;  %v8325_v10 = vunpack.c.l.bf16 %v6253_v5  ;;  %v8323_v11 = vunpack.c.h.bf16 %v6253_v5  ;;  %v5691_v18 = vld [vmem:[#allocation6 + $0x160] sm:$0xff]   ;;  %v5694_v61 = vld [vmem:[#allocation6 + $0x118] sm:$0xff]  }
  0x6e   : > { %351 = vst [vmem:[#allocation2 + $0x170] sm:$0xff] %v5954_v0  ;;  %352 = vst [vmem:[#allocation2 + $0x178] sm:$0x3] %v5954_v0  ;;  %4664 = vmatpush3.bf16.msra.mxu1 %v5676_v24 }
  0x6f   : > { %353 = vst [vmem:[#allocation2 + $0x180] sm:$0xff] %v5954_v0  ;;  %354 = vst [vmem:[#allocation2 + $0x188] sm:$0xff] %v5954_v0  ;;  %4665 = vmatprep.subr.bf16.mxu1 %v5679_v27 }
  0x70   : > { %355 = vst [vmem:[#allocation2 + $0x190] sm:$0x3] %v5954_v0  ;;  %358 = vst [vmem:[#allocation2 + $0x1a8] sm:$0x3] %v5954_v0  ;;  %4554 = vmatpush3.bf16.msra.mxu0 %v5678_v26  ;;  %v8338_v0 = vunpack.c.h.bf16 %v6239_v62 }
  0x71   : > { %4555 = vmatprep.subr.bf16.mxu0 %v5681_v29  ;;  %8395 = vst [vmem:[#allocation13_spill] sm:$0xff] %v6192_v37  ;;  %8396 = vst [vmem:[#allocation14_spill] sm:$0xff] %v6198_v42 }
  0x72   : > { %4666 = vmatpush3.bf16.msra.mxu1 %v5680_v28  ;;  %392 = vst [vmem:[#allocation2 + $0x19] sm:$0xff] %v8349_v39  ;;  %393 = vst [vmem:[#allocation2 + $0x21] sm:$0xff] %v8347_v40 }
  0x73   : > { %4667 = vmatprep.subr.bf16.mxu1 %v5683_v32  ;;  %8397 = vst [vmem:[#allocation15_spill] sm:$0xff] %v6210_v49  ;;  %394 = vst [vmem:[#allocation2 + $0x31] sm:$0xff] %v8350_v45 }
  0x74   : > { %4556 = vmatpush3.bf16.msra.mxu0 %v5682_v31  ;;  %395 = vst [vmem:[#allocation2 + $0x39] sm:$0xff] %v8348_v46  ;;  %8398 = vst [vmem:[#allocation16_spill] sm:$0xff] %v6219_v52  ;;  %v5692_v31 = vld [vmem:[#allocation6 + $0x120] sm:$0xff]   ;;  %v5713_v46 = vld [vmem:[#allocation6 + $0x1c8] sm:$0xff]  }
  0x75   : > { %4765 = vmatprep.subr.bf16.mxu0 %v5685_v36  ;;  %8399 = vst [vmem:[#allocation17_spill] sm:$0xff] %v6224_v57  ;;  %396 = vst [vmem:[#allocation2 + $0x49] sm:$0xff] %v8345_v50  ;;  %v5693_v36 = vld [vmem:[#allocation6 + $0x158] sm:$0xff]  }
  0x76   : > { %4668 = vmatpush3.bf16.msra.mxu1 %v5684_v35  ;;  %397 = vst [vmem:[#allocation2 + $0x51] sm:$0xff] %v8343_v51  ;;  %398 = vst [vmem:[#allocation2 + $0x61] sm:$0xff] %v8346_v55 }
  0x77   : > { %1456 = vmatmul.mubr.bf16.vlgmr.msra.gmra.mxu0 %v5955_v53  ;;  %399 = vst [vmem:[#allocation2 + $0x69] sm:$0xff] %v8344_v56  ;;  %8400 = vst [vmem:[#allocation18_spill] sm:$0xff] %v6239_v62 }
  0x78   : > { %4766 = vmatpush3.bf16.msra.mxu0 %v5686_v41  ;;  %400 = vst [vmem:[#allocation2 + $0x79] sm:$0xff] %v8341_v59  ;;  %401 = vst [vmem:[#allocation2 + $0x81] sm:$0xff] %v8337_v60 }
  0x79   : > { %4767 = vmatprep.subr.bf16.mxu0 %v5687_v47  ;;  %8401 = vst [vmem:[#allocation19_spill] sm:$0xff] %v6248_v1  ;;  %8402 = vst [vmem:[#allocation20_spill] sm:$0xff] %v6253_v5  ;;  %v427_v6 = vld [vmem:[#allocation2 + $0x18] sm:$0xff]  ;;  %v428_v7 = vld [vmem:[#allocation2 + $0x20] sm:$0xff] }
  0x7a   : > { %v429_v9 = vld [vmem:[#allocation2 + $0x28] sm:$0x3]  ;;  %402 = vst [vmem:[#allocation2 + $0x91] sm:$0xff] %v8342_v63  ;;  %403 = vst [vmem:[#allocation2 + $0x99] sm:$0xff] %v8338_v0  ;;  %v789_v12 = vpack.c.bf16 %v428_v7, %v427_v6  ;;  %v532_v13 = vrot.slane %v427_v6, 1  ;;  %v533_v14 = vrot.slane %v428_v7, 1 }
  0x7b   : > { %v535_v15 = vrot.slane %v429_v9, 1  ;;  %v430_v16 = vld [vmem:[#allocation2 + $0x30] sm:$0xff]  ;;  %v431_v17 = vld [vmem:[#allocation2 + $0x38] sm:$0xff]  ;;  %404 = vst [vmem:[#allocation2 + $0xa9] sm:$0xff] %v8324_v3  ;;  %405 = vst [vmem:[#allocation2 + $0xb1] sm:$0xff] %v8322_v4  ;;  %v645_v20 = vrot.slane %v427_v6, 2 }
  0x7c   : > { %4768 = vmatpush3.bf16.msra.mxu0 %v5688_v54  ;;  %v6266_v19 = vpack.c.bf16 %v431_v17, %v430_v16  ;;  %v646_v21 = vrot.slane %v428_v7, 2  ;;  %v648_v22 = vrot.slane %v429_v9, 2  ;;  %v432_v23 = vld [vmem:[#allocation2 + $0x40] sm:$0x3]  ;;  %406 = vst [vmem:[#allocation2 + $0xc1] sm:$0xff] %v8325_v10  ;;  %407 = vst [vmem:[#allocation2 + $0xc9] sm:$0xff] %v8323_v11  ;;  %1616 = vmatprep.mubr.bf16.mxu1 %v789_v12 }
  0x7d   : > { %4769 = vmatprep.subr.bf16.mxu0 %v5689_v58  ;;  %v534_v24 = vsel %vm526_vm0, %v532_v13, %v533_v14  ;;  %v536_v25 = vsel %vm526_vm0, %v533_v14, %v535_v15  ;;  %v537_v26 = vrot.slane %v430_v16, 1  ;;  %v538_v27 = vrot.slane %v431_v17, 1  ;;  %1617 = vmatmul.mubr.bf16.vlgmr.msra.gmra.mxu1 %v788_v8  ;;  %v6276_v30 = vld [vmem:[#allocation2 + $0x58] sm:$0x3]  ;;  %v6282_v35 = vld [vmem:[#allocation2 + $0x48] sm:$0xff]  ;;  %v434_v41 = vld [vmem:[#allocation2 + $0x50] sm:$0xff] }
  0x7e   : > { %v6274_v28 = vpack.c.bf16 %v536_v25, %v534_v24  ;;  %v540_v29 = vrot.slane %v432_v23, 1  ;;  %1624 = vmatprep.mubr.bf16.mxu1 %v6266_v19  ;;  %v647_v32 = vsel %vm639_vm1, %v645_v20, %v646_v21  ;;  %v649_v33 = vsel %vm639_vm1, %v646_v21, %v648_v22  ;;  %v6298_v9 = vld [vmem:[#allocation2 + $0x70] sm:$0x3]  ;;  %v5695_v13 = vld [vmem:[#allocation6 + $0x150] sm:$0xff]  }
  0x7f   : > { %v539_v34 = vsel %vm526_vm0, %v537_v26, %v538_v27  ;;  %v542_v43 = vrot.slane %v6282_v35, 1  ;;  %v543_v47 = vrot.slane %v434_v41, 1  ;;  %v545_v48 = vrot.slane %v6276_v30, 1  ;;  %v5696_v22 = vld [vmem:[#allocation6 + $0x110] sm:$0xff]   ;;  %v5708_v3 = vld [vmem:[#allocation6 + $0x100] sm:$0xff]  }
  0x80   : > { %4770 = vmatpush3.bf16.msra.mxu0 %v5690_v2  ;;  %1463 = vmatprep.mubr.bf16.mxu0 %v6274_v28  ;;  %v541_v38 = vsel %vm526_vm0, %v538_v27, %v540_v29  ;;  %v6290_v53 = vpack.c.bf16 %v649_v33, %v647_v32  ;;  %v650_v54 = vrot.slane %v430_v16, 2  ;;  %v651_v58 = vrot.slane %v431_v17, 2  ;;  %v6306_v16 = vld [vmem:[#allocation2 + $0x68] sm:$0xff]  ;;  %v6322_v27 = vld [vmem:[#allocation2 + $0x78] sm:$0xff] }
  0x81   : > { %4771 = vmatprep.subr.bf16.mxu0 %v5691_v18  ;;  %1464 = vmatmul.mubr.bf16.gmra.mxu0 %v789_v12  ;;  %v6287_v44 = vpack.c.bf16 %v541_v38, %v539_v34  ;;  %v6294_v2 = vpack.c.bf16 %v434_v41, %v6282_v35  ;;  %v653_v6 = vrot.slane %v432_v23, 2  ;;  %v544_v7 = vsel %vm526_vm0, %v542_v43, %v543_v47  ;;  %v6300_v12 = vld [vmem:[#allocation2 + $0x60] sm:$0xff]  ;;  %v5697_v23 = vld [vmem:[#allocation6 + $0x148] sm:$0xff]   ;;  %v6324_v29 = vld [vmem:[#allocation2 + $0x88] sm:$0x3] }
  0x82   : > { %v546_v8 = vsel %vm526_vm0, %v543_v47, %v545_v48  ;;  %v652_v14 = vsel %vm639_vm1, %v650_v54, %v651_v58  ;;  %v547_v18 = vrot.slane %v6300_v12, 1  ;;  %v548_v20 = vrot.slane %v6306_v16, 1  ;;  %v5698_v38 = vld [vmem:[#allocation6 + $0x108] sm:$0xff]   ;;  %v6334_v47 = vld [vmem:[%s6129_s6 + $0x40] sm:$0xff]   ;;  %v5700_v54 = vld [vmem:[#allocation6 + $0x1b8] sm:$0xff]  }
  0x83   : > { %1471 = vmatprep.mubr.bf16.mxu0 %v6287_v44  ;;  %v6304_v15 = vpack.c.bf16 %v546_v8, %v544_v7  ;;  %v654_v17 = vsel %vm639_vm1, %v651_v58, %v653_v6  ;;  %v550_v21 = vrot.slane %v6298_v9, 1  ;;  %v6319_v25 = vpack.c.bf16 %v6306_v16, %v6300_v12  ;;  %8403 = vst [vmem:[#allocation21_spill] sm:$0xff] %v6334_v47  ;;  %v6346_v8 = vld [vmem:[%s6129_s6 + $0x48] sm:$0xff]   ;;  %v6466_v0 = vld [vmem:[#allocation2 + $0xd0] sm:$0x3] }
  0x84   : > { %4772 = vmatpush3.bf16.msra.mxu0 %v5692_v31  ;;  %v6314_v24 = vpack.c.bf16 %v654_v17, %v652_v14  ;;  %v655_v26 = vrot.slane %v6282_v35, 2  ;;  %v656_v31 = vrot.slane %v434_v41, 2  ;;  %v658_v32 = vrot.slane %v6276_v30, 2  ;;  %v5699_v30 = vld [vmem:[#allocation6 + $0x1f8] sm:$0xff]   ;;  %8404 = vst [vmem:[#allocation22_spill] sm:$0xff] %v6346_v8  ;;  %v6350_v17 = vld [vmem:[%s6129_s6 + $0x50] sm:$0xff]  }
  0x85   : > { %4773 = vmatprep.subr.bf16.mxu0 %v5693_v36  ;;  %1625 = vmatmul.mubr.bf16.gmra.mxu1 %v6290_v53  ;;  %v549_v33 = vsel %vm526_vm0, %v547_v18, %v548_v20  ;;  %v551_v34 = vsel %vm526_vm0, %v548_v20, %v550_v21  ;;  %v6329_v36 = vld [vmem:[#allocation2 + $0x80] sm:$0xff]  ;;  %v552_v43 = vrot.slane %v6322_v27, 1  ;;  %v555_v41 = vrot.slane %v6324_v29, 1  ;;  %8405 = vst [vmem:[#allocation23_spill] sm:$0xff] %v6350_v17  ;;  %v6353_v18 = vld [vmem:[%s6129_s6 + $0x58] sm:$0xff]  }
  0x86   : > { %1632 = vmatprep.mubr.bf16.mxu1 %v6294_v2  ;;  %v553_v35 = vrot.slane %v6329_v36, 1  ;;  %v6338_v48 = vpack.c.bf16 %v551_v34, %v549_v33  ;;  %v657_v58 = vsel %vm639_vm1, %v655_v26, %v656_v31  ;;  %v660_v6 = vrot.slane %v6300_v12, 2  ;;  %4877 = vmatprep.subr.bf16.mxu1 %v5699_v30  ;;  %8406 = vst [vmem:[#allocation24_spill] sm:$0xff] %v6353_v18  ;;  %v5702_v20 = vld [vmem:[#allocation6 + $0x1b0] sm:$0xff]   ;;  %v6373_v34 = vld [vmem:[#allocation2 + $0x90] sm:$0xff] }
  0x87   : > { %v661_v7 = vrot.slane %v6306_v16, 2  ;;  %v663_v14 = vrot.slane %v6298_v9, 2  ;;  %4878 = vmatpush3.bf16.msra.mxu1 %v5700_v54  ;;  %v8319_v16 = vunpack.c.l.bf16 %v6334_v47  ;;  %v6365_v9 = vld [vmem:[#allocation2 + $0xa0] sm:$0x3]  ;;  %v8320_v26 = vunpack.c.h.bf16 %v6334_v47 }
  0x88   : > { %4774 = vmatpush3.bf16.msra.mxu0 %v5694_v61  ;;  %v659_v61 = vsel %vm639_vm1, %v656_v31, %v658_v32  ;;  %v554_v21 = vsel %vm526_vm0, %v552_v43, %v553_v35  ;;  %v556_v12 = vsel %vm526_vm0, %v553_v35, %v555_v41  ;;  %v5703_v31 = vld [vmem:[#allocation6 + $0x1e8] sm:$0xff]   ;;  %v6370_v32 = vpack.c.bf16 %v6329_v36, %v6322_v27 }
  0x89   : > { %4775 = vmatprep.subr.bf16.mxu0 %v5695_v13  ;;  %1472 = vmatmul.mubr.bf16.gmra.mxu0 %v6266_v19  ;;  %v5701_v13 = vld [vmem:[#allocation6 + $0x1f0] sm:$0xff]   ;;  %v662_v33 = vsel %vm639_vm1, %v660_v6, %v661_v7  ;;  %408 = vst [vmem:[#allocation2 + $0xd9] sm:$0xff] %v8319_v16  ;;  %v6380_v43 = vld [vmem:[%s6129_s6 + $0x68] sm:$0xff]   ;;  %v664_v35 = vsel %vm639_vm1, %v661_v7, %v663_v14  ;;  %v665_v30 = vrot.slane %v6322_v27, 2  ;;  %409 = vst [vmem:[#allocation2 + $0xe1] sm:$0xff] %v8320_v26 }
  0x8a   : > { %1479 = vmatprep.mubr.bf16.mxu0 %v6304_v15  ;;  %4879 = vmatprep.subr.bf16.mxu1 %v5701_v13  ;;  %8408 = vst [vmem:[#allocation26_spill] sm:$0xff] %v6380_v43  ;;  %v6383_v41 = vpack.c.bf16 %v556_v12, %v554_v21  ;;  %v8321_v54 = vunpack.c.l.bf16 %v6346_v8  ;;  %v8329_v6 = vunpack.c.h.bf16 %v6346_v8  ;;  %v8327_v13 = vunpack.c.l.bf16 %v6350_v17  ;;  %v5707_v12 = vld [vmem:[#allocation6 + $0x140] sm:$0xff]   ;;  %v6401_v26 = vld [vmem:[%s6129_s6 + $0x70] sm:$0xff]  }
  0x8b   : > { %4880 = vmatpush3.bf16.msra.mxu1 %v5702_v20  ;;  %v8326_v16 = vunpack.c.h.bf16 %v6350_v17  ;;  %v8328_v7 = vunpack.c.l.bf16 %v6353_v18  ;;  %v557_v27 = vrot.slane %v6373_v34, 1  ;;  %v8336_v20 = vunpack.c.h.bf16 %v6353_v18  ;;  %8409 = vst [vmem:[#allocation27_spill] sm:$0xff] %v6401_v26 }
  0x8c   : > { %4776 = vmatpush3.bf16.msra.mxu0 %v5696_v22  ;;  %v6360_v22 = vld [vmem:[%s6129_s6 + $0x60] sm:$0xff]   ;;  %4881 = vmatprep.subr.bf16.mxu1 %v5703_v31  ;;  %410 = vst [vmem:[#allocation2 + $0xf1] sm:$0xff] %v8321_v54  ;;  %v560_v31 = vrot.slane %v6365_v9, 1  ;;  %411 = vst [vmem:[#allocation2 + $0xf9] sm:$0xff] %v8329_v6  ;;  %v8335_v4 = vunpack.c.l.bf16 %v6380_v43  ;;  %v8332_v11 = vunpack.c.h.bf16 %v6380_v43  ;;  %v666_v10 = vrot.slane %v6329_v36, 2  ;;  %v5709_v36 = vld [vmem:[#allocation6 + $0x1d8] sm:$0xff]  }
  0x8d   : > { %4777 = vmatprep.subr.bf16.mxu0 %v5697_v23  ;;  %1633 = vmatmul.mubr.bf16.gmra.mxu1 %v6314_v24  ;;  %8407 = vst [vmem:[#allocation25_spill] sm:$0xff] %v6360_v22  ;;  %v6362_v23 = vpack.c.bf16 %v659_v61, %v657_v58  ;;  %v5704_v58 = vld [vmem:[#allocation6 + $0x1a8] sm:$0xff]   ;;  %v5705_v61 = vld [vmem:[#allocation6 + $0x1e0] sm:$0xff]   ;;  %v8334_v21 = vunpack.c.l.bf16 %v6360_v22  ;;  %412 = vst [vmem:[#allocation2 + $0x109] sm:$0xff] %v8327_v13  ;;  %v8330_v54 = vunpack.c.h.bf16 %v6360_v22  ;;  %v8331_v13 = vunpack.c.l.bf16 %v6401_v26 }
  0x8e   : > { %1640 = vmatprep.mubr.bf16.mxu1 %v6319_v25  ;;  %413 = vst [vmem:[#allocation2 + $0x111] sm:$0xff] %v8326_v16  ;;  %414 = vst [vmem:[#allocation2 + $0x121] sm:$0xff] %v8328_v7  ;;  %v5706_v16 = vld [vmem:[#allocation6 + $0x1a0] sm:$0xff]   ;;  %v8333_v7 = vunpack.c.h.bf16 %v6401_v26  ;;  %v668_v6 = vrot.slane %v6324_v29, 2 }
  0x8f   : > { %415 = vst [vmem:[#allocation2 + $0x129] sm:$0xff] %v8336_v20  ;;  %416 = vst [vmem:[#allocation2 + $0x139] sm:$0xff] %v8334_v21  ;;  %4882 = vmatpush3.bf16.msra.mxu1 %v5704_v58  ;;  %v6431_v58 = vpack.c.bf16 %v664_v35, %v662_v33  ;;  %v6446_v33 = vld [vmem:[#allocation2 + $0xb0] sm:$0xff]  ;;  %v6448_v35 = vld [vmem:[#allocation2 + $0xb8] sm:$0x3]  ;;  %v667_v21 = vsel %vm639_vm1, %v665_v30, %v666_v10 }
  0x90   : > { %4778 = vmatpush3.bf16.msra.mxu0 %v5698_v38  ;;  %v6375_v38 = vld [vmem:[#allocation2 + $0x98] sm:$0xff]  ;;  %417 = vst [vmem:[#allocation2 + $0x141] sm:$0xff] %v8330_v54  ;;  %418 = vst [vmem:[#allocation2 + $0x151] sm:$0xff] %v8335_v4  ;;  %4883 = vmatprep.subr.bf16.mxu1 %v5705_v61  ;;  %v6444_v54 = vld [vmem:[#allocation2 + $0xa8] sm:$0xff]  ;;  %v565_v60 = vrot.slane %v6448_v35, 1  ;;  %v8413_v8 = vrot.slane %v6448_v35, 2 }
  0x91   : > { %1480 = vmatmul.mubr.bf16.gmra.mxu0 %v6294_v2  ;;  %v558_v14 = vrot.slane %v6375_v38, 1  ;;  %4779 = vmatprep.subr.bf16.mxu0 %v5707_v12  ;;  %419 = vst [vmem:[#allocation2 + $0x159] sm:$0xff] %v8332_v11  ;;  %420 = vst [vmem:[#allocation2 + $0x169] sm:$0xff] %v8331_v13  ;;  %v6440_v29 = vpack.c.bf16 %v6375_v38, %v6373_v34  ;;  %v562_v13 = vrot.slane %v6444_v54, 1  ;;  %v563_v11 = vrot.slane %v6446_v33, 1  ;;  %v6489_v59 = vld [vmem:[#allocation2 + $0xd8] sm:$0xff] }
  0x92   : > { %1487 = vmatprep.mubr.bf16.mxu0 %v6338_v48  ;;  %421 = vst [vmem:[#allocation2 + $0x171] sm:$0xff] %v8333_v7  ;;  %v6453_v7 = vld [vmem:[%s6129_s6 + $0x78] sm:$0xff]   ;;  %v671_v30 = vrot.slane %v6375_v38, 2  ;;  %v5712_v38 = vld [vmem:[#allocation6 + $0x190] sm:$0xff]   ;;  %v6497_v56 = vpack.c.bf16 %v6446_v33, %v6444_v54  ;;  %v8412_v43 = vrot.slane %v6444_v54, 2  ;;  %s5885_s6 = scalar_lea.vmem %s5884_s29, 8192 }
  0x93   : > { %v559_v12 = vsel %vm526_vm0, %v557_v27, %v558_v14  ;;  %v561_v61 = vsel %vm526_vm0, %v558_v14, %v560_v31  ;;  %4884 = vmatpush3.bf16.msra.mxu1 %v5706_v16  ;;  %8410 = vst [vmem:[#allocation28_spill] sm:$0xff] %v6453_v7  ;;  %v669_v27 = vsel %vm639_vm1, %v666_v10, %v668_v6  ;;  %v5711_v14 = vld [vmem:[#allocation6 + $0x1d0] sm:$0xff]   ;;  %v8339_v31 = vunpack.c.l.bf16 %v6453_v7  ;;  %v6493_v51 = vld [vmem:[#allocation2 + $0xe8] sm:$0x3]  ;;  %v6512_v63 = vld [vmem:[#allocation2 + $0xf8] sm:$0xff]  ;;  %p5887_p0 = scmp.lt.s32.totalorder %s5885_s6, %s5879_s16 }
  0x94   : > { %4780 = vmatpush3.bf16.msra.mxu0 %v5708_v3  ;;  %v5710_v3 = vld [vmem:[#allocation6 + $0x198] sm:$0xff]   ;;  %4885 = vmatprep.subr.bf16.mxu1 %v5709_v36  ;;  %v8340_v4 = vunpack.c.h.bf16 %v6453_v7  ;;  %v6460_v20 = vpack.c.bf16 %v561_v61, %v559_v12  ;;  %v670_v16 = vrot.slane %v6373_v34, 2  ;;  %v6472_v10 = vpack.c.bf16 %v669_v27, %v667_v21  ;;  %v6476_v12 = vld [vmem:[#allocation2 + $0xc0] sm:$0xff] }
  0x95   : > { %1641 = vmatmul.mubr.bf16.gmra.mxu1 %v6362_v23  ;;  %422 = vst [vmem:[#allocation2 + $0x181] sm:$0xff] %v8339_v31  ;;  %v673_v6 = vrot.slane %v6365_v9, 2  ;;  %v564_v36 = vsel %vm526_vm0, %v562_v13, %v563_v11  ;;  %v6478_v61 = vld [vmem:[#allocation2 + $0xc8] sm:$0xff]  ;;  %v567_v21 = vrot.slane %v6476_v12, 1  ;;  %v566_v13 = vsel %vm526_vm0, %v563_v11, %v565_v60  ;;  %v6499_v50 = vld [vmem:[#allocation2 + $0xe0] sm:$0xff]  ;;  %v6503_v11 = vld [vmem:[#allocation2 + $0xf0] sm:$0xff]  ;;  %p5888_p10 = por %p5887_p0, %p5886_p13 }
  0x96   : > { %1648 = vmatprep.mubr.bf16.mxu1 %v6370_v32  ;;  %423 = vst [vmem:[#allocation2 + $0x189] sm:$0xff] %v8340_v4  ;;  %v568_v9 = vrot.slane %v6478_v61, 1  ;;  %v570_v27 = vrot.slane %v6466_v0, 1  ;;  %v6505_v55 = vld [vmem:[#allocation2 + $0x100] sm:$0x3]  ;;  %v6508_v39 = vpack.c.bf16 %v566_v13, %v564_v36  ;;  %v5714_v4 = vld [vmem:[#allocation6 + $0x188] sm:$0xff]   ;;  %v672_v36 = vsel %vm639_vm1, %v670_v16, %v671_v30 }
  0x97   : > { %4886 = vmatpush3.bf16.msra.mxu1 %v5710_v3  ;;  %v674_v13 = vsel %vm639_vm1, %v671_v30, %v673_v6  ;;  %v6523_v3 = vld [vmem:[#allocation2 + $0x108] sm:$0xff]  ;;  %v6525_v45 = vld [vmem:[#allocation2 + $0x118] sm:$0x3]  ;;  %v6527_v31 = vld [vmem:[#allocation2 + $0x110] sm:$0xff]  ;;  %v6541_v40 = vpack.c.bf16 %v6478_v61, %v6476_v12  ;;  %p5889_p3 = pnand %p5888_p10, %p5882_p12 }
  0x98   : > { %4887 = vmatprep.subr.bf16.mxu1 %v5711_v14  ;;  %v5715_v14 = vld [vmem:[#allocation6 + $0x1c0] sm:$0xff]   ;;  %v6534_v30 = vld [vmem:[#allocation6 + $0x238] sm:$0xff]   ;;  %v6536_v6 = vpack.c.bf16 %v674_v13, %v672_v36  ;;  %v571_v16 = vsel %vm526_vm0, %v568_v9, %v570_v27  ;;  %v583_v36 = vrot.slane %v6527_v31, 1  ;;  %v585_v13 = vrot.slane %v6525_v45, 1  ;;  %v6558_v22 = vld [vmem:[#allocation2 + $0x138] sm:$0xff] }
  0x99   : > { %1488 = vmatmul.mubr.bf16.gmra.mxu0 %v6319_v25  ;;  %v6530_v34 = vld [vmem:[#allocation2 + $0x130] sm:$0x3]  ;;  %v6547_v26 = vld [vmem:[#allocation2 + $0x128] sm:$0xff]  ;;  %5485 = vmatprep.subr.bf16.mxu0 %v6534_v30  ;;  %v6564_v17 = vld [vmem:[#allocation2 + $0x140] sm:$0xff] }
  0x9a   : > { %1495 = vmatprep.mubr.bf16.mxu0 %v6383_v41  ;;  %v6553_v7 = vld [vmem:[#allocation2 + $0x148] sm:$0x3]  ;;  %v590_v27 = vrot.slane %v6530_v34, 1 }
  0x9b   : > { %4888 = vmatpush3.bf16.msra.mxu1 %v5712_v38  ;;  %v6545_v38 = vld [vmem:[#allocation2 + $0x120] sm:$0xff] }
  0x9c   : > { %4889 = vmatprep.subr.bf16.mxu1 %v5713_v46  ;;  %v5716_v46 = vld [vmem:[#allocation6 + $0x180] sm:$0xff]  }
  0x9d   : > { %1649 = vmatmul.mubr.bf16.gmra.mxu1 %v6431_v58 }
  0x9e   : > { %1656 = vmatprep.mubr.bf16.mxu1 %v6440_v29 }
  0x9f   : > { %4890 = vmatpush3.bf16.msra.mxu1 %v5714_v4  ;;  %v6611_v4 = vld [vmem:[#allocation2 + $0x150] sm:$0xff] }
  0xa0   : > { %4891 = vmatprep.subr.bf16.mxu1 %v5715_v14  ;;  %v569_v14 = vsel %vm526_vm0, %v567_v21, %v568_v9  ;;  %v587_v21 = vrot.slane %v6545_v38, 1  ;;  %v588_v9 = vrot.slane %v6547_v26, 1 }
  0xa1   : > { %1496 = vmatmul.mubr.bf16.gmra.mxu0 %v6370_v32  ;;  %v6567_v18 = vpack.c.bf16 %v571_v16, %v569_v14  ;;  %v8417_v16 = vrot.slane %v6493_v51, 1  ;;  %v6613_v14 = vld [vmem:[#allocation2 + $0x158] sm:$0xff] }
  0xa2   : > { %1503 = vmatprep.mubr.bf16.mxu0 %v6460_v20  ;;  %v598_v62 = vrot.slane %v6613_v14, 1 }
  0xa3   : > { %4892 = vmatpush3.bf16.msra.mxu1 %v5716_v46  ;;  %v8411_v46 = vrot.slane %v6446_v33, 2  ;;  %v8416_v33 = vrot.slane %v6489_v59, 1 }
  0xa5   : > { %1657 = vmatmul.mubr.bf16.gmra.mxu1 %v6472_v10  ;;  %v677_v47 = vsel %vm639_vm1, %v8412_v43, %v8411_v46  ;;  %v8414_v1 = vmov %v8411_v46 }
  0xa6   : > { %1664 = vmatprep.mubr.bf16.mxu1 %v6497_v56  ;;  %v679_v5 = vsel %vm639_vm1, %v8414_v1, %v8413_v8  ;;  %v6594_v1 = vpack.c.bf16 %v6499_v50, %v6489_v59  ;;  %v8415_v8 = vrot.slane %v6499_v50, 1 }
  0xa7   : > { %v6589_v46 = vpack.c.bf16 %v679_v5, %v677_v47  ;;  %v6606_v5 = vld [vmem:[#allocation2 + $0x160] sm:$0x3] }
  0xa8   : > { %v574_v35 = vsel %vm526_vm0, %v8416_v33, %v8415_v8  ;;  %v8418_v54 = vmov %v8415_v8  ;;  %v8419_v8 = vrot.slane %v6478_v61, 2  ;;  %v8420_v33 = vrot.slane %v6476_v12, 2 }
  0xa9   : > { %1504 = vmatmul.mubr.bf16.gmra.mxu0 %v6440_v29  ;;  %v576_v43 = vsel %vm526_vm0, %v8418_v54, %v8417_v16  ;;  %v8421_v16 = vrot.slane %v6466_v0, 2  ;;  %v600_v49 = vrot.slane %v6606_v5, 1  ;;  %v6636_v0 = vpack.c.bf16 %v6512_v63, %v6503_v11 }
  0xaa   : > { %1511 = vmatprep.mubr.bf16.mxu0 %v6508_v39  ;;  %v6609_v47 = vpack.c.bf16 %v576_v43, %v574_v35  ;;  %v682_v60 = vsel %vm639_vm1, %v8420_v33, %v8419_v8  ;;  %v8422_v54 = vmov %v8419_v8  ;;  %v597_v35 = vrot.slane %v6611_v4, 1 }
  0xab   : > { %v684_v57 = vsel %vm639_vm1, %v8422_v54, %v8421_v16  ;;  %v8423_v12 = vrot.slane %v6512_v63, 1  ;;  %v8424_v61 = vrot.slane %v6503_v11, 1  ;;  %v8425_v33 = vrot.slane %v6505_v55, 1 }
  0xac   : > { %v6631_v52 = vpack.c.bf16 %v684_v57, %v682_v60  ;;  %v8427_v60 = vrot.slane %v6499_v50, 2  ;;  %v8428_v43 = vrot.slane %v6489_v59, 2  ;;  %v8431_v59 = vrot.slane %v6523_v3, 1 }
  0xad   : > { %1665 = vmatmul.mubr.bf16.gmra.mxu1 %v6536_v6  ;;  %v579_v8 = vsel %vm526_vm0, %v8424_v61, %v8423_v12  ;;  %v8426_v16 = vmov %v8423_v12  ;;  %v8429_v12 = vrot.slane %v6493_v51, 2  ;;  %v586_v51 = vsel %vm526_vm0, %v583_v36, %v585_v13 }
  0xae   : > { %1672 = vmatprep.mubr.bf16.mxu1 %v6541_v40  ;;  %v581_v54 = vsel %vm526_vm0, %v8426_v16, %v8425_v33  ;;  %v687_v37 = vsel %vm639_vm1, %v8428_v43, %v8427_v60  ;;  %v8430_v61 = vmov %v8427_v60  ;;  %v584_v43 = vsel %vm526_vm0, %v8431_v59, %v583_v36  ;;  %v469_v59 = vld [vmem:[#allocation2 + $0x168] sm:$0xff] }
  0xaf   : > { %v6649_v57 = vpack.c.bf16 %v581_v54, %v579_v8  ;;  %v689_v42 = vsel %vm639_vm1, %v8430_v61, %v8429_v12  ;;  %v6668_v8 = vpack.c.bf16 %v6527_v31, %v6523_v3  ;;  %v6675_v50 = vpack.c.bf16 %v586_v51, %v584_v43 }
  0xb0   : > { %v6663_v33 = vpack.c.bf16 %v689_v42, %v687_v37  ;;  %v8432_v37 = vrot.slane %v6512_v63, 2  ;;  %v8433_v42 = vrot.slane %v6503_v11, 2  ;;  %v8434_v54 = vrot.slane %v6505_v55, 2 }
  0xb1   : > { %1512 = vmatmul.mubr.bf16.gmra.mxu0 %v6497_v56  ;;  %v6694_v13 = vpack.c.bf16 %v6547_v26, %v6545_v38  ;;  %v589_v11 = vsel %vm526_vm0, %v587_v21, %v588_v9  ;;  %v591_v61 = vsel %vm526_vm0, %v588_v9, %v590_v27  ;;  %v8436_v63 = vrot.slane %v6527_v31, 2 }
  0xb2   : > { %1519 = vmatprep.mubr.bf16.mxu0 %v6567_v18  ;;  %v692_v16 = vsel %vm639_vm1, %v8433_v42, %v8432_v37  ;;  %v8435_v60 = vmov %v8432_v37  ;;  %v6699_v55 = vpack.c.bf16 %v591_v61, %v589_v11  ;;  %v8437_v43 = vrot.slane %v6523_v3, 2 }
  0xb3   : > { %v694_v12 = vsel %vm639_vm1, %v8435_v60, %v8434_v54  ;;  %v8438_v37 = vrot.slane %v6525_v45, 2  ;;  %v8439_v42 = vmov %v8436_v63  ;;  %v710_v9 = vrot.slane %v6611_v4, 2 }
  0xb4   : > { %v6689_v36 = vpack.c.bf16 %v694_v12, %v692_v16  ;;  %v697_v51 = vsel %vm639_vm1, %v8437_v43, %v8436_v63  ;;  %v602_v27 = vrot.slane %v469_v59, 1  ;;  %v6719_v3 = vpack.c.bf16 %v6564_v17, %v6558_v22 }
  0xb5   : > { %1673 = vmatmul.mubr.bf16.gmra.mxu1 %v6589_v46  ;;  %v699_v21 = vsel %vm639_vm1, %v8439_v42, %v8438_v37  ;;  %v8440_v54 = vrot.slane %v6564_v17, 1  ;;  %v8441_v45 = vrot.slane %v6558_v22, 1  ;;  %v8442_v60 = vrot.slane %v6553_v7, 1 }
  0xb6   : > { %1680 = vmatprep.mubr.bf16.mxu1 %v6594_v1  ;;  %v6714_v16 = vpack.c.bf16 %v699_v21, %v697_v51  ;;  %v8444_v63 = vrot.slane %v6547_v26, 2  ;;  %v8445_v43 = vrot.slane %v6545_v38, 2  ;;  %v8446_v37 = vrot.slane %v6530_v34, 2  ;;  %v470_v34 = vld [vmem:[#allocation2 + $0x170] sm:$0xff] }
  0xb7   : > { %v594_v31 = vsel %vm526_vm0, %v8441_v45, %v8440_v54  ;;  %v8443_v12 = vmov %v8440_v54  ;;  %v471_v45 = vld [vmem:[#allocation2 + $0x178] sm:$0x3]  ;;  %v599_v38 = vsel %vm526_vm0, %v597_v35, %v598_v62 }
  0xb8   : > { %v596_v11 = vsel %vm526_vm0, %v8443_v12, %v8442_v60  ;;  %v702_v51 = vsel %vm639_vm1, %v8445_v43, %v8444_v63  ;;  %v8447_v42 = vmov %v8444_v63  ;;  %v601_v60 = vsel %vm526_vm0, %v598_v62, %v600_v49 }
  0xb9   : > { %1520 = vmatmul.mubr.bf16.gmra.mxu0 %v6541_v40  ;;  %v6732_v61 = vpack.c.bf16 %v596_v11, %v594_v31  ;;  %v704_v21 = vsel %vm639_vm1, %v8447_v42, %v8446_v37  ;;  %v6751_v31 = vpack.c.bf16 %v6613_v14, %v6611_v4  ;;  %v6756_v26 = vpack.c.bf16 %v601_v60, %v599_v38 }
  0xba   : > { %1527 = vmatprep.mubr.bf16.mxu0 %v6609_v47  ;;  %v6746_v54 = vpack.c.bf16 %v704_v21, %v702_v51  ;;  %v8448_v12 = vrot.slane %v6564_v17, 2  ;;  %v8449_v11 = vrot.slane %v6558_v22, 2  ;;  %v8450_v4 = vrot.slane %v6553_v7, 2 }
  0xbb   : > { %v603_v49 = vrot.slane %v470_v34, 1  ;;  %v605_v62 = vrot.slane %v471_v45, 1  ;;  %v6773_v37 = vpack.c.bf16 %v470_v34, %v469_v59  ;;  %v711_v22 = vrot.slane %v6613_v14, 2 }
  0xbc   : > { %v707_v63 = vsel %vm639_vm1, %v8449_v11, %v8448_v12  ;;  %v8451_v43 = vmov %v8448_v12  ;;  %v713_v42 = vrot.slane %v6606_v5, 2  ;;  %v6785_v12 = vld [vmem:[#allocation2 + $0x180] sm:$0xff]  ;;  %v6787_v11 = vld [vmem:[#allocation2 + $0x188] sm:$0xff] }
  0xbd   : > { %1681 = vmatmul.mubr.bf16.gmra.mxu1 %v6631_v52  ;;  %v709_v35 = vsel %vm639_vm1, %v8451_v43, %v8450_v4  ;;  %v604_v7 = vsel %vm526_vm0, %v602_v27, %v603_v49  ;;  %v606_v17 = vsel %vm526_vm0, %v603_v49, %v605_v62  ;;  %v712_v38 = vsel %vm639_vm1, %v710_v9, %v711_v22 }
  0xbe   : > { %1688 = vmatprep.mubr.bf16.mxu1 %v6636_v0  ;;  %v6770_v51 = vpack.c.bf16 %v709_v35, %v707_v63  ;;  %v6780_v21 = vpack.c.bf16 %v606_v17, %v604_v7  ;;  %v714_v60 = vsel %vm639_vm1, %v711_v22, %v713_v42  ;;  %v6795_v5 = vpack.c.bf16 %v6787_v11, %v6785_v12 }
  0xbf   : > { %v6790_v14 = vpack.c.bf16 %v714_v60, %v712_v38  ;;  %v715_v27 = vrot.slane %v469_v59, 2  ;;  %v716_v63 = vrot.slane %v470_v34, 2  ;;  %v718_v4 = vrot.slane %v471_v45, 2  ;;  %v5718_v59 = vld [vmem:[#allocation6 + $0x230] sm:$0xff]   ;;  %v5719_v45 = vld [vmem:[#allocation6 + $0x228] sm:$0xff]  }
  0xc1   : > { %1528 = vmatmul.mubr.bf16.gmra.mxu0 %v6594_v1  ;;  %v717_v9 = vsel %vm639_vm1, %v715_v27, %v716_v63  ;;  %v719_v43 = vsel %vm639_vm1, %v716_v63, %v718_v4 }
  0xc2   : > { %1535 = vmatprep.mubr.bf16.mxu0 %v6649_v57  ;;  %v6802_v35 = vpack.c.bf16 %v719_v43, %v717_v9 }
  0xc5   : > { %1689 = vmatmul.mubr.bf16.gmra.mxu1 %v6663_v33 }
  0xc6   : > { %1696 = vmatprep.mubr.bf16.mxu1 %v6668_v8 }
  0xc9   : > { %1536 = vmatmul.mubr.bf16.gmra.mxu0 %v6636_v0 }
  0xca   : > { %1543 = vmatprep.mubr.bf16.mxu0 %v6675_v50 }
  0xcd   : > { %1697 = vmatmul.mubr.bf16.gmra.mxu1 %v6689_v36 }
  0xce   : > { %1704 = vmatprep.mubr.bf16.mxu1 %v6694_v13 }
  0xd1   : > { %1544 = vmatmul.mubr.bf16.gmra.mxu0 %v6668_v8 }
  0xd2   : > { %1551 = vmatprep.mubr.bf16.mxu0 %v6699_v55 }
  0xd5   : > { %1705 = vmatmul.mubr.bf16.gmra.mxu1 %v6714_v16 }
  0xd6   : > { %1712 = vmatprep.mubr.bf16.mxu1 %v6719_v3 }
  0xd9   : > { %1552 = vmatmul.mubr.bf16.gmra.mxu0 %v6694_v13 }
  0xda   : > { %1559 = vmatprep.mubr.bf16.mxu0 %v6732_v61 }
  0xdd   : > { %1713 = vmatmul.mubr.bf16.gmra.mxu1 %v6746_v54 }
  0xde   : > { %1720 = vmatprep.mubr.bf16.mxu1 %v6751_v31 }
  0xe1   : > { %1560 = vmatmul.mubr.bf16.gmra.mxu0 %v6719_v3 }
  0xe2   : > { %1567 = vmatprep.mubr.bf16.mxu0 %v6756_v26 }
  0xe5   : > { %1721 = vmatmul.mubr.bf16.gmra.mxu1 %v6770_v51 }
  0xe6   : > { %1728 = vmatprep.mubr.bf16.mxu1 %v6773_v37 }
  0xe9   : > { %1568 = vmatmul.mubr.bf16.gmra.mxu0 %v6751_v31 }
  0xea   : > { %1575 = vmatprep.mubr.bf16.mxu0 %v6780_v21 }
  0xed   : > { %1729 = vmatmul.mubr.bf16.gmra.mxu1 %v6790_v14 }
  0xee   : > { %1736 = vmatprep.mubr.bf16.mxu1 %v6795_v5 }
  0xf1   : > { %1576 = vmatmul.mubr.bf16.gmra.mxu0 %v6773_v37 }
  0xf2   : > { %1777 = vmatprep.mubr.bf16.mxu0 %v6290_v53  ;;  %v5720_v53 = vld [vmem:[#allocation6 + $0x220] sm:$0xff]  }
  0xf5   : > { %1737 = vmatmul.mubr.bf16.gmra.mxu1 %v6802_v35 }
  0xf6   : > { %1938 = vmatprep.mubr.bf16.mxu1 %v6287_v44 }
  0xf9   : > { %1778 = vmatmul.mubr.bf16.vlgmr.msra.gmra.mxu0 %v6274_v28  ;;  %v5721_v28 = vld [vmem:[#allocation6 + $0x218] sm:$0xff]  }
  0xfa   : > { %5486 = vmatpush3.bf16.msra.mxu0 %v6534_v30  ;;  %1785 = vmatprep.mubr.bf16.mxu0 %v6314_v24  ;;  %v5722_v30 = vld [vmem:[#allocation6 + $0x210] sm:$0xff]  }
  0xfb   : > { %5487 = vmatprep.subr.bf16.mxu0 %v5718_v59 }
  0xfd   : > { %1939 = vmatmul.mubr.bf16.vlgmr.msra.gmra.mxu1 %v6266_v19  ;;  %v5723_v19 = vld [vmem:[#allocation6 + $0x208] sm:$0xff]  }
  0xfe   : > { %5488 = vmatpush3.bf16.msra.mxu0 %v5718_v59  ;;  %1946 = vmatprep.mubr.bf16.mxu1 %v6304_v15 }
  0xff   : > { %5489 = vmatprep.subr.bf16.mxu0 %v5719_v45 }
 0x101   : > { %1786 = vmatmul.mubr.bf16.gmra.mxu0 %v6287_v44  ;;  %v5724_v44 = vld [vmem:[#allocation6 + $0x200] sm:$0xff]  }
 0x102   : > { %1793 = vmatprep.mubr.bf16.mxu0 %v6362_v23  ;;  %5490 = vmatpush3.bf16.msra.mxu0 %v5719_v45 }
 0x103   : > { %5491 = vmatprep.subr.bf16.mxu0 %v5720_v53 }
 0x105   : > { %1947 = vmatmul.mubr.bf16.gmra.mxu1 %v6294_v2 }
 0x106   : > { %5492 = vmatpush3.bf16.msra.mxu0 %v5720_v53  ;;  %1954 = vmatprep.mubr.bf16.mxu1 %v6338_v48 }
 0x107   : > { %5493 = vmatprep.subr.bf16.mxu0 %v5721_v28 }
 0x109   : > { %1794 = vmatmul.mubr.bf16.gmra.mxu0 %v6304_v15 }
 0x10a   : > { %1801 = vmatprep.mubr.bf16.mxu0 %v6431_v58  ;;  %5494 = vmatpush3.bf16.msra.mxu0 %v5721_v28 }
 0x10b   : > { %5495 = vmatprep.subr.bf16.mxu0 %v5722_v30 }
 0x10d   : > { %1955 = vmatmul.mubr.bf16.gmra.mxu1 %v6319_v25 }
 0x10e   : > { %5496 = vmatpush3.bf16.msra.mxu0 %v5722_v30  ;;  %1962 = vmatprep.mubr.bf16.mxu1 %v6383_v41 }
 0x10f   : > { %5497 = vmatprep.subr.bf16.mxu0 %v5723_v19 }
 0x111   : > { %1802 = vmatmul.mubr.bf16.gmra.mxu0 %v6338_v48 }
 0x112   : > { %1809 = vmatprep.mubr.bf16.mxu0 %v6472_v10  ;;  %5498 = vmatpush3.bf16.msra.mxu0 %v5723_v19  ;;  %v5725_v19 = vld [vmem:[#allocation8 + $0x78] sm:$0xff]  }
 0x113   : > { %5499 = vmatprep.subr.bf16.mxu0 %v5724_v44  ;;  %5013 = vmatprep.subr.bf16.mxu1 %v5725_v19  ;;  %v5727_v19 = vld [vmem:[#allocation8 + $0x70] sm:$0xff]  }
 0x115   : > { %1963 = vmatmul.mubr.bf16.gmra.mxu1 %v6370_v32 }
 0x116   : > { %5500 = vmatpush3.bf16.msra.mxu0 %v5724_v44  ;;  %1970 = vmatprep.mubr.bf16.mxu1 %v6460_v20 }
 0x119   : > { %1810 = vmatmul.mubr.bf16.gmra.mxu0 %v6383_v41 }
 0x11a   : > { %1817 = vmatprep.mubr.bf16.mxu0 %v6536_v6 }
 0x11d   : > { %1971 = vmatmul.mubr.bf16.gmra.mxu1 %v6440_v29 }
 0x11e   : > { %1978 = vmatprep.mubr.bf16.mxu1 %v6508_v39 }
 0x121   : > { %1818 = vmatmul.mubr.bf16.gmra.mxu0 %v6460_v20 }
 0x122   : > { %1825 = vmatprep.mubr.bf16.mxu0 %v6589_v46 }
 0x125   : > { %1979 = vmatmul.mubr.bf16.gmra.mxu1 %v6497_v56 }
 0x126   : > { %1986 = vmatprep.mubr.bf16.mxu1 %v6567_v18 }
 0x129   : > { %1826 = vmatmul.mubr.bf16.gmra.mxu0 %v6508_v39 }
 0x12a   : > { %1833 = vmatprep.mubr.bf16.mxu0 %v6631_v52 }
 0x12d   : > { %1987 = vmatmul.mubr.bf16.gmra.mxu1 %v6541_v40  ;;  %v6845_v40 = vld [vmem:[%s8310_s2] ss:$0 sm:$0xff] }
 0x12e   : > { %1994 = vmatprep.mubr.bf16.mxu1 %v6609_v47 }
 0x131   : > { %1834 = vmatmul.mubr.bf16.gmra.mxu0 %v6567_v18 }
 0x132   : > { %1841 = vmatprep.mubr.bf16.mxu0 %v6663_v33 }
 0x135   : > { %1995 = vmatmul.mubr.bf16.gmra.mxu1 %v6594_v1 }
 0x136   : > { %2002 = vmatprep.mubr.bf16.mxu1 %v6649_v57 }
 0x137   : > { %v4557_v2 = vpop.f32.mrf.mxu0 }
 0x139   : > { %v4558_v56 = vpop.f32.mrf.mxu0  ;;  %1842 = vmatmul.mubr.bf16.gmra.mxu0 %v6609_v47 }
 0x13a   : > { %v4559_v15 = vadd.f32 %v4558_v56, %v4557_v2  ;;  %1849 = vmatprep.mubr.bf16.mxu0 %v6689_v36  ;;  %v5726_v2 = vld [vmem:[#allocation8 + $0x38] sm:$0xff]  }
 0x13b   : > { %v4560_v39 = vpop.f32.mrf.mxu0  ;;  %5014 = vmatpush3.bf16.msra.mxu1 %v5726_v2 }
 0x13c   : > { %v1458_v32 = vadd.f32 %v4559_v15, %v6845_v40  ;;  %5015 = vmatprep.subr.bf16.mxu1 %v5727_v19 }
 0x13d   : > { %v4561_v25 = vpop.f32.mrf.mxu0  ;;  %v4669_v18 = vpop.f32.mrf.mxu1  ;;  %2003 = vmatmul.mubr.bf16.gmra.mxu1 %v6636_v0 }
 0x13e   : > { %v4562_v48 = vadd.f32 %v4561_v25, %v4560_v39  ;;  %2010 = vmatprep.mubr.bf16.mxu1 %v6675_v50 }
 0x13f   : > { %v4670_v41 = vpop.f32.mrf.mxu1 }
 0x140   : > { %v4671_v20 = vadd.f32 %v4670_v41, %v4669_v18  ;;  %v1461_v34 = vadd.f32 %v4562_v48, %v6845_v40 }
 0x141   : > { %v4563_v29 = vpop.f32.mrf.mxu0  ;;  %1850 = vmatmul.mubr.bf16.gmra.mxu0 %v6649_v57  ;;  %v4672_v1 = vpop.f32.mrf.mxu1 }
 0x142   : > { %1857 = vmatprep.mubr.bf16.mxu0 %v6714_v16  ;;  %v6852_v47 = vadd.f32 %v4671_v20, %v1458_v32 }
 0x143   : > { %v4564_v49 = vpop.f32.mrf.mxu0  ;;  %v4673_v62 = vpop.f32.mrf.mxu1 }
 0x144   : > { %v4565_v22 = vadd.f32 %v4564_v49, %v4563_v29  ;;  %v4674_v0 = vadd.f32 %v4673_v62, %v4672_v1 }
 0x145   : > { %v4566_v42 = vpop.f32.mrf.mxu0  ;;  %v4675_v7 = vpop.f32.mrf.mxu1  ;;  %2011 = vmatmul.mubr.bf16.gmra.mxu1 %v6668_v8 }
 0x146   : > { %v6856_v17 = vadd.f32 %v4674_v0, %v1461_v34  ;;  %v1466_v38 = vadd.f32 %v4565_v22, %v6845_v40  ;;  %2018 = vmatprep.mubr.bf16.mxu1 %v6699_v55 }
 0x147   : > { %v4567_v57 = vpop.f32.mrf.mxu0  ;;  %v4676_v60 = vpop.f32.mrf.mxu1 }
 0x148   : > { %v4568_v27 = vadd.f32 %v4567_v57, %v4566_v42  ;;  %v4677_v63 = vadd.f32 %v4676_v60, %v4675_v7  ;;  %v474_v42 = vld [vmem:[#allocation2 + $0x190] sm:$0x3] }
 0x149   : > { %v4569_v4 = vpop.f32.mrf.mxu0  ;;  %1858 = vmatmul.mubr.bf16.gmra.mxu0 %v6675_v50  ;;  %v4678_v9 = vpop.f32.mrf.mxu1 }
 0x14a   : > { %1865 = vmatprep.mubr.bf16.mxu0 %v6746_v54  ;;  %v6862_v43 = vadd.f32 %v4677_v63, %v1466_v38  ;;  %v1469_v8 = vadd.f32 %v4568_v27, %v6845_v40  ;;  %v755_v63 = vrot.slane %v6785_v12, 1 }
 0x14b   : > { %v4570_v59 = vpop.f32.mrf.mxu0  ;;  %v4679_v45 = vpop.f32.mrf.mxu1 }
 0x14c   : > { %v4571_v53 = vadd.f32 %v4570_v59, %v4569_v4  ;;  %v4680_v28 = vadd.f32 %v4679_v45, %v4678_v9  ;;  %v758_v4 = vrot.slane %v474_v42, 1 }
 0x14d   : > { %v4572_v30 = vpop.f32.mrf.mxu0  ;;  %v4681_v44 = vpop.f32.mrf.mxu1  ;;  %2019 = vmatmul.mubr.bf16.gmra.mxu1 %v6694_v13 }
 0x14e   : > { %v6866_v56 = vadd.f32 %v4680_v28, %v1469_v8  ;;  %v1474_v50 = vadd.f32 %v4571_v53, %v6845_v40  ;;  %2026 = vmatprep.mubr.bf16.mxu1 %v6732_v61 }
 0x14f   : > { %v4573_v15 = vpop.f32.mrf.mxu0  ;;  %v4682_v39 = vpop.f32.mrf.mxu1 }
 0x150   : > { %v4574_v25 = vadd.f32 %v4573_v15, %v4572_v30  ;;  %v4683_v48 = vadd.f32 %v4682_v39, %v4681_v44  ;;  %v5728_v15 = vld [vmem:[#allocation8 + $0x30] sm:$0xff]  }
 0x151   : > { %v4575_v18 = vpop.f32.mrf.mxu0  ;;  %1866 = vmatmul.mubr.bf16.gmra.mxu0 %v6699_v55  ;;  %v4684_v32 = vpop.f32.mrf.mxu1  ;;  %5016 = vmatpush3.bf16.msra.mxu1 %v5728_v15 }
 0x152   : > { %1873 = vmatprep.mubr.bf16.mxu0 %v6770_v51  ;;  %v6872_v13 = vadd.f32 %v4683_v48, %v1474_v50  ;;  %v1477_v41 = vadd.f32 %v4574_v25, %v6845_v40  ;;  %v762_v50 = vrot.slane %v6785_v12, 2  ;;  %v6897_v12 = vld [vmem:[#allocation2 + $0x1a8] sm:$0x3] }
 0x153   : > { %v4576_v20 = vpop.f32.mrf.mxu0  ;;  %v4685_v29 = vpop.f32.mrf.mxu1 }
 0x154   : > { %v4577_v1 = vadd.f32 %v4576_v20, %v4575_v18  ;;  %v4686_v34 = vadd.f32 %v4685_v29, %v4684_v32  ;;  %v763_v18 = vrot.slane %v6787_v11, 2  ;;  %v765_v32 = vrot.slane %v474_v42, 2 }
 0x155   : > { %v4578_v49 = vpop.f32.mrf.mxu0  ;;  %v4687_v62 = vpop.f32.mrf.mxu1  ;;  %2027 = vmatmul.mubr.bf16.gmra.mxu1 %v6719_v3  ;;  %v756_v3 = vrot.slane %v6787_v11, 1 }
 0x156   : > { %v6876_v22 = vadd.f32 %v4686_v34, %v1477_v41  ;;  %v1482_v0 = vadd.f32 %v4577_v1, %v6845_v40  ;;  %2034 = vmatprep.mubr.bf16.mxu1 %v6756_v26 }
 0x157   : > { %v4579_v55 = vpop.f32.mrf.mxu0  ;;  %v4688_v7 = vpop.f32.mrf.mxu1  ;;  %v759_v2 = vsel %vm526_vm0, %v756_v3, %v758_v4 }
 0x158   : > { %v4580_v38 = vadd.f32 %v4579_v55, %v4578_v49  ;;  %v4689_v57 = vadd.f32 %v4688_v7, %v4687_v62  ;;  %v766_v55 = vsel %vm639_vm1, %v763_v18, %v765_v32  ;;  %v5729_v32 = vld [vmem:[#allocation8 + $0x68] sm:$0xff]  }
 0x159   : > { %v4581_v60 = vpop.f32.mrf.mxu0  ;;  %1874 = vmatmul.mubr.bf16.gmra.mxu0 %v6732_v61  ;;  %v4690_v27 = vpop.f32.mrf.mxu1  ;;  %v757_v61 = vsel %vm526_vm0, %v755_v63, %v756_v3  ;;  %5017 = vmatprep.subr.bf16.mxu1 %v5729_v32  ;;  %v5731_v32 = vld [vmem:[#allocation8 + $0x60] sm:$0xff]  }
 0x15a   : > { %1881 = vmatprep.mubr.bf16.mxu0 %v6790_v14  ;;  %v6884_v9 = vadd.f32 %v4689_v57, %v1482_v0  ;;  %v1485_v8 = vadd.f32 %v4580_v38, %v6845_v40  ;;  %v835_v34 = vpack.c.bf16 %v759_v2, %v757_v61  ;;  %v764_v0 = vsel %vm639_vm1, %v762_v50, %v763_v18  ;;  %v6905_v38 = vld [vmem:[#allocation2] sm:$0xff] }
 0x15b   : > { %v4582_v59 = vpop.f32.mrf.mxu0  ;;  %v4691_v45 = vpop.f32.mrf.mxu1  ;;  %v775_v57 = vrot.slane %v6897_v12, 1  ;;  %v6912_v3 = vpack.c.bf16 %v766_v55, %v764_v0 }
 0x15c   : > { %v4583_v53 = vadd.f32 %v4582_v59, %v4581_v60  ;;  %v4692_v28 = vadd.f32 %v4691_v45, %v4690_v27 }
 0x15d   : > { %v4584_v30 = vpop.f32.mrf.mxu0  ;;  %v4693_v44 = vpop.f32.mrf.mxu1  ;;  %2035 = vmatmul.mubr.bf16.gmra.mxu1 %v6751_v31 }
 0x15e   : > { %v6891_v39 = vadd.f32 %v4692_v28, %v1485_v8  ;;  %v1490_v25 = vadd.f32 %v4583_v53, %v6845_v40  ;;  %2042 = vmatprep.mubr.bf16.mxu1 %v6780_v21 }
 0x15f   : > { %v4585_v48 = vpop.f32.mrf.mxu0  ;;  %v4694_v41 = vpop.f32.mrf.mxu1 }
 0x160   : > { %v4586_v31 = vadd.f32 %v4585_v48, %v4584_v30  ;;  %v4695_v20 = vadd.f32 %v4694_v41, %v4693_v44 }
 0x161   : > { %v4587_v29 = vpop.f32.mrf.mxu0  ;;  %1882 = vmatmul.mubr.bf16.gmra.mxu0 %v6756_v26  ;;  %v4696_v1 = vpop.f32.mrf.mxu1  ;;  %v6908_v26 = vrot.slane %v6905_v38, 1 }
 0x162   : > { %1889 = vmatprep.mubr.bf16.mxu0 %v6802_v35  ;;  %v6900_v49 = vadd.f32 %v4695_v20, %v1490_v25  ;;  %v1493_v62 = vadd.f32 %v4586_v31, %v6845_v40  ;;  %v5730_v31 = vld [vmem:[#allocation8 + $0x28] sm:$0xff]  }
 0x163   : > { %v4588_v11 = vpop.f32.mrf.mxu0  ;;  %v4697_v42 = vpop.f32.mrf.mxu1  ;;  %v776_v28 = vsel %vm526_vm0, %v6908_v26, %v775_v57  ;;  %5018 = vmatpush3.bf16.msra.mxu1 %v5730_v31  ;;  %v5732_v31 = vld [vmem:[#allocation8 + $0x20] sm:$0xff]  }
 0x164   : > { %v4589_v7 = vadd.f32 %v4588_v11, %v4587_v29  ;;  %v4698_v60 = vadd.f32 %v4697_v42, %v4696_v1  ;;  %v838_v50 = vpack.c.bf16 %v776_v28, %v6908_v26  ;;  %v6931_v42 = vpack.c.bf16 %v6905_v38, %v6905_v38  ;;  %5019 = vmatprep.subr.bf16.mxu1 %v5731_v32  ;;  %v5733_v32 = vld [vmem:[#allocation8 + $0x58] sm:$0xff]  }
 0x165   : > { %v4590_v27 = vpop.f32.mrf.mxu0  ;;  %v4699_v63 = vpop.f32.mrf.mxu1  ;;  %2043 = vmatmul.mubr.bf16.gmra.mxu1 %v6773_v37 }
 0x166   : > { %v6914_v4 = vadd.f32 %v4698_v60, %v1493_v62  ;;  %v1498_v8 = vadd.f32 %v4589_v7, %v6845_v40  ;;  %2050 = vmatprep.mubr.bf16.mxu1 %v835_v34 }
 0x167   : > { %v4591_v59 = vpop.f32.mrf.mxu0  ;;  %v4700_v45 = vpop.f32.mrf.mxu1  ;;  %5020 = vmatpush3.bf16.msra.mxu1 %v5732_v31  ;;  %v5734_v31 = vld [vmem:[#allocation8 + $0x18] sm:$0xff]  }
 0x168   : > { %v4592_v53 = vadd.f32 %v4591_v59, %v4590_v27  ;;  %v4701_v30 = vadd.f32 %v4700_v45, %v4699_v63  ;;  %5021 = vmatprep.subr.bf16.mxu1 %v5733_v32  ;;  %v5735_v32 = vld [vmem:[#allocation8 + $0x50] sm:$0xff]  }
 0x169   : > { %v4593_v19 = vpop.f32.mrf.mxu0  ;;  %1890 = vmatmul.mubr.bf16.gmra.mxu0 %v6780_v21  ;;  %v4702_v44 = vpop.f32.mrf.mxu1 }
 0x16a   : > { %1897 = vmatprep.mubr.bf16.mxu0 %v6912_v3  ;;  %v6921_v37 = vadd.f32 %v4701_v30, %v1498_v8  ;;  %v1501_v61 = vadd.f32 %v4592_v53, %v6845_v40 }
 0x16b   : > { %v4594_v2 = vpop.f32.mrf.mxu0  ;;  %v4703_v15 = vpop.f32.mrf.mxu1  ;;  %5022 = vmatpush3.bf16.msra.mxu1 %v5734_v31  ;;  %v5736_v31 = vld [vmem:[#allocation8 + $0x10] sm:$0xff]  }
 0x16c   : > { %v4595_v25 = vadd.f32 %v4594_v2, %v4593_v19  ;;  %v4704_v48 = vadd.f32 %v4703_v15, %v4702_v44  ;;  %5023 = vmatprep.subr.bf16.mxu1 %v5735_v32 }
 0x16d   : > { %v4596_v18 = vpop.f32.mrf.mxu0  ;;  %v4705_v41 = vpop.f32.mrf.mxu1  ;;  %2051 = vmatmul.mubr.bf16.gmra.mxu1 %v6795_v5 }
 0x16e   : > { %v6926_v21 = vadd.f32 %v4704_v48, %v1501_v61  ;;  %v1506_v20 = vadd.f32 %v4595_v25, %v6845_v40  ;;  %2058 = vmatprep.mubr.bf16.mxu1 %v838_v50 }
 0x16f   : > { %v4597_v29 = vpop.f32.mrf.mxu0  ;;  %v4706_v1 = vpop.f32.mrf.mxu1  ;;  %5024 = vmatpush3.bf16.msra.mxu1 %v5736_v31  ;;  %v5737_v31 = vld [vmem:[#allocation8 + $0x48] sm:$0xff]  }
 0x170   : > { %v4598_v62 = vadd.f32 %v4597_v29, %v4596_v18  ;;  %v4707_v11 = vadd.f32 %v4706_v1, %v4705_v41  ;;  %5025 = vmatprep.subr.bf16.mxu1 %v5737_v31 }
 0x171   : > { %v4599_v0 = vpop.f32.mrf.mxu0  ;;  %1898 = vmatmul.mubr.bf16.gmra.mxu0 %v835_v34  ;;  %v4708_v55 = vpop.f32.mrf.mxu1 }
 0x172   : > { %5501 = vmatprep.mubr.bf16.mxu0 %v6314_v24  ;;  %v6934_v5 = vadd.f32 %v4707_v11, %v1506_v20  ;;  %v1509_v7 = vadd.f32 %v4598_v62, %v6845_v40 }
 0x173   : > { %v4600_v57 = vpop.f32.mrf.mxu0  ;;  %v4709_v60 = vpop.f32.mrf.mxu1 }
 0x174   : > { %v4601_v27 = vadd.f32 %v4600_v57, %v4599_v0  ;;  %v4710_v63 = vadd.f32 %v4709_v60, %v4708_v55 }
 0x175   : > { %v4602_v8 = vpop.f32.mrf.mxu0  ;;  %v4711_v59 = vpop.f32.mrf.mxu1  ;;  %2059 = vmatmul.mubr.bf16.gmra.mxu1 %v6931_v42 }
 0x176   : > { %v6938_v34 = vadd.f32 %v4710_v63, %v1509_v7  ;;  %v1514_v45 = vadd.f32 %v4601_v27, %v6845_v40 }
 0x177   : > { %v4603_v53 = vpop.f32.mrf.mxu0  ;;  %v4712_v28 = vpop.f32.mrf.mxu1 }
 0x178   : > { %v4604_v30 = vadd.f32 %v4603_v53, %v4602_v8  ;;  %v4713_v24 = vadd.f32 %v4712_v28, %v4711_v59 }
 0x179   : > { %v4605_v19 = vpop.f32.mrf.mxu0  ;;  %5502 = vmatmul.mubr.bf16.vlgmr.msra.gmra.mxu0 %v6362_v23  ;;  %v4714_v44 = vpop.f32.mrf.mxu1 }
 0x17a   : > { %5505 = vmatprep.mubr.bf16.mxu0 %v6431_v58  ;;  %v6943_v61 = vadd.f32 %v4713_v24, %v1514_v45  ;;  %v1517_v2 = vadd.f32 %v4604_v30, %v6845_v40 }
 0x17b   : > { %v4606_v50 = vpop.f32.mrf.mxu0  ;;  %v4715_v15 = vpop.f32.mrf.mxu1 }
 0x17c   : > { %v4607_v25 = vadd.f32 %v4606_v50, %v4605_v19  ;;  %v4716_v48 = vadd.f32 %v4715_v15, %v4714_v44 }
 0x17d   : > { %v4608_v18 = vpop.f32.mrf.mxu0  ;;  %v4717_v41 = vpop.f32.mrf.mxu1 }
 0x17e   : > { %v6946_v20 = vadd.f32 %v4716_v48, %v1517_v2  ;;  %v1522_v29 = vadd.f32 %v4607_v25, %v6845_v40 }
 0x17f   : > { %v4609_v23 = vpop.f32.mrf.mxu0  ;;  %v4718_v1 = vpop.f32.mrf.mxu1 }
 0x180   : > { %v4610_v58 = vadd.f32 %v4609_v23, %v4608_v18  ;;  %v4719_v62 = vadd.f32 %v4718_v1, %v4717_v41 }
 0x181   : > { %v4611_v11 = vpop.f32.mrf.mxu0  ;;  %5506 = vmatmul.mubr.bf16.gmra.mxu0 %v6472_v10  ;;  %v4720_v0 = vpop.f32.mrf.mxu1 }
 0x182   : > { %5509 = vmatprep.mubr.bf16.mxu0 %v6536_v6  ;;  %v6951_v55 = vadd.f32 %v4719_v62, %v1522_v29  ;;  %v1525_v7 = vadd.f32 %v4610_v58, %v6845_v40 }
 0x183   : > { %v4612_v57 = vpop.f32.mrf.mxu0  ;;  %v4721_v60 = vpop.f32.mrf.mxu1 }
 0x184   : > { %v4613_v27 = vadd.f32 %v4612_v57, %v4611_v11  ;;  %v4722_v63 = vadd.f32 %v4721_v60, %v4720_v0 }
 0x185   : > { %v4614_v8 = vpop.f32.mrf.mxu0  ;;  %v4723_v59 = vpop.f32.mrf.mxu1 }
 0x186   : > { %v6954_v45 = vadd.f32 %v4722_v63, %v1525_v7  ;;  %v1530_v53 = vadd.f32 %v4613_v27, %v6845_v40 }
 0x187   : > { %v4615_v28 = vpop.f32.mrf.mxu0  ;;  %v4724_v30 = vpop.f32.mrf.mxu1 }
 0x188   : > { %v4616_v10 = vadd.f32 %v4615_v28, %v4614_v8  ;;  %v4725_v24 = vadd.f32 %v4724_v30, %v4723_v59 }
 0x189   : > { %v4617_v19 = vpop.f32.mrf.mxu0  ;;  %5510 = vmatmul.mubr.bf16.gmra.mxu0 %v6589_v46  ;;  %v4726_v6 = vpop.f32.mrf.mxu1 }
 0x18a   : > { %5513 = vmatprep.mubr.bf16.mxu0 %v6631_v52  ;;  %v6959_v44 = vadd.f32 %v4725_v24, %v1530_v53  ;;  %v1533_v2 = vadd.f32 %v4616_v10, %v6845_v40 }
 0x18b   : > { %v4618_v50 = vpop.f32.mrf.mxu0  ;;  %v4727_v15 = vpop.f32.mrf.mxu1 }
 0x18c   : > { %v4619_v25 = vadd.f32 %v4618_v50, %v4617_v19  ;;  %v4728_v48 = vadd.f32 %v4727_v15, %v4726_v6 }
 0x18d   : > { %v4620_v18 = vpop.f32.mrf.mxu0  ;;  %v4729_v41 = vpop.f32.mrf.mxu1 }
 0x18e   : > { %v6962_v29 = vadd.f32 %v4728_v48, %v1533_v2  ;;  %v1538_v23 = vadd.f32 %v4619_v25, %v6845_v40 }
 0x18f   : > { %v4621_v46 = vpop.f32.mrf.mxu0  ;;  %v4730_v1 = vpop.f32.mrf.mxu1 }
 0x190   : > { %v4622_v52 = vadd.f32 %v4621_v46, %v4620_v18  ;;  %v4731_v58 = vadd.f32 %v4730_v1, %v4729_v41 }
 0x191   : > { %v4623_v62 = vpop.f32.mrf.mxu0  ;;  %5514 = vmatmul.mubr.bf16.gmra.mxu0 %v6663_v33  ;;  %v4732_v11 = vpop.f32.mrf.mxu1 }
 0x192   : > { %5517 = vmatprep.mubr.bf16.mxu0 %v6689_v36  ;;  %v6967_v0 = vadd.f32 %v4731_v58, %v1538_v23  ;;  %v1541_v7 = vadd.f32 %v4622_v52, %v6845_v40 }
 0x193   : > { %v4624_v57 = vpop.f32.mrf.mxu0  ;;  %v4733_v60 = vpop.f32.mrf.mxu1 }
 0x194   : > { %v4625_v27 = vadd.f32 %v4624_v57, %v4623_v62  ;;  %v4734_v63 = vadd.f32 %v4733_v60, %v4732_v11 }
 0x195   : > { %v4626_v8 = vpop.f32.mrf.mxu0  ;;  %v4735_v59 = vpop.f32.mrf.mxu1 }
 0x196   : > { %v6970_v53 = vadd.f32 %v4734_v63, %v1541_v7  ;;  %v1546_v28 = vadd.f32 %v4625_v27, %v6845_v40 }
 0x197   : > { %v4627_v30 = vpop.f32.mrf.mxu0  ;;  %v4736_v10 = vpop.f32.mrf.mxu1 }
 0x198   : > { %v4628_v33 = vadd.f32 %v4627_v30, %v4626_v8  ;;  %v4737_v24 = vadd.f32 %v4736_v10, %v4735_v59  ;;  %v782_v59 = vrot.slane %v6897_v12, 2  ;;  %v6988_v30 = vrot.slane %v6905_v38, 2 }
 0x199   : > { %v4629_v19 = vpop.f32.mrf.mxu0  ;;  %5518 = vmatmul.mubr.bf16.gmra.mxu0 %v6714_v16  ;;  %v4738_v36 = vpop.f32.mrf.mxu1 }
 0x19a   : > { %5521 = vmatprep.mubr.bf16.mxu0 %v6746_v54  ;;  %v6975_v6 = vadd.f32 %v4737_v24, %v1546_v28  ;;  %v1549_v2 = vadd.f32 %v4628_v33, %v6845_v40  ;;  %v783_v12 = vsel %vm639_vm1, %v6988_v30, %v782_v59 }
 0x19b   : > { %v4630_v50 = vpop.f32.mrf.mxu0  ;;  %v4739_v15 = vpop.f32.mrf.mxu1 }
 0x19c   : > { %v4631_v25 = vadd.f32 %v4630_v50, %v4629_v19  ;;  %v4740_v48 = vadd.f32 %v4739_v15, %v4738_v36 }
 0x19d   : > { %v4632_v18 = vpop.f32.mrf.mxu0  ;;  %v4741_v41 = vpop.f32.mrf.mxu1 }
 0x19e   : > { %v6978_v23 = vadd.f32 %v4740_v48, %v1549_v2  ;;  %v1554_v46 = vadd.f32 %v4631_v25, %v6845_v40 }
 0x19f   : > { %v4633_v16 = vpop.f32.mrf.mxu0  ;;  %v4742_v1 = vpop.f32.mrf.mxu1 }
 0x1a0   : > { %v4634_v54 = vadd.f32 %v4633_v16, %v4632_v18  ;;  %v4743_v52 = vadd.f32 %v4742_v1, %v4741_v41  ;;  %v839_v41 = vpack.c.bf16 %v783_v12, %v6988_v30 }
 0x1a1   : > { %v4635_v58 = vpop.f32.mrf.mxu0  ;;  %5522 = vmatmul.mubr.bf16.gmra.mxu0 %v6770_v51  ;;  %v4744_v62 = vpop.f32.mrf.mxu1 }
 0x1a2   : > { %5525 = vmatprep.mubr.bf16.mxu0 %v6790_v14  ;;  %v6983_v11 = vadd.f32 %v4743_v52, %v1554_v46  ;;  %v1557_v7 = vadd.f32 %v4634_v54, %v6845_v40 }
 0x1a3   : > { %v4636_v57 = vpop.f32.mrf.mxu0  ;;  %v4745_v60 = vpop.f32.mrf.mxu1 }
 0x1a4   : > { %v4637_v27 = vadd.f32 %v4636_v57, %v4635_v58  ;;  %v4746_v63 = vadd.f32 %v4745_v60, %v4744_v62  ;;  %v5739_v58 = vld [vmem:[#allocation8 + $0xf8] sm:$0xff]  }
 0x1a5   : > { %v4638_v8 = vpop.f32.mrf.mxu0  ;;  %v4747_v28 = vpop.f32.mrf.mxu1  ;;  %v5740_v57 = vld [vmem:[#allocation8 + $0xb8] sm:$0xff]   ;;  %5125 = vmatprep.subr.bf16.mxu0 %v5739_v58 }
 0x1a6   : > { %v6990_v10 = vadd.f32 %v4746_v63, %v1557_v7  ;;  %v1562_v51 = vadd.f32 %v4637_v27, %v6845_v40  ;;  %5126 = vmatpush3.bf16.msra.mxu0 %v5740_v57 }
 0x1a7   : > { %v4639_v14 = vpop.f32.mrf.mxu0  ;;  %v4748_v33 = vpop.f32.mrf.mxu1 }
 0x1a8   : > { %v4640_v24 = vadd.f32 %v4639_v14, %v4638_v8  ;;  %v4749_v19 = vadd.f32 %v4748_v33, %v4747_v28 }
 0x1a9   : > { %v4641_v36 = vpop.f32.mrf.mxu0  ;;  %5526 = vmatmul.mubr.bf16.gmra.mxu0 %v6802_v35  ;;  %v4750_v2 = vpop.f32.mrf.mxu1  ;;  %v5738_v35 = vld [vmem:[#allocation8 + $0x8] sm:$0xff]  }
 0x1aa   : > { %5529 = vmatprep.mubr.bf16.mxu0 %v6912_v3  ;;  %v6997_v50 = vadd.f32 %v4749_v19, %v1562_v51  ;;  %v1565_v38 = vadd.f32 %v4640_v24, %v6845_v40  ;;  %5026 = vmatpush3.bf16.msra.mxu1 %v5738_v35  ;;  %v5741_v51 = vld [vmem:[#allocation8 + $0xf0] sm:$0xff]  }
 0x1ab   : > { %v4642_v15 = vpop.f32.mrf.mxu0  ;;  %v4751_v25 = vpop.f32.mrf.mxu1  ;;  %v5742_v24 = vld [vmem:[#allocation8 + $0xb0] sm:$0xff]   ;;  %5127 = vmatprep.subr.bf16.mxu0 %v5741_v51  ;;  %v5749_v51 = vld [vmem:[#allocation8 + $0xd8] sm:$0xff]  }
 0x1ac   : > { %v4643_v48 = vadd.f32 %v4642_v15, %v4641_v36  ;;  %v4752_v18 = vadd.f32 %v4751_v25, %v4750_v2  ;;  %5128 = vmatpush3.bf16.msra.mxu0 %v5742_v24  ;;  %v5743_v25 = vld [vmem:[#allocation8 + $0xe8] sm:$0xff]  }
 0x1ad   : > { %v4644_v32 = vpop.f32.mrf.mxu0  ;;  %v4753_v46 = vpop.f32.mrf.mxu1  ;;  %5129 = vmatprep.subr.bf16.mxu0 %v5743_v25 }
 0x1ae   : > { %v7001_v16 = vadd.f32 %v4752_v18, %v1565_v38  ;;  %v1570_v3 = vadd.f32 %v4643_v48, %v6845_v40 }
 0x1af   : > { %v4645_v1 = vpop.f32.mrf.mxu0  ;;  %v4754_v54 = vpop.f32.mrf.mxu1 }
 0x1b0   : > { %v4646_v52 = vadd.f32 %v4645_v1, %v4644_v32  ;;  %v4755_v62 = vadd.f32 %v4754_v54, %v4753_v46  ;;  %v5744_v32 = vld [vmem:[#allocation8 + $0xa8] sm:$0xff]   ;;  %v5747_v54 = vld [vmem:[#allocation8 + $0xe0] sm:$0xff]  }
 0x1b1   : > { %v4647_v7 = vpop.f32.mrf.mxu0  ;;  %5530 = vmatmul.mubr.bf16.gmra.mxu0 %v839_v41  ;;  %v4756_v60 = vpop.f32.mrf.mxu1 }
 0x1b2   : > { %v7004_v27 = vadd.f32 %v4755_v62, %v1570_v3  ;;  %v1573_v63 = vadd.f32 %v4646_v52, %v6845_v40  ;;  %5130 = vmatpush3.bf16.msra.mxu0 %v5744_v32  ;;  %v5748_v62 = vld [vmem:[#allocation8 + $0xa0] sm:$0xff]   ;;  %v5751_v32 = vld [vmem:[#allocation8 + $0xd0] sm:$0xff]  }
 0x1b3   : > { %v4648_v8 = vpop.f32.mrf.mxu0  ;;  %v4757_v59 = vpop.f32.mrf.mxu1  ;;  %5131 = vmatprep.subr.bf16.mxu0 %v5747_v54 }
 0x1b4   : > { %v4649_v28 = vadd.f32 %v4648_v8, %v4647_v7  ;;  %v4758_v14 = vadd.f32 %v4757_v59, %v4756_v60  ;;  %v5745_v60 = vld [vmem:[#allocation8 + $0x40] sm:$0xff]  }
 0x1b5   : > { %v4650_v33 = vpop.f32.mrf.mxu0  ;;  %v4759_v19 = vpop.f32.mrf.mxu1  ;;  %5027 = vmatprep.subr.bf16.mxu1 %v5745_v60 }
 0x1b6   : > { %v7007_v36 = vadd.f32 %v4758_v14, %v1573_v63  ;;  %v1578_v2 = vadd.f32 %v4649_v28, %v6845_v40  ;;  %5132 = vmatpush3.bf16.msra.mxu0 %v5748_v62  ;;  %v7016_v14 = vld [vmem:[#allocation2 + $0x10] sm:$0x3] }
 0x1b7   : > { %v4651_v12 = vpop.f32.mrf.mxu0  ;;  %v4760_v38 = vpop.f32.mrf.mxu1  ;;  %5133 = vmatprep.subr.bf16.mxu0 %v5749_v51 }
 0x1b8   : > { %v4652_v15 = vadd.f32 %v4651_v12, %v4650_v33  ;;  %v4761_v48 = vadd.f32 %v4760_v38, %v4759_v19  ;;  %v5750_v19 = vld [vmem:[#allocation8 + $0x98] sm:$0xff]  }
 0x1b9   : > { %v4781_v18 = vpop.f32.mrf.mxu0  ;;  %v4762_v41 = vpop.f32.mrf.mxu1 }
 0x1ba   : > { %v7010_v31 = vadd.f32 %v4761_v48, %v1578_v2  ;;  %v1581_v46 = vadd.f32 %v4652_v15, %v6845_v40  ;;  %v5746_v40 = vld [vmem:[#allocation8] sm:$0xff]   ;;  %v2397_v2 = vrot.slane %v7016_v14, 1  ;;  %5134 = vmatpush3.bf16.msra.mxu0 %v5750_v19  ;;  %v5755_v19 = vld [vmem:[#allocation8 + $0x178] sm:$0xff]  }
 0x1bb   : > { %v4782_v35 = vpop.f32.mrf.mxu0  ;;  %v4763_v3 = vpop.f32.mrf.mxu1  ;;  %5028 = vmatpush3.bf16.msra.mxu1 %v5746_v40  ;;  %5135 = vmatprep.subr.bf16.mxu0 %v5751_v32  ;;  %v5756_v40 = vld [vmem:[#allocation8 + $0xc0] sm:$0xff]  }
 0x1bc   : > { %8452 = vst [vmem:[#allocation29_spill] sm:$0xff] %v7010_v31  ;;  %v4783_v1 = vadd.f32 %v4782_v35, %v4781_v18  ;;  %v4764_v52 = vadd.f32 %v4763_v3, %v4762_v41  ;;  %v2398_v25 = vsel %vm526_vm0, %v6908_v26, %v2397_v2  ;;  %v5752_v3 = vld [vmem:[#allocation8 + $0x90] sm:$0xff]   ;;  %5237 = vmatprep.subr.bf16.mxu1 %v5755_v19 }
 0x1bd   : > { %v4784_v58 = vpop.f32.mrf.mxu0  ;;  %v4893_v57 = vpop.f32.mrf.mxu1  ;;  %v2653_v41 = vpack.c.bf16 %v2398_v25, %v6908_v26  ;;  %v5753_v26 = vld [vmem:[#allocation8 + $0xc8] sm:$0xff]  }
 0x1be   : > { %v1780_v7 = vadd.f32 %v4783_v1, %v6852_v47  ;;  %v7014_v63 = vadd.f32 %v4764_v52, %v1581_v46  ;;  %5136 = vmatpush3.bf16.msra.mxu0 %v5752_v3 }
 0x1bf   : > { %v4785_v8 = vpop.f32.mrf.mxu0  ;;  %v4894_v59 = vpop.f32.mrf.mxu1  ;;  %3321 = vmatprep.mubr.bf16.mxu1 %v2653_v41  ;;  %5137 = vmatprep.subr.bf16.mxu0 %v5753_v26 }
 0x1c0   : > { %8453 = vst [vmem:[#allocation30_spill] sm:$0xff] %v7014_v63  ;;  %v4786_v28 = vadd.f32 %v4785_v8, %v4784_v58  ;;  %v4895_v33 = vadd.f32 %v4894_v59, %v4893_v57  ;;  %3322 = vmatmul.mubr.bf16.vlgmr.msra.gmra.mxu1 %v6931_v42  ;;  %v5754_v57 = vld [vmem:[#allocation8 + $0x88] sm:$0xff]   ;;  %v5758_v42 = vld [vmem:[#allocation8 + $0x80] sm:$0xff]  }
 0x1c1   : > { %v4787_v24 = vpop.f32.mrf.mxu0  ;;  %v4896_v12 = vpop.f32.mrf.mxu1  ;;  %v5761_v63 = vld [vmem:[#allocation8 + $0x168] sm:$0xff]  }
 0x1c2   : > { %v1783_v47 = vadd.f32 %v4786_v28, %v6856_v17  ;;  %v7020_v15 = vadd.f32 %v4895_v33, %v1780_v7  ;;  %5138 = vmatpush3.bf16.msra.mxu0 %v5754_v57 }
 0x1c3   : > { %v4788_v38 = vpop.f32.mrf.mxu0  ;;  %v4897_v48 = vpop.f32.mrf.mxu1  ;;  %5139 = vmatprep.subr.bf16.mxu0 %v5756_v40 }
 0x1c4   : > { %v4789_v18 = vadd.f32 %v4788_v38, %v4787_v24  ;;  %v4898_v46 = vadd.f32 %v4897_v48, %v4896_v12  ;;  %v5757_v12 = vld [vmem:[#allocation8 + $0x138] sm:$0xff]  }
 0x1c5   : > { %v4790_v35 = vpop.f32.mrf.mxu0  ;;  %v7028_v1 = vpop.f32.mrf.mxu1  ;;  %5238 = vmatpush3.bf16.msra.mxu1 %v5757_v12 }
 0x1c6   : > { %v7026_v17 = vadd.f32 %v4789_v18, %v6862_v43  ;;  %v7030_v52 = vadd.f32 %v4898_v46, %v1783_v47  ;;  %5140 = vmatpush3.bf16.msra.mxu0 %v5758_v42  ;;  %v5759_v42 = vld [vmem:[#allocation8 + $0x170] sm:$0xff]  }
 0x1c7   : > { %v4791_v54 = vpop.f32.mrf.mxu0  ;;  %v7033_v58 = vpop.f32.mrf.mxu1  ;;  %5239 = vmatprep.subr.bf16.mxu1 %v5759_v42 }
 0x1c8   : > { %v4792_v62 = vadd.f32 %v4791_v54, %v4790_v35 }
 0x1c9   : > { %v4793_v7 = vpop.f32.mrf.mxu0  ;;  %v7038_v43 = vpop.f32.mrf.mxu1 }
 0x1ca   : > { %v7036_v60 = vadd.f32 %v4792_v62, %v6866_v56 }
 0x1cb   : > { %v4794_v8 = vpop.f32.mrf.mxu0  ;;  %v7040_v59 = vpop.f32.mrf.mxu1 }
 0x1cc   : > { %v4795_v28 = vadd.f32 %v4794_v8, %v4793_v7 }
 0x1cd   : > { %v4796_v51 = vpop.f32.mrf.mxu0  ;;  %v7045_v24 = vpop.f32.mrf.mxu1 }
 0x1ce   : > { %v7043_v33 = vadd.f32 %v4795_v28, %v6872_v13 }
 0x1cf   : > { %v4797_v56 = vpop.f32.mrf.mxu0  ;;  %v7047_v2 = vpop.f32.mrf.mxu1 }
 0x1d0   : > { %v4798_v47 = vadd.f32 %v4797_v56, %v4796_v51 }
 0x1d1   : > { %v4799_v38 = vpop.f32.mrf.mxu0  ;;  %v7052_v48 = vpop.f32.mrf.mxu1 }
 0x1d2   : > { %v7050_v25 = vadd.f32 %v4798_v47, %v6876_v22 }
 0x1d3   : > { %v4800_v13 = vpop.f32.mrf.mxu0  ;;  %v7054_v18 = vpop.f32.mrf.mxu1 }
 0x1d4   : > { %v4801_v32 = vadd.f32 %v4800_v13, %v4799_v38 }
 0x1d5   : > { %v4802_v41 = vpop.f32.mrf.mxu0  ;;  %v7059_v35 = vpop.f32.mrf.mxu1 }
 0x1d6   : > { %v7057_v46 = vadd.f32 %v4801_v32, %v6884_v9 }
 0x1d7   : > { %v4803_v3 = vpop.f32.mrf.mxu0  ;;  %v7061_v54 = vpop.f32.mrf.mxu1 }
 0x1d8   : > { %v4804_v62 = vadd.f32 %v4803_v3, %v4802_v41 }
 0x1d9   : > { %v4805_v26 = vpop.f32.mrf.mxu0  ;;  %v7066_v7 = vpop.f32.mrf.mxu1 }
 0x1da   : > { %v7064_v22 = vadd.f32 %v4804_v62, %v6891_v39  ;;  %v5760_v39 = vld [vmem:[#allocation8 + $0x130] sm:$0xff]  }
 0x1db   : > { %v4806_v57 = vpop.f32.mrf.mxu0  ;;  %v7068_v8 = vpop.f32.mrf.mxu1  ;;  %5240 = vmatpush3.bf16.msra.mxu1 %v5760_v39 }
 0x1dc   : > { %v4807_v28 = vadd.f32 %v4806_v57, %v4805_v26  ;;  %5241 = vmatprep.subr.bf16.mxu1 %v5761_v63 }
 0x1dd   : > { %v4808_v40 = vpop.f32.mrf.mxu0  ;;  %v7073_v51 = vpop.f32.mrf.mxu1 }
 0x1de   : > { %v7071_v9 = vadd.f32 %v4807_v28, %v6900_v49 }
 0x1df   : > { %v4809_v19 = vpop.f32.mrf.mxu0  ;;  %v7075_v56 = vpop.f32.mrf.mxu1 }
 0x1e0   : > { %v4810_v47 = vadd.f32 %v4809_v19, %v4808_v40 }
 0x1e1   : > { %v4811_v12 = vpop.f32.mrf.mxu0  ;;  %v7080_v13 = vpop.f32.mrf.mxu1 }
 0x1e2   : > { %v7078_v38 = vadd.f32 %v4810_v47, %v6914_v4 }
 0x1e3   : > { %v4812_v32 = vpop.f32.mrf.mxu0  ;;  %v7082_v41 = vpop.f32.mrf.mxu1 }
 0x1e4   : > { %8454 = vst [vmem:[#allocation31_spill] sm:$0xff] %v7078_v38  ;;  %v4813_v49 = vadd.f32 %v4812_v32, %v4811_v12 }
 0x1e5   : > { %v4814_v3 = vpop.f32.mrf.mxu0  ;;  %v7087_v26 = vpop.f32.mrf.mxu1 }
 0x1e6   : > { %v7085_v62 = vadd.f32 %v4813_v49, %v6921_v37 }
 0x1e7   : > { %v4815_v57 = vpop.f32.mrf.mxu0  ;;  %v7089_v28 = vpop.f32.mrf.mxu1 }
 0x1e8   : > { %v4816_v40 = vadd.f32 %v4815_v57, %v4814_v3 }
 0x1e9   : > { %v4817_v42 = vpop.f32.mrf.mxu0  ;;  %v7094_v19 = vpop.f32.mrf.mxu1 }
 0x1ea   : > { %v7092_v4 = vadd.f32 %v4816_v40, %v6926_v21  ;;  %v5762_v21 = vld [vmem:[#allocation8 + $0x128] sm:$0xff]  }
 0x1eb   : > { %v4818_v47 = vpop.f32.mrf.mxu0  ;;  %v7096_v39 = vpop.f32.mrf.mxu1  ;;  %5242 = vmatpush3.bf16.msra.mxu1 %v5762_v21 }
 0x1ec   : > { %8455 = vst [vmem:[#allocation32_spill] sm:$0xff] %v7092_v4  ;;  %v4819_v12 = vadd.f32 %v4818_v47, %v4817_v42 }
 0x1ed   : > { %v4820_v32 = vpop.f32.mrf.mxu0  ;;  %v7101_v49 = vpop.f32.mrf.mxu1 }
 0x1ee   : > { %v7099_v37 = vadd.f32 %v4819_v12, %v6934_v5  ;;  %8457 = vst [vmem:[#allocation34_spill] sm:$0xff] %v7101_v49 }
 0x1ef   : > { %v4821_v31 = vpop.f32.mrf.mxu0  ;;  %v7103_v38 = vpop.f32.mrf.mxu1 }
 0x1f0   : > { %8456 = vst [vmem:[#allocation33_spill] sm:$0xff] %v7099_v37  ;;  %8458 = vst [vmem:[#allocation35_spill] sm:$0xff] %v7103_v38  ;;  %v4822_v3 = vadd.f32 %v4821_v31, %v4820_v32 }
 0x1f1   : > { %v4823_v57 = vpop.f32.mrf.mxu0  ;;  %v7108_v4 = vpop.f32.mrf.mxu1 }
 0x1f2   : > { %v7106_v40 = vadd.f32 %v4822_v3, %v6938_v34  ;;  %8460 = vst [vmem:[#allocation37_spill] sm:$0xff] %v7108_v4 }
 0x1f3   : > { %v4824_v42 = vpop.f32.mrf.mxu0  ;;  %v7110_v47 = vpop.f32.mrf.mxu1 }
 0x1f4   : > { %8459 = vst [vmem:[#allocation36_spill] sm:$0xff] %v7106_v40  ;;  %8461 = vst [vmem:[#allocation38_spill] sm:$0xff] %v7110_v47  ;;  %v4825_v5 = vadd.f32 %v4824_v42, %v4823_v57  ;;  %v5763_v42 = vld [vmem:[#allocation8 + $0x160] sm:$0xff]  }
 0x1f5   : > { %v4826_v12 = vpop.f32.mrf.mxu0  ;;  %v7115_v49 = vpop.f32.mrf.mxu1  ;;  %v5764_v47 = vld [vmem:[#allocation8 + $0x120] sm:$0xff]   ;;  %5243 = vmatprep.subr.bf16.mxu1 %v5763_v42 }
 0x1f6   : > { %v7113_v37 = vadd.f32 %v4825_v5, %v6943_v61  ;;  %5244 = vmatpush3.bf16.msra.mxu1 %v5764_v47 }
 0x1f7   : > { %v4827_v31 = vpop.f32.mrf.mxu0  ;;  %v7117_v63 = vpop.f32.mrf.mxu1 }
 0x1f8   : > { %8462 = vst [vmem:[#allocation39_spill] sm:$0xff] %v7113_v37  ;;  %v4828_v32 = vadd.f32 %v4827_v31, %v4826_v12 }
 0x1f9   : > { %v4829_v38 = vpop.f32.mrf.mxu0  ;;  %v7122_v3 = vpop.f32.mrf.mxu1 }
 0x1fa   : > { %v7120_v34 = vadd.f32 %v4828_v32, %v6946_v20 }
 0x1fb   : > { %v4830_v21 = vpop.f32.mrf.mxu0  ;;  %v7124_v40 = vpop.f32.mrf.mxu1 }
 0x1fc   : > { %8463 = vst [vmem:[#allocation40_spill] sm:$0xff] %v7120_v34  ;;  %8464 = vst [vmem:[#allocation41_spill] sm:$0xff] %v7124_v40  ;;  %v4831_v57 = vadd.f32 %v4830_v21, %v4829_v38 }
 0x1fd   : > { %v4832_v61 = vpop.f32.mrf.mxu0  ;;  %v7129_v4 = vpop.f32.mrf.mxu1 }
 0x1fe   : > { %v7127_v5 = vadd.f32 %v4831_v57, %v6951_v55  ;;  %v5765_v55 = vld [vmem:[#allocation8 + $0x1f8] sm:$0xff]  }
 0x1ff   : > { %v4833_v12 = vpop.f32.mrf.mxu0  ;;  %v7131_v31 = vpop.f32.mrf.mxu1  ;;  %5349 = vmatprep.subr.bf16.mxu0 %v5765_v55 }
 0x200   : > { %8465 = vst [vmem:[#allocation42_spill] sm:$0xff] %v7127_v5  ;;  %8466 = vst [vmem:[#allocation43_spill] sm:$0xff] %v7131_v31  ;;  %v4834_v20 = vadd.f32 %v4833_v12, %v4832_v61 }
 0x201   : > { %v4835_v32 = vpop.f32.mrf.mxu0  ;;  %v7136_v37 = vpop.f32.mrf.mxu1 }
 0x202   : > { %v7134_v34 = vadd.f32 %v4834_v20, %v6954_v45  ;;  %8468 = vst [vmem:[#allocation45_spill] sm:$0xff] %v7136_v37  ;;  %v5768_v37 = vld [vmem:[#allocation8 + $0x118] sm:$0xff]  }
 0x203   : > { %v4836_v38 = vpop.f32.mrf.mxu0  ;;  %v7138_v21 = vpop.f32.mrf.mxu1 }
 0x204   : > { %8467 = vst [vmem:[#allocation44_spill] sm:$0xff] %v7134_v34  ;;  %8469 = vst [vmem:[#allocation46_spill] sm:$0xff] %v7138_v21  ;;  %v4837_v40 = vadd.f32 %v4836_v38, %v4835_v32  ;;  %v5767_v32 = vld [vmem:[#allocation8 + $0x158] sm:$0xff]  }
 0x205   : > { %v4838_v57 = vpop.f32.mrf.mxu0  ;;  %v7143_v42 = vpop.f32.mrf.mxu1  ;;  %5245 = vmatprep.subr.bf16.mxu1 %v5767_v32 }
 0x206   : > { %v7141_v5 = vadd.f32 %v4837_v40, %v6959_v44  ;;  %5246 = vmatpush3.bf16.msra.mxu1 %v5768_v37 }
 0x207   : > { %v4839_v47 = vpop.f32.mrf.mxu0  ;;  %v7145_v61 = vpop.f32.mrf.mxu1 }
 0x208   : > { %8470 = vst [vmem:[#allocation47_spill] sm:$0xff] %v7141_v5  ;;  %v4840_v12 = vadd.f32 %v4839_v47, %v4838_v57 }
 0x209   : > { %v4841_v45 = vpop.f32.mrf.mxu0  ;;  %v7150_v34 = vpop.f32.mrf.mxu1 }
 0x20a   : > { %v7148_v20 = vadd.f32 %v4840_v12, %v6962_v29 }
 0x20b   : > { %v4842_v21 = vpop.f32.mrf.mxu0  ;;  %v7152_v31 = vpop.f32.mrf.mxu1 }
 0x20c   : > { %8471 = vst [vmem:[#allocation48_spill] sm:$0xff] %v7148_v20  ;;  %v4843_v38 = vadd.f32 %v4842_v21, %v4841_v45  ;;  %8472 = vst [vmem:[#allocation49_spill] sm:$0xff] %v7152_v31 }
 0x20d   : > { %v4844_v44 = vpop.f32.mrf.mxu0  ;;  %v7157_v47 = vpop.f32.mrf.mxu1 }
 0x20e   : > { %v7155_v40 = vadd.f32 %v4843_v38, %v6967_v0 }
 0x20f   : > { %v4845_v55 = vpop.f32.mrf.mxu0  ;;  %v7162_v21 = vpop.f32.mrf.mxu1 }
 0x210   : > { %8473 = vst [vmem:[#allocation50_spill] sm:$0xff] %v7155_v40  ;;  %v4846_v57 = vadd.f32 %v4845_v55, %v4844_v44  ;;  %v5771_v40 = vld [vmem:[#allocation8 + $0x150] sm:$0xff]  }
 0x211   : > { %v4847_v29 = vpop.f32.mrf.mxu0  ;;  %v7167_v38 = vpop.f32.mrf.mxu1  ;;  %5247 = vmatprep.subr.bf16.mxu1 %v5771_v40 }
 0x212   : > { %v7160_v12 = vadd.f32 %v4846_v57, %v6970_v53  ;;  %v5772_v57 = vld [vmem:[#allocation8 + $0x110] sm:$0xff]  }
 0x213   : > { %v4848_v20 = vpop.f32.mrf.mxu0  ;;  %5248 = vmatpush3.bf16.msra.mxu1 %v5772_v57 }
 0x214   : > { %8474 = vst [vmem:[#allocation51_spill] sm:$0xff] %v7160_v12  ;;  %v4849_v5 = vadd.f32 %v4848_v20, %v4847_v29  ;;  %v7172_v12 = vpop.f32.mrf.mxu1 }
 0x215   : > { %v4850_v45 = vpop.f32.mrf.mxu0  ;;  %8476 = vst [vmem:[#allocation53_spill] sm:$0xff] %v7172_v12 }
 0x216   : > { %v7165_v31 = vadd.f32 %v4849_v5, %v6975_v6 }
 0x217   : > { %v4851_v32 = vpop.f32.mrf.mxu0 }
 0x218   : > { %v4852_v0 = vadd.f32 %v4851_v32, %v4850_v45  ;;  %v7177_v45 = vpop.f32.mrf.mxu1 }
 0x219   : > { %v4853_v37 = vpop.f32.mrf.mxu0 }
 0x21a   : > { %v7170_v44 = vadd.f32 %v4852_v0, %v6978_v23 }
 0x21b   : > { %v4854_v55 = vpop.f32.mrf.mxu0 }
 0x21c   : > { %8475 = vst [vmem:[#allocation52_spill] sm:$0xff] %v7170_v44  ;;  %v4855_v53 = vadd.f32 %v4854_v55, %v4853_v37  ;;  %v7182_v37 = vpop.f32.mrf.mxu1 }
 0x21d   : > { %v4856_v20 = vpop.f32.mrf.mxu0 }
 0x21e   : > { %v7175_v29 = vadd.f32 %v4855_v53, %v6983_v11  ;;  %v7187_v53 = vpop.f32.mrf.mxu1 }
 0x21f   : > { %v4857_v6 = vpop.f32.mrf.mxu0 }
 0x220   : > { %8477 = vst [vmem:[#allocation54_spill] sm:$0xff] %v7175_v29  ;;  %v4858_v5 = vadd.f32 %v4857_v6, %v4856_v20  ;;  %v5775_v29 = vld [vmem:[#allocation8 + $0x148] sm:$0xff]  }
 0x221   : > { %v4859_v32 = vpop.f32.mrf.mxu0  ;;  %5249 = vmatprep.subr.bf16.mxu1 %v5775_v29 }
 0x222   : > { %v7180_v23 = vadd.f32 %v4858_v5, %v6990_v10  ;;  %v5776_v5 = vld [vmem:[#allocation8 + $0x108] sm:$0xff]  }
 0x223   : > { %v4860_v0 = vpop.f32.mrf.mxu0  ;;  %5250 = vmatpush3.bf16.msra.mxu1 %v5776_v5 }
 0x224   : > { %8478 = vst [vmem:[#allocation55_spill] sm:$0xff] %v7180_v23  ;;  %v4861_v44 = vadd.f32 %v4860_v0, %v4859_v32  ;;  %v7192_v23 = vpop.f32.mrf.mxu1 }
 0x225   : > { %v4862_v55 = vpop.f32.mrf.mxu0 }
 0x226   : > { %v7185_v12 = vadd.f32 %v4861_v44, %v6997_v50 }
 0x227   : > { %v4863_v40 = vpop.f32.mrf.mxu0 }
 0x228   : > { %v4864_v11 = vadd.f32 %v4863_v40, %v4862_v55  ;;  %v7197_v55 = vpop.f32.mrf.mxu1 }
 0x229   : > { %v4865_v57 = vpop.f32.mrf.mxu0 }
 0x22a   : > { %v7190_v20 = vadd.f32 %v4864_v11, %v7001_v16 }
 0x22b   : > { %v4866_v6 = vpop.f32.mrf.mxu0 }
 0x22c   : > { %8479 = vst [vmem:[#allocation56_spill] sm:$0xff] %v7190_v20  ;;  %v4867_v10 = vadd.f32 %v4866_v6, %v4865_v57  ;;  %v4901_v57 = vadd.f32 %v7033_v58, %v7028_v1  ;;  %v7208_v6 = vpop.f32.mrf.mxu1  ;;  %v4913_v1 = vadd.f32 %v7061_v54, %v7059_v35  ;;  %v4916_v35 = vadd.f32 %v7068_v8, %v7066_v7 }
 0x22d   : > { %v4868_v32 = vpop.f32.mrf.mxu0  ;;  %v4925_v8 = vadd.f32 %v7089_v28, %v7087_v26  ;;  %v4928_v26 = vadd.f32 %v7096_v39, %v7094_v19  ;;  %v8484_v19 = vld [vmem:[#allocation31_spill] sm:$0xff] }
 0x22e   : > { %v7195_v0 = vadd.f32 %v4867_v10, %v7004_v27  ;;  %v4904_v10 = vadd.f32 %v7040_v59, %v7038_v43  ;;  %v1949_v5 = vadd.f32 %v4901_v57, %v7026_v17  ;;  %v4907_v17 = vadd.f32 %v7047_v2, %v7045_v24 }
 0x22f   : > { %v4869_v50 = vpop.f32.mrf.mxu0  ;;  %v1965_v54 = vadd.f32 %v4913_v1, %v7057_v46  ;;  %v4910_v24 = vadd.f32 %v7054_v18, %v7052_v48  ;;  %v4922_v48 = vadd.f32 %v7082_v41, %v7080_v13  ;;  %v1981_v13 = vadd.f32 %v4925_v8, %v7085_v62 }
 0x230   : > { %8480 = vst [vmem:[#allocation57_spill] sm:$0xff] %v7195_v0  ;;  %v4870_v44 = vadd.f32 %v4869_v50, %v4868_v32  ;;  %v7217_v32 = vpop.f32.mrf.mxu1  ;;  %v1952_v20 = vadd.f32 %v4904_v10, %v7036_v60 }
 0x231   : > { %v7199_v40 = vpop.f32.mrf.mxu0  ;;  %v1976_v39 = vadd.f32 %v4922_v48, %v8484_v19 }
 0x232   : > { %v7202_v16 = vadd.f32 %v4870_v44, %v7007_v36 }
 0x233   : > { %v7204_v11 = vpop.f32.mrf.mxu0 }
 0x234   : > { %8481 = vst [vmem:[#allocation58_spill] sm:$0xff] %v7202_v16  ;;  %v5779_v16 = vld [vmem:[#allocation8 + $0x140] sm:$0xff]  }
 0x235   : > { %v7210_v29 = vpop.f32.mrf.mxu0  ;;  %5251 = vmatprep.subr.bf16.mxu1 %v5779_v16 }
 0x236   : > { %8482 = vst [vmem:[#allocation59_spill] sm:$0xff] %v7210_v29  ;;  %v7223_v29 = vpop.f32.mrf.mxu1 }
 0x237   : > { %v7212_v27 = vpop.f32.mrf.mxu0 }
 0x238   : > { %8483 = vst [vmem:[#allocation60_spill] sm:$0xff] %v7212_v27  ;;  %v5780_v27 = vld [vmem:[#allocation8 + $0x100] sm:$0xff]   ;;  %v7231_v10 = vpop.f32.mrf.mxu1 }
 0x239   : > { %v5503_v36 = vpop.f32.mrf.mxu0  ;;  %5252 = vmatpush3.bf16.msra.mxu1 %v5780_v27  ;;  %v1968_v27 = vadd.f32 %v4916_v35, %v7064_v22  ;;  %v1960_v22 = vadd.f32 %v4910_v24, %v7050_v25  ;;  %v8486_v35 = vld [vmem:[#allocation35_spill] sm:$0xff] }
 0x23a   : > { %v2110_v50 = vadd.f32 %v5503_v36, %v1949_v5  ;;  %v2509_v36 = vrot.slane %v7016_v14, 2  ;;  %v4919_v14 = vadd.f32 %v7075_v56, %v7073_v51  ;;  %v7244_v18 = vpop.f32.mrf.mxu1 }
 0x23b   : > { %v2101_v44 = vpop.f32.mrf.mxu0 }
 0x23c   : > { %v2230_v58 = vmax.f32 %v2110_v50, 0.0  ;;  %v2102_v0 = vadd.f32 %v2101_v44, %v7020_v15  ;;  %v7252_v41 = vpop.f32.mrf.mxu1 }
 0x23d   : > { %v5504_v43 = vpop.f32.mrf.mxu0 }
 0x23e   : > { %2262 = vst [vmem:[#allocation2 + $0x31] sm:$0xff] %v2230_v58  ;;  %v2228_v59 = vmax.f32 %v2102_v0, 0.0  ;;  %v2113_v57 = vadd.f32 %v5504_v43, %v1952_v20  ;;  %v1957_v0 = vadd.f32 %v4907_v17, %v7043_v33  ;;  %v2510_v33 = vsel %vm639_vm1, %v6988_v30, %v2509_v36  ;;  %v8488_v36 = vld [vmem:[#allocation41_spill] sm:$0xff] }
 0x23f   : > { %v2104_v5 = vpop.f32.mrf.mxu0  ;;  %v2654_v58 = vpack.c.bf16 %v2510_v33, %v6988_v30  ;;  %v1973_v17 = vadd.f32 %v4919_v14, %v7071_v9  ;;  %v4937_v9 = vadd.f32 %v7117_v63, %v7115_v49  ;;  %v4940_v24 = vadd.f32 %v8488_v36, %v7122_v3  ;;  %v7277_v33 = vpop.f32.mrf.mxu1  ;;  %v8490_v36 = vld [vmem:[#allocation37_spill] sm:$0xff] }
 0x240   : > { %2260 = vst [vmem:[#allocation2 + $0x19] sm:$0xff] %v2228_v59  ;;  %v2231_v15 = vmax.f32 %v2113_v57, 0.0  ;;  %v2105_v60 = vadd.f32 %v2104_v5, %v7030_v52  ;;  %v8485_v5 = vld [vmem:[#allocation34_spill] sm:$0xff] }
 0x241   : > { %v5507_v16 = vpop.f32.mrf.mxu0 }
 0x242   : > { %2263 = vst [vmem:[#allocation2 + $0x39] sm:$0xff] %v2231_v15  ;;  %v2229_v2 = vmax.f32 %v2105_v60, 0.0  ;;  %v2126_v20 = vadd.f32 %v5507_v16, %v1965_v54  ;;  %v4931_v15 = vadd.f32 %v8486_v35, %v8485_v5  ;;  %v8487_v54 = vld [vmem:[#allocation32_spill] sm:$0xff] }
 0x243   : > { %v2117_v7 = vpop.f32.mrf.mxu0  ;;  %v1984_v16 = vadd.f32 %v4928_v26, %v8487_v54 }
 0x244   : > { %2261 = vst [vmem:[#allocation2 + $0x21] sm:$0xff] %v2229_v2  ;;  %v2234_v52 = vmax.f32 %v2126_v20, 0.0  ;;  %v2118_v46 = vadd.f32 %v2117_v7, %v1957_v0 }
 0x245   : > { %v5508_v50 = vpop.f32.mrf.mxu0  ;;  %v7266_v30 = vld [vmem:[#allocation2 + $0x30] sm:$0xff] }
 0x246   : > { %2266 = vst [vmem:[#allocation2 + $0x61] sm:$0xff] %v2234_v52  ;;  %v2232_v28 = vmax.f32 %v2118_v46, 0.0  ;;  %v2129_v44 = vadd.f32 %v5508_v50, %v1968_v27  ;;  %v7274_v52 = vld [vmem:[#allocation8 + $0x238] sm:$0xff]   ;;  %v2404_v3 = vrot.slane %v7266_v30, 1 }
 0x247   : > { %v2120_v1 = vpop.f32.mrf.mxu0  ;;  %v7256_v59 = vld [vmem:[#allocation2 + $0x18] sm:$0xff]  ;;  %5533 = vmatprep.subr.bf16.mxu1 %v7274_v52 }
 0x248   : > { %2264 = vst [vmem:[#allocation2 + $0x49] sm:$0xff] %v2232_v28  ;;  %v2235_v51 = vmax.f32 %v2129_v44, 0.0  ;;  %v2121_v56 = vadd.f32 %v2120_v1, %v1960_v22  ;;  %v2399_v14 = vrot.slane %v7256_v59, 1  ;;  %v5766_v28 = vld [vmem:[#allocation8 + $0x1b8] sm:$0xff]  }
 0x249   : > { %v5511_v43 = vpop.f32.mrf.mxu0  ;;  %v7259_v57 = vld [vmem:[#allocation2 + $0x38] sm:$0xff]  ;;  %v7261_v25 = vld [vmem:[#allocation2 + $0x40] sm:$0x3] }
 0x24a   : > { %2267 = vst [vmem:[#allocation2 + $0x69] sm:$0xff] %v2235_v51  ;;  %v2233_v62 = vmax.f32 %v2121_v56, 0.0  ;;  %v2142_v60 = vadd.f32 %v5511_v43, %v1981_v13  ;;  %v2405_v0 = vrot.slane %v7259_v57, 1  ;;  %v2407_v8 = vrot.slane %v7261_v25, 1  ;;  %v5769_v56 = vld [vmem:[#allocation8 + $0x1f0] sm:$0xff]  }
 0x24b   : > { %v2133_v2 = vpop.f32.mrf.mxu0  ;;  %v2296_v20 = vld [vmem:[#allocation2 + $0x20] sm:$0xff]  ;;  %v2297_v7 = vld [vmem:[#allocation2 + $0x28] sm:$0x3]  ;;  %v7283_v50 = vpack.c.bf16 %v7259_v57, %v7266_v30 }
 0x24c   : > { %2265 = vst [vmem:[#allocation2 + $0x51] sm:$0xff] %v2233_v62  ;;  %v2238_v46 = vmax.f32 %v2142_v60, 0.0  ;;  %v2134_v27 = vadd.f32 %v2133_v2, %v1973_v17  ;;  %v2400_v48 = vrot.slane %v2296_v20, 1  ;;  %v2655_v63 = vpack.c.bf16 %v2296_v20, %v7256_v59  ;;  %v8489_v60 = vld [vmem:[#allocation39_spill] sm:$0xff]  ;;  %v8491_v2 = vld [vmem:[#allocation38_spill] sm:$0xff] }
 0x24d   : > { %v5512_v49 = vpop.f32.mrf.mxu0  ;;  %v2402_v26 = vrot.slane %v2297_v7, 1  ;;  %v2512_v1 = vrot.slane %v2296_v20, 2  ;;  %v2514_v17 = vrot.slane %v2297_v7, 2  ;;  %v2406_v19 = vsel %vm526_vm0, %v2404_v3, %v2405_v0  ;;  %v8493_v3 = vld [vmem:[#allocation40_spill] sm:$0xff] }
 0x24e   : > { %2270 = vst [vmem:[#allocation2 + $0x91] sm:$0xff] %v2238_v46  ;;  %v2236_v44 = vmax.f32 %v2134_v27, 0.0  ;;  %v2145_v22 = vadd.f32 %v5512_v49, %v1984_v16  ;;  %v2401_v51 = vsel %vm526_vm0, %v2399_v14, %v2400_v48  ;;  %3482 = vmatprep.mubr.bf16.mxu0 %v2655_v63  ;;  %v2408_v5 = vsel %vm526_vm0, %v2405_v0, %v2407_v8  ;;  %v7295_v46 = vpop.f32.mrf.mxu1  ;;  %v5770_v0 = vld [vmem:[#allocation8 + $0x1b0] sm:$0xff]   ;;  %v5773_v49 = vld [vmem:[#allocation8 + $0x1e8] sm:$0xff]  }
 0x24f   : > { %v2136_v13 = vpop.f32.mrf.mxu0  ;;  %v2403_v43 = vsel %vm526_vm0, %v2400_v48, %v2402_v26  ;;  %3483 = vmatmul.mubr.bf16.vlgmr.msra.gmra.mxu0 %v2654_v58  ;;  %v1997_v54 = vadd.f32 %v4937_v9, %v8489_v60  ;;  %v4934_v20 = vadd.f32 %v8491_v2, %v8490_v36  ;;  %v2511_v27 = vrot.slane %v7256_v59, 2  ;;  %v8492_v58 = vld [vmem:[#allocation33_spill] sm:$0xff]  ;;  %v7303_v48 = vld [vmem:[#allocation2 + $0x48] sm:$0xff] }
 0x250   : > { %2268 = vst [vmem:[#allocation2 + $0x79] sm:$0xff] %v2236_v44  ;;  %v2239_v35 = vmax.f32 %v2145_v22, 0.0  ;;  %v2137_v62 = vadd.f32 %v2136_v13, %v1976_v39  ;;  %v7291_v16 = vpack.c.bf16 %v2403_v43, %v2401_v51  ;;  %3490 = vmatprep.mubr.bf16.mxu0 %v7283_v50  ;;  %5350 = vmatpush3.bf16.msra.mxu0 %v5766_v28  ;;  %v2519_v2 = vrot.slane %v7261_v25, 2 }
 0x251   : > { %v5515_v7 = vpop.f32.mrf.mxu0  ;;  %v1989_v9 = vadd.f32 %v4931_v15, %v8492_v58  ;;  %v7301_v14 = vpack.c.bf16 %v2408_v5, %v2406_v19  ;;  %5351 = vmatprep.subr.bf16.mxu0 %v5769_v56  ;;  %v2000_v26 = vadd.f32 %v4940_v24, %v8493_v3  ;;  %v2513_v28 = vsel %vm639_vm1, %v2511_v27, %v2512_v1  ;;  %v8494_v24 = vld [vmem:[#allocation43_spill] sm:$0xff]  ;;  %v7318_v19 = vpop.f32.mrf.mxu1  ;;  %v7337_v25 = vld [vmem:[#allocation2 + $0x68] sm:$0xff]  ;;  %v8498_v3 = vld [vmem:[#allocation45_spill] sm:$0xff] }
 0x252   : > { %2271 = vst [vmem:[#allocation2 + $0x99] sm:$0xff] %v2239_v35  ;;  %v2237_v8 = vmax.f32 %v2137_v62, 0.0  ;;  %v2158_v39 = vadd.f32 %v5515_v7, %v1997_v54  ;;  %3329 = vmatprep.mubr.bf16.mxu1 %v7291_v16  ;;  %v2515_v44 = vsel %vm639_vm1, %v2512_v1, %v2514_v17  ;;  %v4949_v15 = vadd.f32 %v7145_v61, %v7143_v42  ;;  %v8495_v17 = vld [vmem:[#allocation36_spill] sm:$0xff]  ;;  %v5774_v42 = vld [vmem:[#allocation8 + $0x1a8] sm:$0xff]  }
 0x253   : > { %3330 = vmatmul.mubr.bf16.gmra.mxu1 %v2655_v63  ;;  %v2149_v59 = vpop.f32.mrf.mxu0  ;;  %v7308_v22 = vld [vmem:[#allocation2 + $0x50] sm:$0xff]  ;;  %v7310_v51 = vld [vmem:[#allocation2 + $0x58] sm:$0x3]  ;;  %v4943_v56 = vadd.f32 %v8494_v24, %v7129_v4  ;;  %v1992_v5 = vadd.f32 %v4934_v20, %v8495_v17  ;;  %v2409_v35 = vrot.slane %v7303_v48, 1  ;;  %v2517_v61 = vrot.slane %v7259_v57, 2 }
 0x254   : > { %2269 = vst [vmem:[#allocation2 + $0x81] sm:$0xff] %v2237_v8  ;;  %v2242_v13 = vmax.f32 %v2158_v39, 0.0  ;;  %v2150_v43 = vadd.f32 %v2149_v59, %v1989_v9  ;;  %3337 = vmatprep.mubr.bf16.mxu1 %v7301_v14  ;;  %v2410_v63 = vrot.slane %v7308_v22, 1  ;;  %v2412_v62 = vrot.slane %v7310_v51, 1  ;;  %5352 = vmatpush3.bf16.msra.mxu0 %v5770_v0  ;;  %v5777_v4 = vld [vmem:[#allocation8 + $0x1e0] sm:$0xff]   ;;  %v8497_v9 = vld [vmem:[#allocation47_spill] sm:$0xff] }
 0x255   : > { %v5516_v1 = vpop.f32.mrf.mxu0  ;;  %v7324_v36 = vpack.c.bf16 %v2515_v44, %v2513_v28  ;;  %5353 = vmatprep.subr.bf16.mxu0 %v5773_v49  ;;  %v7329_v20 = vpack.c.bf16 %v7308_v22, %v7303_v48  ;;  %v8496_v57 = vld [vmem:[#allocation49_spill] sm:$0xff]  ;;  %v2013_v49 = vadd.f32 %v4949_v15, %v8497_v9  ;;  %v7343_v44 = vpop.f32.mrf.mxu1  ;;  %v8500_v15 = vld [vmem:[#allocation42_spill] sm:$0xff] }
 0x256   : > { %2274 = vst [vmem:[#allocation2 + $0xc1] sm:$0xff] %v2242_v13  ;;  %v2240_v60 = vmax.f32 %v2150_v43, 0.0  ;;  %v2161_v54 = vadd.f32 %v5516_v1, %v2000_v26  ;;  %v2411_v7 = vsel %vm526_vm0, %v2409_v35, %v2410_v63  ;;  %v2413_v0 = vsel %vm526_vm0, %v2410_v63, %v2412_v62  ;;  %v7339_v59 = vld [vmem:[#allocation2 + $0x70] sm:$0x3]  ;;  %v8499_v26 = vld [vmem:[#allocation46_spill] sm:$0xff]  ;;  %v5781_v35 = vld [vmem:[#allocation8 + $0x1d8] sm:$0xff]  }
 0x257   : > { %v2152_v27 = vpop.f32.mrf.mxu0  ;;  %v4952_v8 = vadd.f32 %v8496_v57, %v7150_v34  ;;  %3491 = vmatmul.mubr.bf16.gmra.mxu0 %v7324_v36  ;;  %v4946_v28 = vadd.f32 %v8499_v26, %v8498_v3  ;;  %v2516_v13 = vrot.slane %v7266_v30, 2  ;;  %v5778_v43 = vld [vmem:[#allocation8 + $0x1a0] sm:$0xff]   ;;  %v2005_v1 = vadd.f32 %v4943_v56, %v8500_v15 }
 0x258   : > { %2272 = vst [vmem:[#allocation2 + $0xa9] sm:$0xff] %v2240_v60  ;;  %v2243_v39 = vmax.f32 %v2161_v54, 0.0  ;;  %v2153_v58 = vadd.f32 %v2152_v27, %v1992_v5  ;;  %3498 = vmatprep.mubr.bf16.mxu0 %v7329_v20  ;;  %5354 = vmatpush3.bf16.msra.mxu0 %v5774_v42  ;;  %v7348_v17 = vpack.c.bf16 %v2413_v0, %v2411_v7  ;;  %v7350_v5 = vld [vmem:[#allocation2 + $0x60] sm:$0xff]  ;;  %v2415_v42 = vrot.slane %v7337_v25, 1 }
 0x259   : > { %v5519_v34 = vpop.f32.mrf.mxu0  ;;  %5355 = vmatprep.subr.bf16.mxu0 %v5777_v4  ;;  %v2518_v30 = vsel %vm639_vm1, %v2516_v13, %v2517_v61  ;;  %v2520_v60 = vsel %vm639_vm1, %v2517_v61, %v2519_v2  ;;  %v2417_v54 = vrot.slane %v7339_v59, 1  ;;  %v4961_v56 = vadd.f32 %v7182_v37, %v7177_v45  ;;  %v8501_v4 = vld [vmem:[#allocation48_spill] sm:$0xff] }
 0x25a   : > { %2275 = vst [vmem:[#allocation2 + $0xc9] sm:$0xff] %v2243_v39  ;;  %v2241_v63 = vmax.f32 %v2153_v58, 0.0  ;;  %v2174_v24 = vadd.f32 %v5519_v34, %v2013_v49  ;;  %v2016_v0 = vadd.f32 %v4952_v8, %v8501_v4  ;;  %v4955_v57 = vadd.f32 %v7162_v21, %v7157_v47  ;;  %v7363_v39 = vpop.f32.mrf.mxu1  ;;  %v8502_v2 = vld [vmem:[#allocation44_spill] sm:$0xff]  ;;  %v5783_v47 = vld [vmem:[#allocation8 + $0x1d0] sm:$0xff]  }
 0x25b   : > { %3338 = vmatmul.mubr.bf16.gmra.mxu1 %v7283_v50  ;;  %v2165_v62 = vpop.f32.mrf.mxu0  ;;  %v2008_v58 = vadd.f32 %v4946_v28, %v8502_v2  ;;  %v2414_v9 = vrot.slane %v7350_v5, 1  ;;  %v5782_v49 = vld [vmem:[#allocation8 + $0x198] sm:$0xff]   ;;  %v7367_v3 = vpack.c.bf16 %v2520_v60, %v2518_v30  ;;  %v7371_v8 = vpack.c.bf16 %v7337_v25, %v7350_v5 }
 0x25c   : > { %2273 = vst [vmem:[#allocation2 + $0xb1] sm:$0xff] %v2241_v63  ;;  %v2246_v27 = vmax.f32 %v2174_v24, 0.0  ;;  %v2166_v7 = vadd.f32 %v2165_v62, %v2005_v1  ;;  %3345 = vmatprep.mubr.bf16.mxu1 %v7348_v17  ;;  %5356 = vmatpush3.bf16.msra.mxu0 %v5778_v43  ;;  %v2522_v21 = vrot.slane %v7308_v22, 2  ;;  %v2524_v26 = vrot.slane %v7310_v51, 2  ;;  %v7381_v1 = vld [vmem:[#allocation2 + $0x80] sm:$0xff]  ;;  %v8503_v51 = vld [vmem:[#allocation53_spill] sm:$0xff]  ;;  %v7387_v62 = vpop.f32.mrf.mxu1 }
 0x25d   : > { %v5520_v61 = vpop.f32.mrf.mxu0  ;;  %5357 = vmatprep.subr.bf16.mxu0 %v5781_v35  ;;  %v2416_v13 = vsel %vm526_vm0, %v2414_v9, %v2415_v42  ;;  %v2418_v34 = vsel %vm526_vm0, %v2415_v42, %v2417_v54  ;;  %v4964_v43 = vadd.f32 %v7192_v23, %v7187_v53  ;;  %v2029_v15 = vadd.f32 %v4961_v56, %v7165_v31  ;;  %v7383_v22 = vld [vmem:[#allocation2 + $0x88] sm:$0x3]  ;;  %v5784_v53 = vld [vmem:[#allocation8 + $0x190] sm:$0xff]   ;;  %v8504_v31 = vld [vmem:[#allocation50_spill] sm:$0xff] }
 0x25e   : > { %2278 = vst [vmem:[#allocation2 + $0xf1] sm:$0xff] %v2246_v27  ;;  %v2244_v45 = vmax.f32 %v2166_v7, 0.0  ;;  %v2177_v37 = vadd.f32 %v5520_v61, %v2016_v0  ;;  %v4958_v35 = vadd.f32 %v8503_v51, %v7167_v38  ;;  %v2521_v30 = vrot.slane %v7303_v48, 2  ;;  %v7394_v27 = vld [vmem:[#allocation2 + $0x78] sm:$0xff]  ;;  %v8505_v9 = vld [vmem:[#allocation52_spill] sm:$0xff] }
 0x25f   : > { %v2168_v28 = vpop.f32.mrf.mxu0  ;;  %3499 = vmatmul.mubr.bf16.gmra.mxu0 %v7367_v3  ;;  %v2021_v54 = vadd.f32 %v4955_v57, %v8504_v31  ;;  %v7392_v56 = vpack.c.bf16 %v2418_v34, %v2416_v13  ;;  %v5785_v38 = vld [vmem:[#allocation8 + $0x1c8] sm:$0xff]   ;;  %v2525_v4 = vsel %vm639_vm1, %v2522_v21, %v2524_v26  ;;  %v2420_v0 = vrot.slane %v7381_v1, 1  ;;  %v8506_v26 = vld [vmem:[#allocation51_spill] sm:$0xff] }
 0x260   : > { %2276 = vst [vmem:[#allocation2 + $0xd9] sm:$0xff] %v2244_v45  ;;  %v2247_v63 = vmax.f32 %v2177_v37, 0.0  ;;  %v2169_v24 = vadd.f32 %v2168_v28, %v2008_v58  ;;  %3506 = vmatprep.mubr.bf16.mxu0 %v7371_v8  ;;  %5358 = vmatpush3.bf16.msra.mxu0 %v5782_v49  ;;  %v2523_v48 = vsel %vm639_vm1, %v2521_v30, %v2522_v21  ;;  %v2422_v61 = vrot.slane %v7383_v22, 1 }
 0x261   : > { %v5523_v23 = vpop.f32.mrf.mxu0  ;;  %5359 = vmatprep.subr.bf16.mxu0 %v5783_v47  ;;  %v4973_v57 = vadd.f32 %v7244_v18, %v7231_v10  ;;  %v2032_v49 = vadd.f32 %v4964_v43, %v8505_v9  ;;  %v4967_v45 = vadd.f32 %v7208_v6, %v7197_v55  ;;  %v4976_v37 = vadd.f32 %v7277_v33, %v7252_v41  ;;  %v4984_v47 = vpop.f32.mrf.mxu1  ;;  %v5786_v10 = vld [vmem:[#allocation8 + $0x188] sm:$0xff]   ;;  %v5788_v55 = vld [vmem:[#allocation8 + $0x1c0] sm:$0xff]  }
 0x262   : > { %2279 = vst [vmem:[#allocation2 + $0xf9] sm:$0xff] %v2247_v63  ;;  %v2245_v60 = vmax.f32 %v2169_v24, 0.0  ;;  %v2190_v42 = vadd.f32 %v5523_v23, %v2029_v15  ;;  %v2024_v28 = vadd.f32 %v4958_v35, %v8506_v26  ;;  %v2419_v13 = vrot.slane %v7394_v27, 1  ;;  %v7427_v23 = vld [vmem:[#allocation2 + $0xa0] sm:$0x3] }
 0x263   : > { %3346 = vmatmul.mubr.bf16.gmra.mxu1 %v7329_v20  ;;  %v2181_v7 = vpop.f32.mrf.mxu0  ;;  %v2527_v18 = vrot.slane %v7337_v25, 2  ;;  %v7412_v43 = vpack.c.bf16 %v2525_v4, %v2523_v48  ;;  %v2529_v6 = vrot.slane %v7339_v59, 2  ;;  %v7417_v33 = vpack.c.bf16 %v7381_v1, %v7394_v27  ;;  %v7425_v59 = vld [vmem:[#allocation2 + $0x98] sm:$0xff] }
 0x264   : > { %2277 = vst [vmem:[#allocation2 + $0xe1] sm:$0xff] %v2245_v60  ;;  %v2250_v2 = vmax.f32 %v2190_v42, 0.0  ;;  %v2182_v58 = vadd.f32 %v2181_v7, %v2021_v54  ;;  %3353 = vmatprep.mubr.bf16.mxu1 %v7392_v56  ;;  %5360 = vmatpush3.bf16.msra.mxu0 %v5784_v53  ;;  %v2421_v24 = vsel %vm526_vm0, %v2419_v13, %v2420_v0  ;;  %v8507_v60 = vld [vmem:[#allocation59_spill] sm:$0xff]  ;;  %v8508_v42 = vld [vmem:[#allocation60_spill] sm:$0xff]  ;;  %v4986_v54 = vpop.f32.mrf.mxu1  ;;  %v2427_v9 = vrot.slane %v7427_v23, 1  ;;  %v8512_v13 = vld [vmem:[#allocation30_spill] sm:$0xff] }
 0x265   : > { %v5524_v21 = vpop.f32.mrf.mxu0  ;;  %5361 = vmatprep.subr.bf16.mxu0 %v5785_v38  ;;  %v2423_v15 = vsel %vm526_vm0, %v2420_v0, %v2422_v61  ;;  %v4873_v25 = vadd.f32 %v7204_v11, %v7199_v40  ;;  %v2045_v30 = vadd.f32 %v4973_v57, %v7185_v12  ;;  %v4970_v53 = vadd.f32 %v7223_v29, %v7217_v32  ;;  %v8509_v38 = vld [vmem:[#allocation54_spill] sm:$0xff]  ;;  %v5789_v12 = vld [vmem:[#allocation8 + $0x180] sm:$0xff]   ;;  %v8510_v61 = vld [vmem:[#allocation56_spill] sm:$0xff] }
 0x266   : > { %2282 = vst [vmem:[#allocation2 + $0x121] sm:$0xff] %v2250_v2  ;;  %v2248_v34 = vmax.f32 %v2182_v58, 0.0  ;;  %v2193_v63 = vadd.f32 %v5524_v21, %v2032_v49  ;;  %v4876_v31 = vadd.f32 %v8508_v42, %v8507_v60  ;;  %v2526_v40 = vrot.slane %v7350_v5, 2  ;;  %v7439_v32 = vld [vmem:[#allocation2 + $0x90] sm:$0xff]  ;;  %v7467_v42 = vld [vmem:[#allocation2 + $0xb8] sm:$0x3] }
 0x267   : > { %v2184_v41 = vpop.f32.mrf.mxu0  ;;  %3507 = vmatmul.mubr.bf16.gmra.mxu0 %v7412_v43  ;;  %v2037_v7 = vadd.f32 %v4967_v45, %v8509_v38  ;;  %v7436_v0 = vpack.c.bf16 %v2423_v15, %v2421_v24  ;;  %v2048_v29 = vadd.f32 %v4976_v37, %v8510_v61  ;;  %v2530_v2 = vsel %vm639_vm1, %v2527_v18, %v2529_v6  ;;  %v8511_v49 = vld [vmem:[#allocation29_spill] sm:$0xff] }
 0x268   : > { %2280 = vst [vmem:[#allocation2 + $0x109] sm:$0xff] %v2248_v34  ;;  %v2251_v51 = vmax.f32 %v2193_v63, 0.0  ;;  %v2185_v35 = vadd.f32 %v2184_v41, %v2024_v28  ;;  %3514 = vmatprep.mubr.bf16.mxu0 %v7417_v33  ;;  %5362 = vmatpush3.bf16.msra.mxu0 %v5786_v10  ;;  %v2528_v57 = vsel %vm639_vm1, %v2526_v40, %v2527_v18  ;;  %v2425_v58 = vrot.slane %v7425_v59, 1  ;;  %v4987_v34 = vpop.f32.mrf.mxu1  ;;  %v8513_v63 = vld [vmem:[#allocation55_spill] sm:$0xff]  ;;  %v7465_v60 = vld [vmem:[#allocation2 + $0xb0] sm:$0xff] }
 0x269   : > { %v5527_v11 = vpop.f32.mrf.mxu0  ;;  %5363 = vmatprep.subr.bf16.mxu0 %v5788_v55  ;;  %v1900_v45 = vadd.f32 %v4873_v25, %v8511_v49  ;;  %v4985_v21 = vadd.f32 %v4984_v47, %v7387_v62  ;;  %v4979_v28 = vadd.f32 %v7318_v19, %v7295_v46  ;;  %v1903_v10 = vadd.f32 %v4876_v31, %v8512_v13  ;;  %v8514_v38 = vld [vmem:[#allocation57_spill] sm:$0xff] }
 0x26a   : > { %2283 = vst [vmem:[#allocation2 + $0x129] sm:$0xff] %v2251_v51  ;;  %v2249_v48 = vmax.f32 %v2185_v35, 0.0  ;;  %v2206_v4 = vadd.f32 %v5527_v11, %v2045_v30  ;;  %v2040_v55 = vadd.f32 %v4970_v53, %v8513_v63  ;;  %v2424_v6 = vrot.slane %v7439_v32, 1 }
 0x26b   : > { %3354 = vmatmul.mubr.bf16.gmra.mxu1 %v7371_v8  ;;  %v2197_v5 = vpop.f32.mrf.mxu0  ;;  %v2532_v41 = vrot.slane %v7381_v1, 2  ;;  %v7455_v24 = vpack.c.bf16 %v2530_v2, %v2528_v57  ;;  %v2534_v15 = vrot.slane %v7383_v22, 2  ;;  %v7460_v46 = vpack.c.bf16 %v7425_v59, %v7439_v32 }
 0x26c   : > { %2281 = vst [vmem:[#allocation2 + $0x111] sm:$0xff] %v2249_v48  ;;  %v2254_v37 = vmax.f32 %v2206_v4, 0.0  ;;  %v2198_v26 = vadd.f32 %v2197_v5, %v2037_v7  ;;  %3361 = vmatprep.mubr.bf16.mxu1 %v7436_v0  ;;  %5364 = vmatpush3.bf16.msra.mxu0 %v5789_v12  ;;  %v2426_v19 = vsel %vm526_vm0, %v2424_v6, %v2425_v58  ;;  %v2531_v31 = vrot.slane %v7394_v27, 2  ;;  %v2313_v48 = vld [vmem:[#allocation2 + $0xa8] sm:$0xff]  ;;  %v7495_v6 = vld [vmem:[#allocation2 + $0xd0] sm:$0x3] }
 0x26d   : > { %v5528_v18 = vpop.f32.mrf.mxu0  ;;  %v2428_v51 = vsel %vm526_vm0, %v2425_v58, %v2427_v9  ;;  %v4988_v35 = vadd.f32 %v4987_v34, %v4986_v54  ;;  %v2061_v53 = vadd.f32 %v4985_v21, %v1900_v45  ;;  %v4982_v22 = vadd.f32 %v7363_v39, %v7343_v44  ;;  %v8515_v58 = vld [vmem:[#allocation58_spill] sm:$0xff] }
 0x26e   : > { %2286 = vst [vmem:[#allocation2 + $0x151] sm:$0xff] %v2254_v37  ;;  %v2252_v62 = vmax.f32 %v2198_v26, 0.0  ;;  %v2209_v47 = vadd.f32 %v5528_v18, %v2048_v29  ;;  %v2053_v7 = vadd.f32 %v4979_v28, %v8514_v38  ;;  %v7474_v12 = vpack.c.bf16 %v2428_v51, %v2426_v19 }
 0x26f   : > { %v2200_v25 = vpop.f32.mrf.mxu0  ;;  %3515 = vmatmul.mubr.bf16.gmra.mxu0 %v7455_v24  ;;  %v2533_v61 = vsel %vm639_vm1, %v2531_v31, %v2532_v41  ;;  %v2535_v44 = vsel %vm639_vm1, %v2532_v41, %v2534_v15  ;;  %v2430_v39 = vrot.slane %v7465_v60, 1  ;;  %v2432_v27 = vrot.slane %v7467_v42, 1 }
 0x270   : > { %2284 = vst [vmem:[#allocation2 + $0x139] sm:$0xff] %v2252_v62  ;;  %v2255_v30 = vmax.f32 %v2209_v47, 0.0  ;;  %v2201_v1 = vadd.f32 %v2200_v25, %v2040_v55  ;;  %3522 = vmatprep.mubr.bf16.mxu0 %v7460_v46  ;;  %v2064_v57 = vadd.f32 %v4988_v35, %v1903_v10  ;;  %v2056_v9 = vadd.f32 %v4982_v22, %v8515_v58  ;;  %v2316_v47 = vld [vmem:[#allocation2 + $0xc0] sm:$0xff] }
 0x271   : > { %v5531_v40 = vpop.f32.mrf.mxu0  ;;  %v2429_v49 = vrot.slane %v2313_v48, 1  ;;  %v2537_v45 = vrot.slane %v7425_v59, 2  ;;  %v7484_v26 = vpack.c.bf16 %v2535_v44, %v2533_v61  ;;  %v2539_v28 = vrot.slane %v7427_v23, 2  ;;  %v7493_v59 = vld [vmem:[#allocation2 + $0xc8] sm:$0xff] }
 0x272   : > { %2287 = vst [vmem:[#allocation2 + $0x159] sm:$0xff] %v2255_v30  ;;  %v2253_v54 = vmax.f32 %v2201_v1, 0.0  ;;  %v2222_v11 = vadd.f32 %v5531_v40, %v2061_v53  ;;  %v7488_v34 = vpack.c.bf16 %v7465_v60, %v2313_v48  ;;  %v2433_v10 = vsel %vm526_vm0, %v2430_v39, %v2432_v27 }
 0x273   : > { %3362 = vmatmul.mubr.bf16.gmra.mxu1 %v7417_v33  ;;  %v2213_v4 = vpop.f32.mrf.mxu0  ;;  %v2431_v18 = vsel %vm526_vm0, %v2429_v49, %v2430_v39  ;;  %v2536_v41 = vrot.slane %v7439_v32, 2  ;;  %v2540_v25 = vsel %vm639_vm1, %v2537_v45, %v2539_v28  ;;  %v2435_v19 = vrot.slane %v7493_v59, 1 }
 0x274   : > { %2285 = vst [vmem:[#allocation2 + $0x141] sm:$0xff] %v2253_v54  ;;  %v2258_v29 = vmax.f32 %v2222_v11, 0.0  ;;  %v2214_v5 = vadd.f32 %v2213_v4, %v2053_v7  ;;  %3369 = vmatprep.mubr.bf16.mxu1 %v7474_v12  ;;  %v7499_v62 = vpack.c.bf16 %v2433_v10, %v2431_v18  ;;  %v2437_v51 = vrot.slane %v7495_v6, 1  ;;  %v7517_v54 = vld [vmem:[#allocation2 + $0xe0] sm:$0xff]  ;;  %v7519_v11 = vld [vmem:[#allocation2 + $0xe8] sm:$0x3] }
 0x275   : > { %v5532_v2 = vpop.f32.mrf.mxu0  ;;  %v2538_v15 = vsel %vm639_vm1, %v2536_v41, %v2537_v45  ;;  %v2434_v32 = vrot.slane %v2316_v47, 1  ;;  %v2542_v35 = vrot.slane %v7465_v60, 2  ;;  %v2544_v1 = vrot.slane %v7467_v42, 2  ;;  %v2319_v4 = vld [vmem:[#allocation2 + $0xd8] sm:$0xff] }
 0x276   : > { %2290 = vst [vmem:[#allocation2 + $0x181] sm:$0xff] %v2258_v29  ;;  %v2256_v21 = vmax.f32 %v2214_v5, 0.0  ;;  %v2225_v37 = vadd.f32 %v5532_v2, %v2064_v57  ;;  %v7508_v30 = vpack.c.bf16 %v2540_v25, %v2538_v15  ;;  %v7512_v53 = vpack.c.bf16 %v7493_v59, %v2316_v47  ;;  %v2322_v25 = vld [vmem:[#allocation2 + $0xf0] sm:$0xff] }
 0x277   : > { %v2216_v13 = vpop.f32.mrf.mxu0  ;;  %3523 = vmatmul.mubr.bf16.gmra.mxu0 %v7484_v26  ;;  %v2436_v22 = vsel %vm526_vm0, %v2434_v32, %v2435_v19  ;;  %v2438_v31 = vsel %vm526_vm0, %v2435_v19, %v2437_v51  ;;  %v2541_v40 = vrot.slane %v2313_v48, 2  ;;  %v2545_v48 = vsel %vm639_vm1, %v2542_v35, %v2544_v1 }
 0x278   : > { %2288 = vst [vmem:[#allocation2 + $0x169] sm:$0xff] %v2256_v21  ;;  %v2259_v63 = vmax.f32 %v2225_v37, 0.0  ;;  %v2217_v55 = vadd.f32 %v2216_v13, %v2056_v9  ;;  %3530 = vmatprep.mubr.bf16.mxu0 %v7488_v34  ;;  %v7526_v42 = vpack.c.bf16 %v2438_v31, %v2436_v22  ;;  %v2440_v61 = vrot.slane %v7517_v54, 1 }
 0x279   : > { %v2543_v7 = vsel %vm639_vm1, %v2541_v40, %v2542_v35  ;;  %v2442_v44 = vrot.slane %v7519_v11, 1  ;;  %v2546_v27 = vrot.slane %v2316_v47, 2  ;;  %v2547_v57 = vrot.slane %v7493_v59, 2  ;;  %v2324_v59 = vld [vmem:[#allocation2 + $0x100] sm:$0x3] }
 0x27a   : > { %2291 = vst [vmem:[#allocation2 + $0x189] sm:$0xff] %v2259_v63  ;;  %v2257_v23 = vmax.f32 %v2217_v55, 0.0  ;;  %v2439_v2 = vrot.slane %v2319_v4, 1  ;;  %v2549_v49 = vrot.slane %v7495_v6, 2  ;;  %v7540_v45 = vpack.c.bf16 %v2545_v48, %v2543_v7  ;;  %v2323_v55 = vld [vmem:[#allocation2 + $0xf8] sm:$0xff] }
 0x27b   : > { %3370 = vmatmul.mubr.bf16.gmra.mxu1 %v7460_v46  ;;  %v7543_v21 = vpack.c.bf16 %v7517_v54, %v2319_v4  ;;  %v2443_v13 = vsel %vm526_vm0, %v2440_v61, %v2442_v44  ;;  %v2548_v41 = vsel %vm639_vm1, %v2546_v27, %v2547_v57  ;;  %v2445_v1 = vrot.slane %v2323_v55, 1 }
 0x27c   : > { %2289 = vst [vmem:[#allocation2 + $0x171] sm:$0xff] %v2257_v23  ;;  %3377 = vmatprep.mubr.bf16.mxu1 %v7499_v62  ;;  %v2441_v28 = vsel %vm526_vm0, %v2439_v2, %v2440_v61  ;;  %v2550_v35 = vsel %vm639_vm1, %v2547_v57, %v2549_v49  ;;  %v2447_v22 = vrot.slane %v2324_v59, 1  ;;  %v2444_v40 = vrot.slane %v2322_v25, 1 }
 0x27d   : > { %v7522_v60 = vld [vmem:[#allocation2 + $0x180] sm:$0xff]  ;;  %v7553_v15 = vpack.c.bf16 %v2443_v13, %v2441_v28  ;;  %v2552_v7 = vrot.slane %v7517_v54, 2  ;;  %v7566_v48 = vpack.c.bf16 %v2550_v35, %v2548_v41  ;;  %v2554_v61 = vrot.slane %v7519_v11, 2  ;;  %v2325_v54 = vld [vmem:[#allocation2 + $0x108] sm:$0xff]  ;;  %v2330_v41 = vld [vmem:[#allocation2 + $0x130] sm:$0x3] }
 0x27e   : > { %v2621_v29 = vrot.slane %v7522_v60, 1  ;;  %v2628_v58 = vrot.slane %v7522_v60, 2  ;;  %v7569_v44 = vpack.c.bf16 %v2323_v55, %v2322_v25  ;;  %v2448_v27 = vsel %vm526_vm0, %v2445_v1, %v2447_v22 }
 0x27f   : > { %3531 = vmatmul.mubr.bf16.gmra.mxu0 %v7508_v30  ;;  %v2551_v57 = vrot.slane %v2319_v4, 2  ;;  %v2557_v28 = vrot.slane %v2323_v55, 2  ;;  %v2559_v4 = vrot.slane %v2324_v59, 2 }
 0x280   : > { %3538 = vmatprep.mubr.bf16.mxu0 %v7512_v53  ;;  %v5029_v18 = vpop.f32.mrf.mxu1 }
 0x281   : > { %v7524_v38 = vld [vmem:[#allocation2 + $0x188] sm:$0xff]  ;;  %v2342_v5 = vld [vmem:[#allocation2 + $0x190] sm:$0x3]  ;;  %v2553_v11 = vsel %vm639_vm1, %v2551_v57, %v2552_v7  ;;  %v2560_v59 = vsel %vm639_vm1, %v2557_v28, %v2559_v4  ;;  %v2332_v57 = vld [vmem:[#allocation2 + $0x140] sm:$0xff] }
 0x282   : > { %v2622_v39 = vrot.slane %v7524_v38, 1  ;;  %v2629_v9 = vrot.slane %v7524_v38, 2  ;;  %v2624_v10 = vrot.slane %v2342_v5, 1  ;;  %v2631_v6 = vrot.slane %v2342_v5, 2  ;;  %v5030_v23 = vpop.f32.mrf.mxu1  ;;  %v2327_v5 = vld [vmem:[#allocation2 + $0x118] sm:$0x3] }
 0x283   : > { %3378 = vmatmul.mubr.bf16.gmra.mxu1 %v7488_v34  ;;  %v7555_v19 = vadd.f32 %v5030_v23, %v5029_v18  ;;  %v2452_v49 = vrot.slane %v2327_v5, 1  ;;  %v2556_v23 = vrot.slane %v2322_v25, 2  ;;  %v2564_v25 = vrot.slane %v2327_v5, 2 }
 0x284   : > { %3385 = vmatprep.mubr.bf16.mxu1 %v7526_v42  ;;  %v2623_v37 = vsel %vm526_vm0, %v2621_v29, %v2622_v39  ;;  %v2630_v63 = vsel %vm639_vm1, %v2628_v58, %v2629_v9  ;;  %v2625_v47 = vsel %vm526_vm0, %v2622_v39, %v2624_v10  ;;  %v2632_v32 = vsel %vm639_vm1, %v2629_v9, %v2631_v6  ;;  %v2326_v29 = vld [vmem:[#allocation2 + $0x110] sm:$0xff]  ;;  %v2329_v6 = vld [vmem:[#allocation2 + $0x128] sm:$0xff] }
 0x285   : > { %v7557_v51 = vpack.c.bf16 %v2625_v47, %v2623_v37  ;;  %v7562_v31 = vpack.c.bf16 %v2632_v32, %v2630_v63  ;;  %v2446_v39 = vsel %vm526_vm0, %v2444_v40, %v2445_v1  ;;  %v2555_v58 = vsel %vm639_vm1, %v2552_v7, %v2554_v61  ;;  %v2328_v32 = vld [vmem:[#allocation2 + $0x120] sm:$0xff] }
 0x286   : > { %v7575_v2 = vpack.c.bf16 %v2448_v27, %v2446_v39  ;;  %v2450_v9 = vrot.slane %v2326_v29, 1  ;;  %v2449_v37 = vrot.slane %v2325_v54, 1  ;;  %v7581_v13 = vpack.c.bf16 %v2555_v58, %v2553_v11  ;;  %v2333_v11 = vld [vmem:[#allocation2 + $0x148] sm:$0x3] }
 0x287   : > { %3539 = vmatmul.mubr.bf16.gmra.mxu0 %v7540_v45  ;;  %8516 = vst [vmem:[#allocation31_spill] sm:$0xff] %v7562_v31  ;;  %v7583_v18 = vpack.c.bf16 %v2326_v29, %v2325_v54  ;;  %v2558_v55 = vsel %vm639_vm1, %v2556_v23, %v2557_v28  ;;  %v2455_v35 = vrot.slane %v2329_v6, 1  ;;  %v2457_v1 = vrot.slane %v2330_v41, 1 }
 0x288   : > { %3546 = vmatprep.mubr.bf16.mxu0 %v7543_v21  ;;  %v2451_v10 = vsel %vm526_vm0, %v2449_v37, %v2450_v9  ;;  %v2453_v63 = vsel %vm526_vm0, %v2450_v9, %v2452_v49  ;;  %v2454_v22 = vrot.slane %v2328_v32, 1  ;;  %v2562_v40 = vrot.slane %v2326_v29, 2  ;;  %v2331_v49 = vld [vmem:[#allocation2 + $0x138] sm:$0xff] }
 0x289   : > { %v7589_v47 = vpack.c.bf16 %v2453_v63, %v2451_v10  ;;  %v7595_v7 = vpack.c.bf16 %v2560_v59, %v2558_v55  ;;  %v7597_v61 = vpack.c.bf16 %v2329_v6, %v2328_v32  ;;  %v2458_v27 = vsel %vm526_vm0, %v2455_v35, %v2457_v1  ;;  %v2336_v1 = vld [vmem:[#allocation2 + $0x160] sm:$0x3] }
 0x28a   : > { %v2456_v39 = vsel %vm526_vm0, %v2454_v22, %v2455_v35  ;;  %v2561_v58 = vrot.slane %v2325_v54, 2  ;;  %v2565_v5 = vsel %vm639_vm1, %v2562_v40, %v2564_v25  ;;  %v2460_v37 = vrot.slane %v2332_v57, 1  ;;  %v2335_v35 = vld [vmem:[#allocation2 + $0x158] sm:$0xff]  ;;  %v2334_v25 = vld [vmem:[#allocation2 + $0x150] sm:$0xff] }
 0x28b   : > { %3386 = vmatmul.mubr.bf16.gmra.mxu1 %v7512_v53  ;;  %v7603_v9 = vpack.c.bf16 %v2458_v27, %v2456_v39  ;;  %v2462_v28 = vrot.slane %v2333_v11, 1  ;;  %v2459_v4 = vrot.slane %v2331_v49, 1  ;;  %v2567_v10 = vrot.slane %v2329_v6, 2 }
 0x28c   : > { %3393 = vmatprep.mubr.bf16.mxu1 %v7553_v15  ;;  %v2563_v29 = vsel %vm639_vm1, %v2561_v58, %v2562_v40  ;;  %v2569_v54 = vrot.slane %v2330_v41, 2  ;;  %v7611_v23 = vpack.c.bf16 %v2332_v57, %v2331_v49  ;;  %v2566_v22 = vrot.slane %v2328_v32, 2 }
 0x28d   : > { %v7609_v63 = vpack.c.bf16 %v2565_v5, %v2563_v29  ;;  %v2461_v55 = vsel %vm526_vm0, %v2459_v4, %v2460_v37  ;;  %v2463_v59 = vsel %vm526_vm0, %v2460_v37, %v2462_v28  ;;  %v2465_v39 = vrot.slane %v2335_v35, 1 }
 0x28e   : > { %v7617_v40 = vpack.c.bf16 %v2463_v59, %v2461_v55  ;;  %v2568_v6 = vsel %vm639_vm1, %v2566_v22, %v2567_v10  ;;  %v2570_v41 = vsel %vm639_vm1, %v2567_v10, %v2569_v54  ;;  %v2467_v27 = vrot.slane %v2336_v1, 1  ;;  %v2338_v55 = vld [vmem:[#allocation2 + $0x170] sm:$0xff]  ;;  %v2339_v59 = vld [vmem:[#allocation2 + $0x178] sm:$0x3]  ;;  %v2337_v22 = vld [vmem:[#allocation2 + $0x168] sm:$0xff] }
 0x28f   : > { %3547 = vmatmul.mubr.bf16.gmra.mxu0 %v7566_v48  ;;  %v2464_v58 = vrot.slane %v2334_v25, 1  ;;  %v2572_v29 = vrot.slane %v2332_v57, 2  ;;  %v7623_v5 = vpack.c.bf16 %v2570_v41, %v2568_v6  ;;  %v2574_v32 = vrot.slane %v2333_v11, 2 }
 0x290   : > { %3554 = vmatprep.mubr.bf16.mxu0 %v7569_v44  ;;  %v7625_v37 = vpack.c.bf16 %v2335_v35, %v2334_v25  ;;  %v2468_v4 = vsel %vm526_vm0, %v2465_v39, %v2467_v27  ;;  %v2571_v10 = vrot.slane %v2331_v49, 2  ;;  %v2470_v6 = vrot.slane %v2338_v55, 1 }
 0x291   : > { %v2466_v28 = vsel %vm526_vm0, %v2464_v58, %v2465_v39  ;;  %v2575_v11 = vsel %vm639_vm1, %v2572_v29, %v2574_v32  ;;  %v2472_v41 = vrot.slane %v2339_v59, 1  ;;  %v2469_v39 = vrot.slane %v2337_v22, 1 }
 0x292   : > { %v7631_v54 = vpack.c.bf16 %v2468_v4, %v2466_v28  ;;  %v2573_v57 = vsel %vm639_vm1, %v2571_v10, %v2572_v29  ;;  %v2577_v27 = vrot.slane %v2335_v35, 2  ;;  %v2579_v49 = vrot.slane %v2336_v1, 2 }
 0x293   : > { %3394 = vmatmul.mubr.bf16.gmra.mxu1 %v7543_v21  ;;  %v7637_v58 = vpack.c.bf16 %v2575_v11, %v2573_v57  ;;  %v7639_v31 = vpack.c.bf16 %v2338_v55, %v2337_v22  ;;  %v2471_v28 = vsel %vm526_vm0, %v2469_v39, %v2470_v6  ;;  %v2473_v4 = vsel %vm526_vm0, %v2470_v6, %v2472_v41 }
 0x294   : > { %3401 = vmatprep.mubr.bf16.mxu1 %v7575_v2  ;;  %v2576_v10 = vrot.slane %v2334_v25, 2  ;;  %v7645_v29 = vpack.c.bf16 %v2473_v4, %v2471_v28  ;;  %v2580_v32 = vsel %vm639_vm1, %v2577_v27, %v2579_v49  ;;  %v2582_v57 = vrot.slane %v2338_v55, 2 }
 0x295   : > { %v2584_v11 = vrot.slane %v2339_v59, 2  ;;  %v7655_v6 = vpack.c.bf16 %v7524_v38, %v7522_v60  ;;  %v2581_v25 = vrot.slane %v2337_v22, 2  ;;  %v5790_v60 = vld [vmem:[#allocation8 + $0x230] sm:$0xff]   ;;  %v5791_v38 = vld [vmem:[#allocation8 + $0x228] sm:$0xff]  }
 0x296   : > { %v2578_v35 = vsel %vm639_vm1, %v2576_v10, %v2577_v27 }
 0x297   : > { %3555 = vmatmul.mubr.bf16.gmra.mxu0 %v7581_v13  ;;  %v7651_v1 = vpack.c.bf16 %v2580_v32, %v2578_v35  ;;  %v2583_v41 = vsel %vm639_vm1, %v2581_v25, %v2582_v57  ;;  %v2585_v39 = vsel %vm639_vm1, %v2582_v57, %v2584_v11 }
 0x298   : > { %3562 = vmatprep.mubr.bf16.mxu0 %v7583_v18  ;;  %v7663_v27 = vpack.c.bf16 %v2585_v39, %v2583_v41 }
 0x29b   : > { %3402 = vmatmul.mubr.bf16.gmra.mxu1 %v7569_v44 }
 0x29c   : > { %3409 = vmatprep.mubr.bf16.mxu1 %v7589_v47 }
 0x29f   : > { %3563 = vmatmul.mubr.bf16.gmra.mxu0 %v7595_v7 }
 0x2a0   : > { %3570 = vmatprep.mubr.bf16.mxu0 %v7597_v61 }
 0x2a3   : > { %3410 = vmatmul.mubr.bf16.gmra.mxu1 %v7583_v18 }
 0x2a4   : > { %3417 = vmatprep.mubr.bf16.mxu1 %v7603_v9 }
 0x2a7   : > { %3571 = vmatmul.mubr.bf16.gmra.mxu0 %v7609_v63 }
 0x2a8   : > { %3578 = vmatprep.mubr.bf16.mxu0 %v7611_v23 }
 0x2ab   : > { %3418 = vmatmul.mubr.bf16.gmra.mxu1 %v7597_v61 }
 0x2ac   : > { %3425 = vmatprep.mubr.bf16.mxu1 %v7617_v40 }
 0x2af   : > { %3579 = vmatmul.mubr.bf16.gmra.mxu0 %v7623_v5 }
 0x2b0   : > { %3586 = vmatprep.mubr.bf16.mxu0 %v7625_v37 }
 0x2b3   : > { %3426 = vmatmul.mubr.bf16.gmra.mxu1 %v7611_v23 }
 0x2b4   : > { %3433 = vmatprep.mubr.bf16.mxu1 %v7631_v54 }
 0x2b7   : > { %3587 = vmatmul.mubr.bf16.gmra.mxu0 %v7637_v58 }
 0x2b8   : > { %3594 = vmatprep.mubr.bf16.mxu0 %v7639_v31 }
 0x2bb   : > { %3434 = vmatmul.mubr.bf16.gmra.mxu1 %v7625_v37 }
 0x2bc   : > { %3441 = vmatprep.mubr.bf16.mxu1 %v7645_v29 }
 0x2bf   : > { %3595 = vmatmul.mubr.bf16.gmra.mxu0 %v7651_v1 }
 0x2c0   : > { %3602 = vmatprep.mubr.bf16.mxu0 %v7655_v6 }
 0x2c3   : > { %3442 = vmatmul.mubr.bf16.gmra.mxu1 %v7639_v31 }
 0x2c4   : > { %3643 = vmatprep.mubr.bf16.mxu1 %v7324_v36  ;;  %v5792_v36 = vld [vmem:[#allocation8 + $0x220] sm:$0xff]  }
 0x2c7   : > { %3603 = vmatmul.mubr.bf16.gmra.mxu0 %v7663_v27 }
 0x2c8   : > { %3804 = vmatprep.mubr.bf16.mxu0 %v7301_v14 }
 0x2cb   : > { %3644 = vmatmul.mubr.bf16.vlgmr.msra.gmra.mxu1 %v7291_v16  ;;  %v5793_v16 = vld [vmem:[#allocation8 + $0x218] sm:$0xff]  }
 0x2cc   : > { %3651 = vmatprep.mubr.bf16.mxu1 %v7367_v3  ;;  %5534 = vmatpush3.bf16.msra.mxu1 %v7274_v52  ;;  %v5794_v52 = vld [vmem:[#allocation8 + $0x210] sm:$0xff]  }
 0x2cd   : > { %5535 = vmatprep.subr.bf16.mxu1 %v5790_v60 }
 0x2cf   : > { %3805 = vmatmul.mubr.bf16.vlgmr.msra.gmra.mxu0 %v7283_v50  ;;  %v5795_v50 = vld [vmem:[#allocation8 + $0x208] sm:$0xff]  }
 0x2d0   : > { %5536 = vmatpush3.bf16.msra.mxu1 %v5790_v60  ;;  %3812 = vmatprep.mubr.bf16.mxu0 %v7348_v17 }
 0x2d1   : > { %5537 = vmatprep.subr.bf16.mxu1 %v5791_v38 }
 0x2d3   : > { %3652 = vmatmul.mubr.bf16.gmra.mxu1 %v7301_v14  ;;  %v5796_v14 = vld [vmem:[#allocation8 + $0x200] sm:$0xff]  }
 0x2d4   : > { %3659 = vmatprep.mubr.bf16.mxu1 %v7412_v43  ;;  %5538 = vmatpush3.bf16.msra.mxu1 %v5791_v38 }
 0x2d5   : > { %5539 = vmatprep.subr.bf16.mxu1 %v5792_v36 }
 0x2d7   : > { %3813 = vmatmul.mubr.bf16.gmra.mxu0 %v7329_v20  ;;  %v5032_v20 = vpop.f32.mrf.mxu1 }
 0x2d8   : > { %5540 = vmatpush3.bf16.msra.mxu1 %v5792_v36  ;;  %3820 = vmatprep.mubr.bf16.mxu0 %v7392_v56 }
 0x2d9   : > { %5541 = vmatprep.subr.bf16.mxu1 %v5793_v16 }
 0x2db   : > { %3660 = vmatmul.mubr.bf16.gmra.mxu1 %v7348_v17  ;;  %v7705_v17 = vld [vmem:[%s8312_s4] ss:$0 sm:$0xff] }
 0x2dc   : > { %3667 = vmatprep.mubr.bf16.mxu1 %v7455_v24  ;;  %5542 = vmatpush3.bf16.msra.mxu1 %v5793_v16 }
 0x2dd   : > { %5543 = vmatprep.subr.bf16.mxu1 %v5794_v52 }
 0x2df   : > { %3821 = vmatmul.mubr.bf16.gmra.mxu0 %v7371_v8  ;;  %v5033_v8 = vpop.f32.mrf.mxu1 }
 0x2e0   : > { %5544 = vmatpush3.bf16.msra.mxu1 %v5794_v52  ;;  %3828 = vmatprep.mubr.bf16.mxu0 %v7436_v0 }
 0x2e1   : > { %5545 = vmatprep.subr.bf16.mxu1 %v5795_v50 }
 0x2e3   : > { %3668 = vmatmul.mubr.bf16.gmra.mxu1 %v7392_v56 }
 0x2e4   : > { %3675 = vmatprep.mubr.bf16.mxu1 %v7484_v26  ;;  %5546 = vmatpush3.bf16.msra.mxu1 %v5795_v50 }
 0x2e5   : > { %5547 = vmatprep.subr.bf16.mxu1 %v5796_v14 }
 0x2e7   : > { %3829 = vmatmul.mubr.bf16.gmra.mxu0 %v7417_v33 }
 0x2e8   : > { %5548 = vmatpush3.bf16.msra.mxu1 %v5796_v14  ;;  %3836 = vmatprep.mubr.bf16.mxu0 %v7474_v12 }
 0x2eb   : > { %3676 = vmatmul.mubr.bf16.gmra.mxu1 %v7436_v0  ;;  %v3324_v0 = vadd.f32 %v7555_v19, %v7705_v17 }
 0x2ec   : > { %3683 = vmatprep.mubr.bf16.mxu1 %v7508_v30 }
 0x2ef   : > { %3837 = vmatmul.mubr.bf16.gmra.mxu0 %v7460_v46  ;;  %v5034_v46 = vadd.f32 %v5033_v8, %v5032_v20 }
 0x2f0   : > { %3844 = vmatprep.mubr.bf16.mxu0 %v7499_v62 }
 0x2f3   : > { %3684 = vmatmul.mubr.bf16.gmra.mxu1 %v7474_v12 }
 0x2f4   : > { %3691 = vmatprep.mubr.bf16.mxu1 %v7540_v45 }
 0x2f7   : > { %3845 = vmatmul.mubr.bf16.gmra.mxu0 %v7488_v34 }
 0x2f8   : > { %3852 = vmatprep.mubr.bf16.mxu0 %v7526_v42 }
 0x2fb   : > { %3692 = vmatmul.mubr.bf16.gmra.mxu1 %v7499_v62 }
 0x2fc   : > { %3699 = vmatprep.mubr.bf16.mxu1 %v7566_v48 }
 0x2ff   : > { %3853 = vmatmul.mubr.bf16.gmra.mxu0 %v7512_v53 }
 0x300   : > { %3860 = vmatprep.mubr.bf16.mxu0 %v7553_v15 }
 0x303   : > { %3700 = vmatmul.mubr.bf16.gmra.mxu1 %v7526_v42 }
 0x304   : > { %3707 = vmatprep.mubr.bf16.mxu1 %v7581_v13 }
 0x307   : > { %3861 = vmatmul.mubr.bf16.gmra.mxu0 %v7543_v21 }
 0x308   : > { %3868 = vmatprep.mubr.bf16.mxu0 %v7575_v2 }
 0x30b   : > { %3708 = vmatmul.mubr.bf16.gmra.mxu1 %v7553_v15 }
 0x30c   : > { %3715 = vmatprep.mubr.bf16.mxu1 %v7595_v7 }
 0x30f   : > { %v5141_v56 = vpop.f32.mrf.mxu0  ;;  %3869 = vmatmul.mubr.bf16.gmra.mxu0 %v7569_v44  ;;  %v3327_v44 = vadd.f32 %v5034_v46, %v7705_v17 }
 0x310   : > { %3876 = vmatprep.mubr.bf16.mxu0 %v7589_v47 }
 0x311   : > { %v5142_v33 = vpop.f32.mrf.mxu0 }
 0x312   : > { %v5143_v12 = vadd.f32 %v5142_v33, %v5141_v56 }
 0x313   : > { %v5035_v34 = vpop.f32.mrf.mxu1  ;;  %3716 = vmatmul.mubr.bf16.gmra.mxu1 %v7575_v2  ;;  %v5144_v62 = vpop.f32.mrf.mxu0 }
 0x314   : > { %3723 = vmatprep.mubr.bf16.mxu1 %v7609_v63  ;;  %v7713_v53 = vadd.f32 %v5143_v12, %v3324_v0 }
 0x315   : > { %v5036_v42 = vpop.f32.mrf.mxu1  ;;  %v5145_v15 = vpop.f32.mrf.mxu0 }
 0x316   : > { %v5037_v21 = vadd.f32 %v5036_v42, %v5035_v34  ;;  %v5146_v55 = vadd.f32 %v5145_v15, %v5144_v62 }
 0x317   : > { %v5038_v59 = vpop.f32.mrf.mxu1  ;;  %v5147_v22 = vpop.f32.mrf.mxu0  ;;  %3877 = vmatmul.mubr.bf16.gmra.mxu0 %v7583_v18 }
 0x318   : > { %v7717_v19 = vadd.f32 %v5146_v55, %v3327_v44  ;;  %3884 = vmatprep.mubr.bf16.mxu0 %v7603_v9  ;;  %v3332_v4 = vadd.f32 %v5037_v21, %v7705_v17 }
 0x319   : > { %v5039_v49 = vpop.f32.mrf.mxu1  ;;  %v5148_v28 = vpop.f32.mrf.mxu0 }
 0x31a   : > { %v5040_v2 = vadd.f32 %v5039_v49, %v5038_v59  ;;  %v5149_v10 = vadd.f32 %v5148_v28, %v5147_v22 }
 0x31b   : > { %v5041_v35 = vpop.f32.mrf.mxu1  ;;  %3724 = vmatmul.mubr.bf16.gmra.mxu1 %v7589_v47  ;;  %v5150_v32 = vpop.f32.mrf.mxu0 }
 0x31c   : > { %3731 = vmatprep.mubr.bf16.mxu1 %v7623_v5  ;;  %v7723_v57 = vadd.f32 %v5149_v10, %v3332_v4  ;;  %v3335_v41 = vadd.f32 %v5040_v2, %v7705_v17 }
 0x31d   : > { %v5042_v11 = vpop.f32.mrf.mxu1  ;;  %v5151_v25 = vpop.f32.mrf.mxu0 }
 0x31e   : > { %v5043_v18 = vadd.f32 %v5042_v11, %v5041_v35  ;;  %v5152_v39 = vadd.f32 %v5151_v25, %v5150_v32 }
 0x31f   : > { %v5044_v60 = vpop.f32.mrf.mxu1  ;;  %v5153_v38 = vpop.f32.mrf.mxu0  ;;  %3885 = vmatmul.mubr.bf16.gmra.mxu0 %v7597_v61 }
 0x320   : > { %v7727_v36 = vadd.f32 %v5152_v39, %v3335_v41  ;;  %3892 = vmatprep.mubr.bf16.mxu0 %v7617_v40  ;;  %v3340_v50 = vadd.f32 %v5043_v18, %v7705_v17 }
 0x321   : > { %v5045_v16 = vpop.f32.mrf.mxu1  ;;  %v5154_v52 = vpop.f32.mrf.mxu0 }
 0x322   : > { %v5046_v47 = vadd.f32 %v5045_v16, %v5044_v60  ;;  %v5155_v14 = vadd.f32 %v5154_v52, %v5153_v38  ;;  %v7752_v38 = vld [vmem:[#allocation2 + $0x1a8] sm:$0x3] }
 0x323   : > { %v5047_v20 = vpop.f32.mrf.mxu1  ;;  %3732 = vmatmul.mubr.bf16.gmra.mxu1 %v7603_v9  ;;  %v5156_v8 = vpop.f32.mrf.mxu0 }
 0x324   : > { %3739 = vmatprep.mubr.bf16.mxu1 %v7637_v58  ;;  %v7733_v56 = vadd.f32 %v5155_v14, %v3340_v50  ;;  %v3343_v46 = vadd.f32 %v5046_v47, %v7705_v17  ;;  %v7757_v14 = vld [vmem:[#allocation2] sm:$0xff] }
 0x325   : > { %v5048_v33 = vpop.f32.mrf.mxu1  ;;  %v5157_v0 = vpop.f32.mrf.mxu0 }
 0x326   : > { %v5049_v61 = vadd.f32 %v5048_v33, %v5047_v20  ;;  %v5158_v12 = vadd.f32 %v5157_v0, %v5156_v8  ;;  %v2638_v20 = vrot.slane %v7757_v14, 1  ;;  %v2641_v8 = vrot.slane %v7752_v38, 1 }
 0x327   : > { %v5050_v34 = vpop.f32.mrf.mxu1  ;;  %v5159_v62 = vpop.f32.mrf.mxu0  ;;  %3893 = vmatmul.mubr.bf16.gmra.mxu0 %v7611_v23 }
 0x328   : > { %v7737_v42 = vadd.f32 %v5158_v12, %v3343_v46  ;;  %3900 = vmatprep.mubr.bf16.mxu0 %v7631_v54  ;;  %v3348_v44 = vadd.f32 %v5049_v61, %v7705_v17 }
 0x329   : > { %v5051_v21 = vpop.f32.mrf.mxu1  ;;  %v5160_v15 = vpop.f32.mrf.mxu0 }
 0x32a   : > { %v5052_v9 = vadd.f32 %v5051_v21, %v5050_v34  ;;  %v5161_v55 = vadd.f32 %v5160_v15, %v5159_v62  ;;  %v2642_v21 = vsel %vm526_vm0, %v2638_v20, %v2641_v8 }
 0x32b   : > { %v5053_v59 = vpop.f32.mrf.mxu1  ;;  %3740 = vmatmul.mubr.bf16.gmra.mxu1 %v7617_v40  ;;  %v5162_v22 = vpop.f32.mrf.mxu0 }
 0x32c   : > { %3747 = vmatprep.mubr.bf16.mxu1 %v7651_v1  ;;  %v7743_v49 = vadd.f32 %v5161_v55, %v3348_v44  ;;  %v3351_v4 = vadd.f32 %v5052_v9, %v7705_v17 }
 0x32d   : > { %v5054_v2 = vpop.f32.mrf.mxu1  ;;  %v5163_v28 = vpop.f32.mrf.mxu0 }
 0x32e   : > { %v5055_v23 = vadd.f32 %v5054_v2, %v5053_v59  ;;  %v5164_v10 = vadd.f32 %v5163_v28, %v5162_v22  ;;  %v8517_v59 = vld [vmem:[#allocation31_spill] sm:$0xff]  ;;  %v2704_v2 = vpack.c.bf16 %v2642_v21, %v2638_v20 }
 0x32f   : > { %v5056_v35 = vpop.f32.mrf.mxu1  ;;  %v5165_v32 = vpop.f32.mrf.mxu0  ;;  %3901 = vmatmul.mubr.bf16.gmra.mxu0 %v7625_v37 }
 0x330   : > { %v7747_v11 = vadd.f32 %v5164_v10, %v3351_v4  ;;  %3908 = vmatprep.mubr.bf16.mxu0 %v7645_v29  ;;  %v3356_v41 = vadd.f32 %v5055_v23, %v7705_v17 }
 0x331   : > { %v5057_v18 = vpop.f32.mrf.mxu1  ;;  %v5166_v25 = vpop.f32.mrf.mxu0 }
 0x332   : > { %v5058_v40 = vadd.f32 %v5057_v18, %v5056_v35  ;;  %v5167_v39 = vadd.f32 %v5166_v25, %v5165_v32 }
 0x333   : > { %v5059_v60 = vpop.f32.mrf.mxu1  ;;  %3748 = vmatmul.mubr.bf16.gmra.mxu1 %v7631_v54  ;;  %v5168_v16 = vpop.f32.mrf.mxu0 }
 0x334   : > { %3755 = vmatprep.mubr.bf16.mxu1 %v7663_v27  ;;  %v7755_v47 = vadd.f32 %v5167_v39, %v3356_v41  ;;  %v3359_v33 = vadd.f32 %v5058_v40, %v7705_v17 }
 0x335   : > { %v5060_v37 = vpop.f32.mrf.mxu1  ;;  %v5169_v50 = vpop.f32.mrf.mxu0 }
 0x336   : > { %v5061_v52 = vadd.f32 %v5060_v37, %v5059_v60  ;;  %v5170_v61 = vadd.f32 %v5169_v50, %v5168_v16  ;;  %v2703_v37 = vpack.c.bf16 %v7757_v14, %v7757_v14 }
 0x337   : > { %v5062_v54 = vpop.f32.mrf.mxu1  ;;  %v5171_v0 = vpop.f32.mrf.mxu0  ;;  %3909 = vmatmul.mubr.bf16.gmra.mxu0 %v7639_v31 }
 0x338   : > { %v7763_v46 = vadd.f32 %v5170_v61, %v3359_v33  ;;  %3916 = vmatprep.mubr.bf16.mxu0 %v7557_v51  ;;  %v3364_v9 = vadd.f32 %v5061_v52, %v7705_v17 }
 0x339   : > { %v5063_v12 = vpop.f32.mrf.mxu1  ;;  %v5172_v62 = vpop.f32.mrf.mxu0 }
 0x33a   : > { %v5064_v34 = vadd.f32 %v5063_v12, %v5062_v54  ;;  %v5173_v15 = vadd.f32 %v5172_v62, %v5171_v0 }
 0x33b   : > { %v5065_v44 = vpop.f32.mrf.mxu1  ;;  %3756 = vmatmul.mubr.bf16.gmra.mxu1 %v7645_v29  ;;  %v5174_v55 = vpop.f32.mrf.mxu0 }
 0x33c   : > { %3763 = vmatprep.mubr.bf16.mxu1 %v8517_v59  ;;  %v7770_v22 = vadd.f32 %v5173_v15, %v3364_v9  ;;  %v3367_v4 = vadd.f32 %v5064_v34, %v7705_v17 }
 0x33d   : > { %v5066_v31 = vpop.f32.mrf.mxu1  ;;  %v5175_v28 = vpop.f32.mrf.mxu0 }
 0x33e   : > { %v5067_v23 = vadd.f32 %v5066_v31, %v5065_v44  ;;  %v5176_v10 = vadd.f32 %v5175_v28, %v5174_v55 }
 0x33f   : > { %v5068_v35 = vpop.f32.mrf.mxu1  ;;  %v5177_v32 = vpop.f32.mrf.mxu0  ;;  %3917 = vmatmul.mubr.bf16.gmra.mxu0 %v7655_v6 }
 0x340   : > { %v7774_v18 = vadd.f32 %v5176_v10, %v3367_v4  ;;  %3924 = vmatprep.mubr.bf16.mxu0 %v2704_v2  ;;  %v3372_v41 = vadd.f32 %v5067_v23, %v7705_v17 }
 0x341   : > { %v5069_v40 = vpop.f32.mrf.mxu1  ;;  %v5178_v25 = vpop.f32.mrf.mxu0 }
 0x342   : > { %v5070_v29 = vadd.f32 %v5069_v40, %v5068_v35  ;;  %v5179_v39 = vadd.f32 %v5178_v25, %v5177_v32 }
 0x343   : > { %v5071_v60 = vpop.f32.mrf.mxu1  ;;  %3764 = vmatmul.mubr.bf16.gmra.mxu1 %v7557_v51  ;;  %v5180_v16 = vpop.f32.mrf.mxu0 }
 0x344   : > { %5549 = vmatprep.mubr.bf16.mxu1 %v7367_v3  ;;  %v7781_v52 = vadd.f32 %v5179_v39, %v3372_v41  ;;  %v3375_v8 = vadd.f32 %v5070_v29, %v7705_v17 }
 0x345   : > { %v5072_v6 = vpop.f32.mrf.mxu1  ;;  %v5181_v20 = vpop.f32.mrf.mxu0 }
 0x346   : > { %v5073_v50 = vadd.f32 %v5072_v6, %v5071_v60  ;;  %v5182_v33 = vadd.f32 %v5181_v20, %v5180_v16 }
 0x347   : > { %v5074_v61 = vpop.f32.mrf.mxu1  ;;  %v5183_v54 = vpop.f32.mrf.mxu0  ;;  %3925 = vmatmul.mubr.bf16.gmra.mxu0 %v2703_v37 }
 0x348   : > { %v7784_v0 = vadd.f32 %v5182_v33, %v3375_v8  ;;  %v3380_v3 = vadd.f32 %v5073_v50, %v7705_v17 }
 0x349   : > { %v5075_v51 = vpop.f32.mrf.mxu1  ;;  %v5184_v34 = vpop.f32.mrf.mxu0 }
 0x34a   : > { %v5076_v12 = vadd.f32 %v5075_v51, %v5074_v61  ;;  %v5185_v62 = vadd.f32 %v5184_v34, %v5183_v54 }
 0x34b   : > { %v5077_v21 = vpop.f32.mrf.mxu1  ;;  %5550 = vmatmul.mubr.bf16.vlgmr.msra.gmra.mxu1 %v7412_v43  ;;  %v5186_v9 = vpop.f32.mrf.mxu0 }
 0x34c   : > { %5553 = vmatprep.mubr.bf16.mxu1 %v7455_v24  ;;  %v7789_v15 = vadd.f32 %v5185_v62, %v3380_v3  ;;  %v3383_v2 = vadd.f32 %v5076_v12, %v7705_v17 }
 0x34d   : > { %v5078_v44 = vpop.f32.mrf.mxu1  ;;  %v5187_v31 = vpop.f32.mrf.mxu0 }
 0x34e   : > { %v5079_v55 = vadd.f32 %v5078_v44, %v5077_v21  ;;  %v5188_v23 = vadd.f32 %v5187_v31, %v5186_v9 }
 0x34f   : > { %v5080_v28 = vpop.f32.mrf.mxu1  ;;  %v5189_v4 = vpop.f32.mrf.mxu0 }
 0x350   : > { %v7792_v10 = vadd.f32 %v5188_v23, %v3383_v2  ;;  %v3388_v43 = vadd.f32 %v5079_v55, %v7705_v17 }
 0x351   : > { %v5081_v35 = vpop.f32.mrf.mxu1  ;;  %v5190_v40 = vpop.f32.mrf.mxu0 }
 0x352   : > { %v5082_v32 = vadd.f32 %v5081_v35, %v5080_v28  ;;  %v5191_v29 = vadd.f32 %v5190_v40, %v5189_v4 }
 0x353   : > { %v5083_v25 = vpop.f32.mrf.mxu1  ;;  %5554 = vmatmul.mubr.bf16.gmra.mxu1 %v7484_v26  ;;  %v5192_v24 = vpop.f32.mrf.mxu0 }
 0x354   : > { %5557 = vmatprep.mubr.bf16.mxu1 %v7508_v30  ;;  %v7797_v41 = vadd.f32 %v5191_v29, %v3388_v43  ;;  %v3391_v37 = vadd.f32 %v5082_v32, %v7705_v17 }
 0x355   : > { %v5084_v39 = vpop.f32.mrf.mxu1  ;;  %v5193_v16 = vpop.f32.mrf.mxu0 }
 0x356   : > { %v5085_v60 = vadd.f32 %v5084_v39, %v5083_v25  ;;  %v5194_v6 = vadd.f32 %v5193_v16, %v5192_v24 }
 0x357   : > { %v5086_v50 = vpop.f32.mrf.mxu1  ;;  %v5195_v20 = vpop.f32.mrf.mxu0 }
 0x358   : > { %v7800_v8 = vadd.f32 %v5194_v6, %v3391_v37  ;;  %v3396_v26 = vadd.f32 %v5085_v60, %v7705_v17 }
 0x359   : > { %v5087_v33 = vpop.f32.mrf.mxu1  ;;  %v5196_v54 = vpop.f32.mrf.mxu0 }
 0x35a   : > { %v5088_v61 = vadd.f32 %v5087_v33, %v5086_v50  ;;  %v5197_v51 = vadd.f32 %v5196_v54, %v5195_v20 }
 0x35b   : > { %v5089_v12 = vpop.f32.mrf.mxu1  ;;  %5558 = vmatmul.mubr.bf16.gmra.mxu1 %v7540_v45  ;;  %v5198_v30 = vpop.f32.mrf.mxu0 }
 0x35c   : > { %5561 = vmatprep.mubr.bf16.mxu1 %v7566_v48  ;;  %v7805_v34 = vadd.f32 %v5197_v51, %v3396_v26  ;;  %v3399_v9 = vadd.f32 %v5088_v61, %v7705_v17 }
 0x35d   : > { %v5090_v3 = vpop.f32.mrf.mxu1  ;;  %v5199_v21 = vpop.f32.mrf.mxu0 }
 0x35e   : > { %v5091_v62 = vadd.f32 %v5090_v3, %v5089_v12  ;;  %v5200_v44 = vadd.f32 %v5199_v21, %v5198_v30 }
 0x35f   : > { %v5092_v55 = vpop.f32.mrf.mxu1  ;;  %v5201_v31 = vpop.f32.mrf.mxu0 }
 0x360   : > { %v7808_v2 = vadd.f32 %v5200_v44, %v3399_v9  ;;  %v3404_v45 = vadd.f32 %v5091_v62, %v7705_v17 }
 0x361   : > { %v5093_v23 = vpop.f32.mrf.mxu1  ;;  %v5202_v4 = vpop.f32.mrf.mxu0 }
 0x362   : > { %v5094_v28 = vadd.f32 %v5093_v23, %v5092_v55  ;;  %v5203_v35 = vadd.f32 %v5202_v4, %v5201_v31 }
 0x363   : > { %v5095_v32 = vpop.f32.mrf.mxu1  ;;  %5562 = vmatmul.mubr.bf16.gmra.mxu1 %v7581_v13  ;;  %v5204_v48 = vpop.f32.mrf.mxu0 }
 0x364   : > { %5565 = vmatprep.mubr.bf16.mxu1 %v7595_v7  ;;  %v7813_v40 = vadd.f32 %v5203_v35, %v3404_v45  ;;  %v3407_v24 = vadd.f32 %v5094_v28, %v7705_v17 }
 0x365   : > { %v5096_v43 = vpop.f32.mrf.mxu1  ;;  %v5205_v25 = vpop.f32.mrf.mxu0 }
 0x366   : > { %v5097_v29 = vadd.f32 %v5096_v43, %v5095_v32  ;;  %v5206_v39 = vadd.f32 %v5205_v25, %v5204_v48  ;;  %v2648_v25 = vrot.slane %v7752_v38, 2 }
 0x367   : > { %v5098_v60 = vpop.f32.mrf.mxu1  ;;  %v5207_v16 = vpop.f32.mrf.mxu0 }
 0x368   : > { %v7816_v37 = vadd.f32 %v5206_v39, %v3407_v24  ;;  %v3412_v13 = vadd.f32 %v5097_v29, %v7705_v17  ;;  %v2645_v39 = vrot.slane %v7757_v14, 2 }
 0x369   : > { %v5099_v6 = vpop.f32.mrf.mxu1  ;;  %v5208_v20 = vpop.f32.mrf.mxu0 }
 0x36a   : > { %v5100_v50 = vadd.f32 %v5099_v6, %v5098_v60  ;;  %v5209_v33 = vadd.f32 %v5208_v20, %v5207_v16 }
 0x36b   : > { %v5101_v61 = vpop.f32.mrf.mxu1  ;;  %5566 = vmatmul.mubr.bf16.gmra.mxu1 %v7609_v63  ;;  %v5210_v7 = vpop.f32.mrf.mxu0 }
 0x36c   : > { %5569 = vmatprep.mubr.bf16.mxu1 %v7623_v5  ;;  %v7821_v54 = vadd.f32 %v5209_v33, %v3412_v13  ;;  %v3415_v30 = vadd.f32 %v5100_v50, %v7705_v17  ;;  %v2649_v33 = vsel %vm639_vm1, %v2645_v39, %v2648_v25 }
 0x36d   : > { %v5102_v26 = vpop.f32.mrf.mxu1  ;;  %v5211_v12 = vpop.f32.mrf.mxu0 }
 0x36e   : > { %v5103_v51 = vadd.f32 %v5102_v26, %v5101_v61  ;;  %v5212_v3 = vadd.f32 %v5211_v12, %v5210_v7 }
 0x36f   : > { %v5104_v62 = vpop.f32.mrf.mxu1  ;;  %v5213_v21 = vpop.f32.mrf.mxu0 }
 0x370   : > { %v7824_v9 = vadd.f32 %v5212_v3, %v3415_v30  ;;  %v3420_v63 = vadd.f32 %v5103_v51, %v7705_v17  ;;  %v2705_v30 = vpack.c.bf16 %v2649_v33, %v2645_v39 }
 0x371   : > { %v5105_v44 = vpop.f32.mrf.mxu1  ;;  %v5214_v31 = vpop.f32.mrf.mxu0 }
 0x372   : > { %v5106_v55 = vadd.f32 %v5105_v44, %v5104_v62  ;;  %v5215_v23 = vadd.f32 %v5214_v31, %v5213_v21 }
 0x373   : > { %v5107_v28 = vpop.f32.mrf.mxu1  ;;  %5570 = vmatmul.mubr.bf16.gmra.mxu1 %v7637_v58  ;;  %v5216_v5 = vpop.f32.mrf.mxu0 }
 0x374   : > { %5573 = vmatprep.mubr.bf16.mxu1 %v7651_v1  ;;  %v7829_v4 = vadd.f32 %v5215_v23, %v3420_v63  ;;  %v3423_v48 = vadd.f32 %v5106_v55, %v7705_v17 }
 0x375   : > { %v5108_v45 = vpop.f32.mrf.mxu1  ;;  %v5217_v32 = vpop.f32.mrf.mxu0 }
 0x376   : > { %v5109_v35 = vadd.f32 %v5108_v45, %v5107_v28  ;;  %v5218_v43 = vadd.f32 %v5217_v32, %v5216_v5 }
 0x377   : > { %v5110_v29 = vpop.f32.mrf.mxu1  ;;  %v5219_v24 = vpop.f32.mrf.mxu0 }
 0x378   : > { %v7834_v60 = vadd.f32 %v5218_v43, %v3423_v48  ;;  %v3428_v1 = vadd.f32 %v5109_v35, %v7705_v17 }
 0x379   : > { %v5111_v58 = vpop.f32.mrf.mxu1  ;;  %v5220_v6 = vpop.f32.mrf.mxu0 }
 0x37a   : > { %v5112_v16 = vadd.f32 %v5111_v58, %v5110_v29  ;;  %v5221_v50 = vadd.f32 %v5220_v6, %v5219_v24 }
 0x37b   : > { %v5113_v20 = vpop.f32.mrf.mxu1  ;;  %5574 = vmatmul.mubr.bf16.gmra.mxu1 %v7663_v27  ;;  %v5222_v13 = vpop.f32.mrf.mxu0 }
 0x37c   : > { %5577 = vmatprep.mubr.bf16.mxu1 %v8517_v59  ;;  %v7840_v38 = vadd.f32 %v5221_v50, %v3428_v1  ;;  %v3431_v26 = vadd.f32 %v5112_v16, %v7705_v17 }
 0x37d   : > { %v5114_v61 = vpop.f32.mrf.mxu1  ;;  %v5223_v7 = vpop.f32.mrf.mxu0 }
 0x37e   : > { %v5115_v14 = vadd.f32 %v5114_v61, %v5113_v20  ;;  %v5224_v51 = vadd.f32 %v5223_v7, %v5222_v13 }
 0x37f   : > { %v5116_v12 = vpop.f32.mrf.mxu1  ;;  %v5225_v3 = vpop.f32.mrf.mxu0 }
 0x380   : > { %v7843_v62 = vadd.f32 %v5224_v51, %v3431_v26  ;;  %v3436_v59 = vadd.f32 %v5115_v14, %v7705_v17 }
 0x381   : > { %v5117_v21 = vpop.f32.mrf.mxu1  ;;  %v5226_v44 = vpop.f32.mrf.mxu0 }
 0x382   : > { %v5118_v27 = vadd.f32 %v5117_v21, %v5116_v12  ;;  %v5227_v55 = vadd.f32 %v5226_v44, %v5225_v3 }
 0x383   : > { %v5119_v31 = vpop.f32.mrf.mxu1  ;;  %5578 = vmatmul.mubr.bf16.gmra.mxu1 %v2705_v30  ;;  %v5228_v63 = vpop.f32.mrf.mxu0 }
 0x384   : > { %v7846_v23 = vadd.f32 %v5227_v55, %v3436_v59  ;;  %v3439_v35 = vadd.f32 %v5118_v27, %v7705_v17 }
 0x385   : > { %v5120_v28 = vpop.f32.mrf.mxu1  ;;  %v5229_v45 = vpop.f32.mrf.mxu0 }
 0x386   : > { %v5121_v5 = vadd.f32 %v5120_v28, %v5119_v31  ;;  %v5230_v32 = vadd.f32 %v5229_v45, %v5228_v63 }
 0x387   : > { %v5122_v48 = vpop.f32.mrf.mxu1  ;;  %v5231_v43 = vpop.f32.mrf.mxu0 }
 0x388   : > { %v7849_v29 = vadd.f32 %v5230_v32, %v3439_v35  ;;  %v3444_v58 = vadd.f32 %v5121_v5, %v7705_v17 }
 0x389   : > { %v5123_v25 = vpop.f32.mrf.mxu1  ;;  %v5232_v39 = vpop.f32.mrf.mxu0 }
 0x38a   : > { %v5124_v24 = vadd.f32 %v5123_v25, %v5122_v48  ;;  %v5233_v16 = vadd.f32 %v5232_v39, %v5231_v43 }
 0x38b   : > { %v5253_v6 = vpop.f32.mrf.mxu1  ;;  %v5234_v1 = vpop.f32.mrf.mxu0 }
 0x38c   : > { %v7852_v50 = vadd.f32 %v5233_v16, %v3444_v58  ;;  %v3447_v61 = vadd.f32 %v5124_v24, %v7705_v17 }
 0x38d   : > { %v5254_v20 = vpop.f32.mrf.mxu1  ;;  %v5235_v33 = vpop.f32.mrf.mxu0 }
 0x38e   : > { %8518 = vst [vmem:[#allocation34_spill] sm:$0xff] %v7852_v50  ;;  %v5255_v13 = vadd.f32 %v5254_v20, %v5253_v6  ;;  %v5236_v14 = vadd.f32 %v5235_v33, %v5234_v1 }
 0x38f   : > { %v5256_v7 = vpop.f32.mrf.mxu1  ;;  %v5365_v51 = vpop.f32.mrf.mxu0 }
 0x390   : > { %v3646_v26 = vadd.f32 %v5255_v13, %v7713_v53  ;;  %v7856_v12 = vadd.f32 %v5236_v14, %v3447_v61 }
 0x391   : > { %v5257_v30 = vpop.f32.mrf.mxu1  ;;  %v5366_v21 = vpop.f32.mrf.mxu0 }
 0x392   : > { %8519 = vst [vmem:[#allocation35_spill] sm:$0xff] %v7856_v12  ;;  %v5258_v3 = vadd.f32 %v5257_v30, %v5256_v7  ;;  %v5367_v27 = vadd.f32 %v5366_v21, %v5365_v51 }
 0x393   : > { %v5259_v44 = vpop.f32.mrf.mxu1  ;;  %v5368_v55 = vpop.f32.mrf.mxu0 }
 0x394   : > { %v3649_v59 = vadd.f32 %v5258_v3, %v7717_v19  ;;  %v7859_v63 = vadd.f32 %v5367_v27, %v3646_v26 }
 0x395   : > { %v5260_v31 = vpop.f32.mrf.mxu1  ;;  %v5369_v17 = vpop.f32.mrf.mxu0 }
 0x396   : > { %v5261_v28 = vadd.f32 %v5260_v31, %v5259_v44  ;;  %v5370_v5 = vadd.f32 %v5369_v17, %v5368_v55 }
 0x397   : > { %v5262_v45 = vpop.f32.mrf.mxu1  ;;  %v7864_v35 = vpop.f32.mrf.mxu0 }
 0x398   : > { %v7862_v53 = vadd.f32 %v5261_v28, %v7723_v57  ;;  %v7866_v48 = vadd.f32 %v5370_v5, %v3649_v59 }
 0x399   : > { %v5263_v32 = vpop.f32.mrf.mxu1  ;;  %v7868_v25 = vpop.f32.mrf.mxu0 }
 0x39a   : > { %v5264_v43 = vadd.f32 %v5263_v32, %v5262_v45 }
 0x39b   : > { %v5265_v19 = vpop.f32.mrf.mxu1  ;;  %v7873_v39 = vpop.f32.mrf.mxu0 }
 0x39c   : > { %v7871_v24 = vadd.f32 %v5264_v43, %v7727_v36 }
 0x39d   : > { %v5266_v58 = vpop.f32.mrf.mxu1  ;;  %v7875_v6 = vpop.f32.mrf.mxu0 }
 0x39e   : > { %v5267_v16 = vadd.f32 %v5266_v58, %v5265_v19 }
 0x39f   : > { %v5268_v57 = vpop.f32.mrf.mxu1  ;;  %v7880_v20 = vpop.f32.mrf.mxu0 }
 0x3a0   : > { %v7878_v1 = vadd.f32 %v5267_v16, %v7733_v56 }
 0x3a1   : > { %v5269_v13 = vpop.f32.mrf.mxu1  ;;  %v7882_v61 = vpop.f32.mrf.mxu0 }
 0x3a2   : > { %v5270_v33 = vadd.f32 %v5269_v13, %v5268_v57 }
 0x3a3   : > { %v5271_v14 = vpop.f32.mrf.mxu1  ;;  %v7887_v7 = vpop.f32.mrf.mxu0 }
 0x3a4   : > { %v7885_v36 = vadd.f32 %v5270_v33, %v7737_v42 }
 0x3a5   : > { %v5272_v26 = vpop.f32.mrf.mxu1  ;;  %v7889_v30 = vpop.f32.mrf.mxu0 }
 0x3a6   : > { %v5273_v51 = vadd.f32 %v5272_v26, %v5271_v14 }
 0x3a7   : > { %v5274_v3 = vpop.f32.mrf.mxu1  ;;  %v7894_v21 = vpop.f32.mrf.mxu0 }
 0x3a8   : > { %v7892_v56 = vadd.f32 %v5273_v51, %v7743_v49 }
 0x3a9   : > { %v5275_v27 = vpop.f32.mrf.mxu1  ;;  %v7896_v59 = vpop.f32.mrf.mxu0 }
 0x3aa   : > { %v5276_v44 = vadd.f32 %v5275_v27, %v5274_v3 }
 0x3ab   : > { %v5277_v55 = vpop.f32.mrf.mxu1  ;;  %v7901_v31 = vpop.f32.mrf.mxu0 }
 0x3ac   : > { %v7899_v42 = vadd.f32 %v5276_v44, %v7747_v11 }
 0x3ad   : > { %v5278_v28 = vpop.f32.mrf.mxu1  ;;  %v7903_v5 = vpop.f32.mrf.mxu0 }
 0x3ae   : > { %v5279_v17 = vadd.f32 %v5278_v28, %v5277_v55 }
 0x3af   : > { %v5280_v45 = vpop.f32.mrf.mxu1  ;;  %v7908_v32 = vpop.f32.mrf.mxu0 }
 0x3b0   : > { %v7906_v49 = vadd.f32 %v5279_v17, %v7755_v47 }
 0x3b1   : > { %v5281_v43 = vpop.f32.mrf.mxu1  ;;  %v7910_v58 = vpop.f32.mrf.mxu0 }
 0x3b2   : > { %v5282_v19 = vadd.f32 %v5281_v43, %v5280_v45 }
 0x3b3   : > { %v5283_v16 = vpop.f32.mrf.mxu1  ;;  %v7915_v57 = vpop.f32.mrf.mxu0 }
 0x3b4   : > { %v7913_v11 = vadd.f32 %v5282_v19, %v7763_v46 }
 0x3b5   : > { %v5284_v13 = vpop.f32.mrf.mxu1  ;;  %v7917_v14 = vpop.f32.mrf.mxu0 }
 0x3b6   : > { %v5285_v33 = vadd.f32 %v5284_v13, %v5283_v16 }
 0x3b7   : > { %v5286_v26 = vpop.f32.mrf.mxu1  ;;  %v7922_v51 = vpop.f32.mrf.mxu0 }
 0x3b8   : > { %v7920_v47 = vadd.f32 %v5285_v33, %v7770_v22 }
 0x3b9   : > { %v5287_v3 = vpop.f32.mrf.mxu1  ;;  %v7924_v44 = vpop.f32.mrf.mxu0 }
 0x3ba   : > { %v5288_v27 = vadd.f32 %v5287_v3, %v5286_v26 }
 0x3bb   : > { %v5289_v55 = vpop.f32.mrf.mxu1  ;;  %v7929_v28 = vpop.f32.mrf.mxu0 }
 0x3bc   : > { %v7927_v46 = vadd.f32 %v5288_v27, %v7774_v18 }
 0x3bd   : > { %v5290_v17 = vpop.f32.mrf.mxu1  ;;  %v7931_v43 = vpop.f32.mrf.mxu0 }
 0x3be   : > { %v5291_v45 = vadd.f32 %v5290_v17, %v5289_v55 }
 0x3bf   : > { %v5292_v19 = vpop.f32.mrf.mxu1  ;;  %v7936_v16 = vpop.f32.mrf.mxu0 }
 0x3c0   : > { %v7934_v22 = vadd.f32 %v5291_v45, %v7781_v52 }
 0x3c1   : > { %v5293_v13 = vpop.f32.mrf.mxu1  ;;  %v7938_v26 = vpop.f32.mrf.mxu0 }
 0x3c2   : > { %8520 = vst [vmem:[#allocation32_spill] sm:$0xff] %v7934_v22  ;;  %v5294_v33 = vadd.f32 %v5293_v13, %v5292_v19  ;;  %8521 = vst [vmem:[#allocation41_spill] sm:$0xff] %v7938_v26 }
 0x3c3   : > { %v5295_v3 = vpop.f32.mrf.mxu1  ;;  %v7943_v27 = vpop.f32.mrf.mxu0 }
 0x3c4   : > { %v7941_v18 = vadd.f32 %v5294_v33, %v7784_v0  ;;  %8523 = vst [vmem:[#allocation37_spill] sm:$0xff] %v7943_v27 }
 0x3c5   : > { %v5296_v12 = vpop.f32.mrf.mxu1  ;;  %v7945_v17 = vpop.f32.mrf.mxu0 }
 0x3c6   : > { %8522 = vst [vmem:[#allocation39_spill] sm:$0xff] %v7941_v18  ;;  %v5297_v55 = vadd.f32 %v5296_v12, %v5295_v3  ;;  %8524 = vst [vmem:[#allocation38_spill] sm:$0xff] %v7945_v17 }
 0x3c7   : > { %v5298_v50 = vpop.f32.mrf.mxu1  ;;  %v7950_v45 = vpop.f32.mrf.mxu0 }
 0x3c8   : > { %v7948_v52 = vadd.f32 %v5297_v55, %v7789_v15 }
 0x3c9   : > { %v5299_v22 = vpop.f32.mrf.mxu1  ;;  %v7952_v13 = vpop.f32.mrf.mxu0 }
 0x3ca   : > { %8525 = vst [vmem:[#allocation33_spill] sm:$0xff] %v7948_v52  ;;  %v5300_v19 = vadd.f32 %v5299_v22, %v5298_v50 }
 0x3cb   : > { %v5301_v26 = vpop.f32.mrf.mxu1  ;;  %v7957_v33 = vpop.f32.mrf.mxu0 }
 0x3cc   : > { %v7955_v0 = vadd.f32 %v5300_v19, %v7792_v10 }
 0x3cd   : > { %v5302_v18 = vpop.f32.mrf.mxu1  ;;  %v7959_v3 = vpop.f32.mrf.mxu0 }
 0x3ce   : > { %8526 = vst [vmem:[#allocation40_spill] sm:$0xff] %v7955_v0  ;;  %v5303_v12 = vadd.f32 %v5302_v18, %v5301_v26  ;;  %8527 = vst [vmem:[#allocation43_spill] sm:$0xff] %v7959_v3 }
 0x3cf   : > { %v5304_v17 = vpop.f32.mrf.mxu1  ;;  %v7964_v55 = vpop.f32.mrf.mxu0 }
 0x3d0   : > { %v7962_v15 = vadd.f32 %v5303_v12, %v7797_v41 }
 0x3d1   : > { %v5305_v27 = vpop.f32.mrf.mxu1  ;;  %v7966_v22 = vpop.f32.mrf.mxu0 }
 0x3d2   : > { %8528 = vst [vmem:[#allocation36_spill] sm:$0xff] %v7962_v15  ;;  %v5306_v50 = vadd.f32 %v5305_v27, %v5304_v17  ;;  %8529 = vst [vmem:[#allocation49_spill] sm:$0xff] %v7966_v22 }
 0x3d3   : > { %v5307_v52 = vpop.f32.mrf.mxu1  ;;  %v7971_v19 = vpop.f32.mrf.mxu0 }
 0x3d4   : > { %v7969_v10 = vadd.f32 %v5306_v50, %v7800_v8  ;;  %8531 = vst [vmem:[#allocation45_spill] sm:$0xff] %v7971_v19 }
 0x3d5   : > { %v5308_v0 = vpop.f32.mrf.mxu1  ;;  %v7973_v18 = vpop.f32.mrf.mxu0 }
 0x3d6   : > { %8530 = vst [vmem:[#allocation47_spill] sm:$0xff] %v7969_v10  ;;  %v5309_v26 = vadd.f32 %v5308_v0, %v5307_v52  ;;  %8532 = vst [vmem:[#allocation46_spill] sm:$0xff] %v7973_v18 }
 0x3d7   : > { %v5310_v3 = vpop.f32.mrf.mxu1  ;;  %v7978_v12 = vpop.f32.mrf.mxu0 }
 0x3d8   : > { %v7976_v41 = vadd.f32 %v5309_v26, %v7805_v34 }
 0x3d9   : > { %v5311_v15 = vpop.f32.mrf.mxu1  ;;  %v7980_v17 = vpop.f32.mrf.mxu0 }
 0x3da   : > { %8533 = vst [vmem:[#allocation42_spill] sm:$0xff] %v7976_v41  ;;  %v5312_v27 = vadd.f32 %v5311_v15, %v5310_v3 }
 0x3db   : > { %v5313_v22 = vpop.f32.mrf.mxu1  ;;  %v7985_v50 = vpop.f32.mrf.mxu0 }
 0x3dc   : > { %v7983_v8 = vadd.f32 %v5312_v27, %v7808_v2  ;;  %8535 = vst [vmem:[#allocation44_spill] sm:$0xff] %v7985_v50 }
 0x3dd   : > { %v5314_v10 = vpop.f32.mrf.mxu1  ;;  %v7987_v0 = vpop.f32.mrf.mxu0 }
 0x3de   : > { %8534 = vst [vmem:[#allocation48_spill] sm:$0xff] %v7983_v8  ;;  %v5315_v52 = vadd.f32 %v5314_v10, %v5313_v22  ;;  %8536 = vst [vmem:[#allocation53_spill] sm:$0xff] %v7987_v0 }
 0x3df   : > { %v5316_v18 = vpop.f32.mrf.mxu1  ;;  %v7992_v41 = vpop.f32.mrf.mxu0 }
 0x3e0   : > { %v7990_v34 = vadd.f32 %v5315_v52, %v7813_v40 }
 0x3e1   : > { %v5317_v26 = vpop.f32.mrf.mxu1  ;;  %v7997_v8 = vpop.f32.mrf.mxu0 }
 0x3e2   : > { %8537 = vst [vmem:[#allocation50_spill] sm:$0xff] %v7990_v34  ;;  %v5318_v19 = vadd.f32 %v5317_v26, %v5316_v18 }
 0x3e3   : > { %v5319_v3 = vpop.f32.mrf.mxu1  ;;  %v8002_v40 = vpop.f32.mrf.mxu0 }
 0x3e4   : > { %v7995_v15 = vadd.f32 %v5318_v19, %v7816_v37  ;;  %8539 = vst [vmem:[#allocation51_spill] sm:$0xff] %v8002_v40 }
 0x3e5   : > { %v5320_v2 = vpop.f32.mrf.mxu1  ;;  %v8007_v37 = vpop.f32.mrf.mxu0 }
 0x3e6   : > { %8538 = vst [vmem:[#allocation52_spill] sm:$0xff] %v7995_v15  ;;  %v5321_v27 = vadd.f32 %v5320_v2, %v5319_v3 }
 0x3e7   : > { %v5322_v50 = vpop.f32.mrf.mxu1 }
 0x3e8   : > { %v8000_v22 = vadd.f32 %v5321_v27, %v7821_v54  ;;  %v8012_v54 = vpop.f32.mrf.mxu0 }
 0x3e9   : > { %v5323_v10 = vpop.f32.mrf.mxu1 }
 0x3ea   : > { %v5324_v0 = vadd.f32 %v5323_v10, %v5322_v50 }
 0x3eb   : > { %v5325_v52 = vpop.f32.mrf.mxu1 }
 0x3ec   : > { %v8005_v18 = vadd.f32 %v5324_v0, %v7824_v9  ;;  %v8017_v9 = vpop.f32.mrf.mxu0 }
 0x3ed   : > { %v5326_v26 = vpop.f32.mrf.mxu1 }
 0x3ee   : > { %8540 = vst [vmem:[#allocation59_spill] sm:$0xff] %v8005_v18  ;;  %v5327_v34 = vadd.f32 %v5326_v26, %v5325_v52 }
 0x3ef   : > { %v5328_v19 = vpop.f32.mrf.mxu1 }
 0x3f0   : > { %v8010_v3 = vadd.f32 %v5327_v34, %v7829_v4  ;;  %v8022_v4 = vpop.f32.mrf.mxu0 }
 0x3f1   : > { %v5329_v2 = vpop.f32.mrf.mxu1 }
 0x3f2   : > { %8541 = vst [vmem:[#allocation60_spill] sm:$0xff] %v8010_v3  ;;  %v5330_v15 = vadd.f32 %v5329_v2, %v5328_v19 }
 0x3f3   : > { %v5331_v27 = vpop.f32.mrf.mxu1 }
 0x3f4   : > { %v8015_v50 = vadd.f32 %v5330_v15, %v7834_v60  ;;  %v8027_v60 = vpop.f32.mrf.mxu0 }
 0x3f5   : > { %v5332_v10 = vpop.f32.mrf.mxu1 }
 0x3f6   : > { %8542 = vst [vmem:[#allocation54_spill] sm:$0xff] %v8015_v50  ;;  %v5333_v40 = vadd.f32 %v5332_v10, %v5331_v27 }
 0x3f7   : > { %v5334_v0 = vpop.f32.mrf.mxu1 }
 0x3f8   : > { %v8020_v52 = vadd.f32 %v5333_v40, %v7840_v38  ;;  %v8032_v40 = vpop.f32.mrf.mxu0 }
 0x3f9   : > { %v5335_v26 = vpop.f32.mrf.mxu1 }
 0x3fa   : > { %v5336_v18 = vadd.f32 %v5335_v26, %v5334_v0 }
 0x3fb   : > { %v5337_v34 = vpop.f32.mrf.mxu1 }
 0x3fc   : > { %v8025_v19 = vadd.f32 %v5336_v18, %v7843_v62  ;;  %v5373_v18 = vadd.f32 %v7868_v25, %v7864_v35  ;;  %v8549_v25 = vld [vmem:[#allocation14_spill] sm:$0xff] }
 0x3fd   : > { %v5338_v2 = vpop.f32.mrf.mxu1 }
 0x3fe   : > { %8543 = vst [vmem:[#allocation56_spill] sm:$0xff] %v8025_v19  ;;  %v5339_v3 = vadd.f32 %v5338_v2, %v5337_v34  ;;  %v8043_v34 = vpop.f32.mrf.mxu0 }
 0x3ff   : > { %v5340_v15 = vpop.f32.mrf.mxu1 }
 0x400   : > { %v8030_v27 = vadd.f32 %v5339_v3, %v7846_v23  ;;  %v5376_v3 = vadd.f32 %v7875_v6, %v7873_v39 }
 0x401   : > { %v5341_v10 = vpop.f32.mrf.mxu1 }
 0x402   : > { %8544 = vst [vmem:[#allocation29_spill] sm:$0xff] %v8030_v27  ;;  %v5342_v38 = vadd.f32 %v5341_v10, %v5340_v15  ;;  %v3815_v15 = vadd.f32 %v5373_v18, %v7862_v53  ;;  %v8052_v10 = vpop.f32.mrf.mxu0  ;;  %v8550_v27 = vunpack.c.l.bf16 %v8549_v25  ;;  %v5379_v53 = vadd.f32 %v7882_v61, %v7880_v20  ;;  %v8551_v18 = vld [vmem:[#allocation13_spill] sm:$0xff] }
 0x403   : > { %v8034_v0 = vpop.f32.mrf.mxu1 }
 0x404   : > { %v8037_v26 = vadd.f32 %v5342_v38, %v7849_v29  ;;  %v8061_v19 = vpop.f32.mrf.mxu0 }
 0x405   : > { %v8039_v62 = vpop.f32.mrf.mxu1 }
 0x406   : > { %8545 = vst [vmem:[#allocation30_spill] sm:$0xff] %v8037_v26  ;;  %8546 = vst [vmem:[#allocation55_spill] sm:$0xff] %v8039_v62  ;;  %v5385_v26 = vadd.f32 %v7896_v59, %v7894_v21 }
 0x407   : > { %v8045_v2 = vpop.f32.mrf.mxu1 }
 0x408   : > { %8547 = vst [vmem:[#allocation57_spill] sm:$0xff] %v8045_v2  ;;  %v3831_v59 = vadd.f32 %v5385_v26, %v7892_v56 }
 0x409   : > { %v8047_v23 = vpop.f32.mrf.mxu1 }
 0x40a   : > { %8548 = vst [vmem:[#allocation58_spill] sm:$0xff] %v8047_v23  ;;  %v3818_v23 = vadd.f32 %v5376_v3, %v7871_v24  ;;  %v8553_v24 = vunpack.c.h.bf16 %v8549_v25  ;;  %v3823_v3 = vadd.f32 %v5379_v53, %v7878_v1  ;;  %v5391_v1 = vadd.f32 %v7910_v58, %v7908_v32 }
 0x40b   : > { %v5551_v29 = vpop.f32.mrf.mxu1  ;;  %v5394_v32 = vadd.f32 %v7917_v14, %v7915_v57  ;;  %v8561_v57 = vld [vmem:[#allocation18_spill] sm:$0xff] }
 0x40c   : > { %v3976_v38 = vadd.f32 %v5551_v29, %v3815_v15  ;;  %v8552_v15 = vunpack.c.l.bf16 %v8551_v18  ;;  %v8562_v14 = vunpack.c.l.bf16 %v8561_v57 }
 0x40d   : > { %v3967_v35 = vpop.f32.mrf.mxu1 }
 0x40e   : > { %v4096_v50 = vadd.f32 %v8550_v27, %v3976_v38  ;;  %v3968_v2 = vadd.f32 %v3967_v35, %v7859_v63  ;;  %v5388_v27 = vadd.f32 %v7903_v5, %v7901_v31  ;;  %v8554_v5 = vunpack.c.h.bf16 %v8551_v18 }
 0x40f   : > { %v5552_v39 = vpop.f32.mrf.mxu1 }
 0x410   : > { %v4128_v6 = vmax.f32 %v4096_v50, 0.0  ;;  %v4094_v29 = vadd.f32 %v8552_v15, %v3968_v2  ;;  %v3979_v62 = vadd.f32 %v5552_v39, %v3818_v23  ;;  %v5382_v50 = vadd.f32 %v7889_v30, %v7887_v7  ;;  %v8078_v2 = vpop.f32.mrf.mxu0  ;;  %v8555_v7 = vld [vmem:[#allocation16_spill] sm:$0xff] }
 0x411   : > { %v3970_v21 = vpop.f32.mrf.mxu1  ;;  %v8556_v30 = vunpack.c.l.bf16 %v8555_v7  ;;  %v3834_v39 = vadd.f32 %v5388_v27, %v7899_v42  ;;  %v5400_v42 = vadd.f32 %v7931_v43, %v7929_v28  ;;  %v3839_v28 = vadd.f32 %v5391_v1, %v7906_v49  ;;  %v8563_v49 = vld [vmem:[#allocation41_spill] sm:$0xff] }
 0x412   : > { %4160 = vst [vmem:[%s8070_s13 + $0x10] sm:$0xff] %v4128_v6  ;;  %v4126_v63 = vmax.f32 %v4094_v29, 0.0  ;;  %v4097_v20 = vadd.f32 %v8553_v24, %v3979_v62  ;;  %v3971_v61 = vadd.f32 %v3970_v21, %v7866_v48  ;;  %v5397_v62 = vadd.f32 %v7924_v44, %v7922_v51  ;;  %v8090_v6 = vpop.f32.mrf.mxu0  ;;  %v8557_v44 = vld [vmem:[#allocation15_spill] sm:$0xff] }
 0x413   : > { %v5555_v56 = vpop.f32.mrf.mxu1  ;;  %v3826_v15 = vadd.f32 %v5382_v50, %v7885_v36  ;;  %v8558_v53 = vunpack.c.l.bf16 %v8557_v44  ;;  %v8559_v36 = vunpack.c.h.bf16 %v8555_v7  ;;  %v5409_v43 = vadd.f32 %v7952_v13, %v7950_v45  ;;  %v8564_v13 = vld [vmem:[#allocation17_spill] sm:$0xff] }
 0x414   : > { %4158 = vst [vmem:[%s8070_s13] sm:$0xff] %v4126_v63  ;;  %v4129_v31 = vmax.f32 %v4097_v20, 0.0  ;;  %v4095_v26 = vadd.f32 %v8554_v5, %v3971_v61  ;;  %v3992_v23 = vadd.f32 %v5555_v56, %v3831_v59  ;;  %v3847_v63 = vadd.f32 %v5397_v62, %v7920_v47  ;;  %v8106_v58 = vpop.f32.mrf.mxu0 }
 0x415   : > { %v3983_v38 = vpop.f32.mrf.mxu1  ;;  %v8560_v47 = vunpack.c.h.bf16 %v8557_v44  ;;  %v3850_v62 = vadd.f32 %v5400_v42, %v7927_v46  ;;  %v3842_v7 = vadd.f32 %v5394_v32, %v7913_v11  ;;  %v8567_v46 = vld [vmem:[#allocation43_spill] sm:$0xff]  ;;  %v8568_v11 = vunpack.c.h.bf16 %v8561_v57 }
 0x416   : > { %4161 = vst [vmem:[%s8070_s13 + $0x18] sm:$0xff] %v4129_v31  ;;  %v4127_v48 = vmax.f32 %v4095_v26, 0.0  ;;  %v4100_v35 = vadd.f32 %v8556_v30, %v3992_v23  ;;  %v3984_v25 = vadd.f32 %v3983_v38, %v3823_v3  ;;  %v8118_v38 = vpop.f32.mrf.mxu0  ;;  %v5403_v30 = vadd.f32 %v8563_v49, %v7936_v16  ;;  %v8569_v16 = vld [vmem:[#allocation37_spill] sm:$0xff] }
 0x417   : > { %v5556_v18 = vpop.f32.mrf.mxu1 }
 0x418   : > { %4159 = vst [vmem:[%s8070_s13 + $0x8] sm:$0xff] %v4127_v48  ;;  %v4132_v51 = vmax.f32 %v4100_v35, 0.0  ;;  %v4098_v29 = vadd.f32 %v8558_v53, %v3984_v25  ;;  %v3995_v21 = vadd.f32 %v5556_v18, %v3834_v39  ;;  %v8565_v35 = vunpack.c.l.bf16 %v8564_v13 }
 0x419   : > { %v3986_v59 = vpop.f32.mrf.mxu1 }
 0x41a   : > { %4164 = vst [vmem:[%s8070_s13 + $0x30] sm:$0xff] %v4132_v51  ;;  %v4130_v27 = vmax.f32 %v4098_v29, 0.0  ;;  %v4101_v24 = vadd.f32 %v8559_v36, %v3995_v21  ;;  %v3987_v20 = vadd.f32 %v3986_v59, %v3826_v15  ;;  %v8566_v15 = vld [vmem:[#allocation33_spill] sm:$0xff]  ;;  %v5412_v51 = vadd.f32 %v8567_v46, %v7957_v33  ;;  %v8570_v21 = vld [vmem:[#allocation38_spill] sm:$0xff]  ;;  %v8572_v33 = vld [vmem:[#allocation32_spill] sm:$0xff] }
 0x41b   : > { %v5559_v61 = vpop.f32.mrf.mxu1  ;;  %v3863_v1 = vadd.f32 %v5409_v43, %v8566_v15  ;;  %v5406_v59 = vadd.f32 %v8570_v21, %v8569_v16  ;;  %v8571_v36 = vunpack.c.h.bf16 %v8564_v13  ;;  %v3855_v32 = vadd.f32 %v5403_v30, %v8572_v33  ;;  %v8580_v13 = vld [vmem:[#allocation42_spill] sm:$0xff] }
 0x41c   : > { %4162 = vst [vmem:[%s8070_s13 + $0x20] sm:$0xff] %v4130_v27  ;;  %v4133_v50 = vmax.f32 %v4101_v24, 0.0  ;;  %v4099_v56 = vadd.f32 %v8560_v47, %v3987_v20  ;;  %v4008_v31 = vadd.f32 %v5559_v61, %v3847_v63  ;;  %v8134_v63 = vpop.f32.mrf.mxu0  ;;  %v5421_v61 = vadd.f32 %v7980_v17, %v7978_v12  ;;  %v8578_v17 = vld [vmem:[#allocation19_spill] sm:$0xff] }
 0x41d   : > { %v3999_v5 = vpop.f32.mrf.mxu1  ;;  %v8586_v21 = vunpack.c.h.bf16 %v8578_v17 }
 0x41e   : > { %4165 = vst [vmem:[%s8070_s13 + $0x38] sm:$0xff] %v4133_v50  ;;  %v4131_v26 = vmax.f32 %v4099_v56, 0.0  ;;  %v4104_v23 = vadd.f32 %v8562_v14, %v4008_v31  ;;  %v4000_v3 = vadd.f32 %v3999_v5, %v3839_v28  ;;  %v8573_v56 = vld [vmem:[#allocation20_spill] sm:$0xff]  ;;  %v8146_v57 = vpop.f32.mrf.mxu0 }
 0x41f   : > { %v5560_v48 = vpop.f32.mrf.mxu1  ;;  %v8574_v31 = vunpack.c.l.bf16 %v8573_v56  ;;  %v8575_v5 = vld [vmem:[#allocation40_spill] sm:$0xff] }
 0x420   : > { %4163 = vst [vmem:[%s8070_s13 + $0x28] sm:$0xff] %v4131_v26  ;;  %v4136_v45 = vmax.f32 %v4104_v23, 0.0  ;;  %v4102_v25 = vadd.f32 %v8565_v35, %v4000_v3  ;;  %v4011_v39 = vadd.f32 %v5560_v48, %v3850_v62  ;;  %v3866_v26 = vadd.f32 %v5412_v51, %v8575_v5  ;;  %v8576_v23 = vld [vmem:[#allocation39_spill] sm:$0xff]  ;;  %v8577_v62 = vld [vmem:[#allocation49_spill] sm:$0xff] }
 0x421   : > { %v4002_v18 = vpop.f32.mrf.mxu1  ;;  %v3858_v3 = vadd.f32 %v5406_v59, %v8576_v23  ;;  %v5415_v48 = vadd.f32 %v8577_v62, %v7964_v55  ;;  %v3879_v35 = vadd.f32 %v5421_v61, %v8580_v13  ;;  %v8584_v55 = vld [vmem:[#allocation45_spill] sm:$0xff]  ;;  %v8591_v5 = vld [vmem:[#allocation47_spill] sm:$0xff] }
 0x422   : > { %4168 = vst [vmem:[%s8070_s13 + $0x50] sm:$0xff] %v4136_v45  ;;  %v4134_v44 = vmax.f32 %v4102_v25, 0.0  ;;  %v4105_v53 = vadd.f32 %v8568_v11, %v4011_v39  ;;  %v4003_v29 = vadd.f32 %v4002_v18, %v3842_v7  ;;  %v8579_v7 = vunpack.c.l.bf16 %v8578_v17  ;;  %v8581_v25 = vld [vmem:[#allocation44_spill] sm:$0xff]  ;;  %v8582_v39 = vld [vmem:[#allocation53_spill] sm:$0xff] }
 0x423   : > { %v5563_v42 = vpop.f32.mrf.mxu1  ;;  %v5424_v18 = vadd.f32 %v8582_v39, %v8581_v25  ;;  %v5436_v17 = vadd.f32 %v8027_v60, %v8022_v4  ;;  %v5445_v60 = vadd.f32 %v8090_v6, %v8078_v2  ;;  %v8602_v6 = vld [vmem:[#allocation23_spill] sm:$0xff] }
 0x424   : > { %4166 = vst [vmem:[%s8070_s13 + $0x40] sm:$0xff] %v4134_v44  ;;  %v4137_v27 = vmax.f32 %v4105_v53, 0.0  ;;  %v4103_v24 = vadd.f32 %v8571_v36, %v4003_v29  ;;  %v4024_v20 = vadd.f32 %v5563_v42, %v3863_v1  ;;  %v8583_v1 = vunpack.c.h.bf16 %v8573_v56  ;;  %v8585_v44 = vld [vmem:[#allocation46_spill] sm:$0xff]  ;;  %v8162_v53 = vpop.f32.mrf.mxu0  ;;  %v8590_v56 = vld [vmem:[#allocation48_spill] sm:$0xff] }
 0x425   : > { %v4015_v50 = vpop.f32.mrf.mxu1  ;;  %v5418_v11 = vadd.f32 %v8585_v44, %v8584_v55 }
 0x426   : > { %4169 = vst [vmem:[%s8070_s13 + $0x58] sm:$0xff] %v4137_v27  ;;  %v4135_v47 = vmax.f32 %v4103_v24, 0.0  ;;  %v4108_v28 = vadd.f32 %v8574_v31, %v4024_v20  ;;  %v4016_v43 = vadd.f32 %v4015_v50, %v3855_v32  ;;  %v8587_v27 = vld [vmem:[#allocation36_spill] sm:$0xff]  ;;  %v5433_v24 = vadd.f32 %v8017_v9, %v8012_v54  ;;  %v8588_v32 = vld [vmem:[#allocation22_spill] sm:$0xff]  ;;  %v8592_v9 = vld [vmem:[#allocation21_spill] sm:$0xff] }
 0x427   : > { %v5564_v14 = vpop.f32.mrf.mxu1  ;;  %v3871_v36 = vadd.f32 %v5415_v48, %v8587_v27  ;;  %v8589_v61 = vunpack.c.l.bf16 %v8588_v32  ;;  %v3882_v31 = vadd.f32 %v5424_v18, %v8590_v56  ;;  %v8593_v23 = vunpack.c.l.bf16 %v8592_v9 }
 0x428   : > { %4167 = vst [vmem:[%s8070_s13 + $0x48] sm:$0xff] %v4135_v47  ;;  %v4140_v12 = vmax.f32 %v4108_v28, 0.0  ;;  %v4106_v49 = vadd.f32 %v8579_v7, %v4016_v43  ;;  %v4027_v30 = vadd.f32 %v5564_v14, %v3866_v26  ;;  %v8174_v28 = vpop.f32.mrf.mxu0  ;;  %v3874_v26 = vadd.f32 %v5418_v11, %v8591_v5  ;;  %v8600_v11 = vld [vmem:[#allocation59_spill] sm:$0xff] }
 0x429   : > { %v4018_v45 = vpop.f32.mrf.mxu1  ;;  %v5427_v14 = vadd.f32 %v7997_v8, %v7992_v41  ;;  %v8595_v41 = vld [vmem:[#allocation51_spill] sm:$0xff]  ;;  %v5439_v27 = vadd.f32 %v8043_v34, %v8032_v40  ;;  %v5442_v34 = vadd.f32 %v8061_v19, %v8052_v10 }
 0x42a   : > { %4172 = vst [vmem:[%s8070_s13 + $0x70] sm:$0xff] %v4140_v12  ;;  %v4138_v15 = vmax.f32 %v4106_v49, 0.0  ;;  %v4109_v46 = vadd.f32 %v8583_v1, %v4027_v30  ;;  %v4019_v51 = vadd.f32 %v4018_v45, %v3858_v3  ;;  %v3895_v12 = vadd.f32 %v5433_v24, %v8000_v22  ;;  %v5455_v13 = vpop.f32.mrf.mxu0 }
 0x42b   : > { %v5567_v29 = vpop.f32.mrf.mxu1  ;;  %v8594_v49 = vunpack.c.h.bf16 %v8588_v32  ;;  %v5430_v8 = vadd.f32 %v8007_v37, %v8595_v41  ;;  %v8596_v22 = vunpack.c.h.bf16 %v8592_v9  ;;  %v3911_v32 = vadd.f32 %v5445_v60, %v8020_v52 }
 0x42c   : > { %4170 = vst [vmem:[%s8070_s13 + $0x60] sm:$0xff] %v4138_v15  ;;  %v4141_v16 = vmax.f32 %v4109_v46, 0.0  ;;  %v4107_v59 = vadd.f32 %v8586_v21, %v4019_v51  ;;  %v4040_v42 = vadd.f32 %v5567_v29, %v3879_v35  ;;  %v8597_v15 = vld [vmem:[#allocation50_spill] sm:$0xff]  ;;  %v8598_v51 = vld [vmem:[#allocation24_spill] sm:$0xff]  ;;  %v3898_v29 = vadd.f32 %v5436_v17, %v8600_v11 }
 0x42d   : > { %v4031_v20 = vpop.f32.mrf.mxu1  ;;  %v3887_v4 = vadd.f32 %v5427_v14, %v8597_v15  ;;  %v8599_v37 = vunpack.c.l.bf16 %v8598_v51  ;;  %v8606_v14 = vunpack.c.h.bf16 %v8602_v6 }
 0x42e   : > { %4173 = vst [vmem:[%s8070_s13 + $0x78] sm:$0xff] %v4141_v16  ;;  %v4139_v33 = vmax.f32 %v4107_v59, 0.0  ;;  %v4112_v50 = vadd.f32 %v8589_v61, %v4040_v42  ;;  %v4032_v47 = vadd.f32 %v4031_v20, %v3871_v36  ;;  %v5456_v16 = vpop.f32.mrf.mxu0  ;;  %v8601_v59 = vld [vmem:[#allocation52_spill] sm:$0xff]  ;;  %v8603_v36 = vunpack.c.l.bf16 %v8602_v6 }
 0x42f   : > { %v5568_v43 = vpop.f32.mrf.mxu1  ;;  %v3890_v42 = vadd.f32 %v5430_v8, %v8601_v59  ;;  %v5448_v61 = vadd.f32 %v8118_v38, %v8106_v58  ;;  %v8612_v8 = vld [vmem:[#allocation54_spill] sm:$0xff] }
 0x430   : > { %4171 = vst [vmem:[%s8070_s13 + $0x68] sm:$0xff] %v4139_v33  ;;  %v4144_v54 = vmax.f32 %v4112_v50, 0.0  ;;  %v4110_v3 = vadd.f32 %v8593_v23, %v4032_v47  ;;  %v4043_v62 = vadd.f32 %v5568_v43, %v3882_v31  ;;  %v8604_v47 = vunpack.c.h.bf16 %v8598_v51  ;;  %v8605_v31 = vld [vmem:[#allocation55_spill] sm:$0xff]  ;;  %v5458_v5 = vpop.f32.mrf.mxu0 }
 0x431   : > { %v4034_v48 = vpop.f32.mrf.mxu1  ;;  %v5345_v43 = vadd.f32 %v8605_v31, %v8034_v0  ;;  %v5457_v23 = vadd.f32 %v5456_v16, %v5455_v13  ;;  %v8613_v13 = vld [vmem:[#allocation57_spill] sm:$0xff]  ;;  %v8625_v31 = vld [vmem:[#allocation30_spill] sm:$0xff] }
 0x432   : > { %4176 = vst [vmem:[%s8070_s13 + $0x90] sm:$0xff] %v4144_v54  ;;  %v4142_v7 = vmax.f32 %v4110_v3, 0.0  ;;  %v4113_v30 = vadd.f32 %v8594_v49, %v4043_v62  ;;  %v4035_v45 = vadd.f32 %v4034_v48, %v3874_v26  ;;  %v8607_v54 = vld [vmem:[#allocation60_spill] sm:$0xff]  ;;  %v8608_v48 = vld [vmem:[#allocation26_spill] sm:$0xff] }
 0x433   : > { %v5571_v35 = vpop.f32.mrf.mxu1  ;;  %v3903_v9 = vadd.f32 %v5439_v27, %v8607_v54  ;;  %v8609_v19 = vunpack.c.l.bf16 %v8608_v48  ;;  %v8611_v49 = vld [vmem:[#allocation34_spill] sm:$0xff]  ;;  %v8617_v51 = vunpack.c.h.bf16 %v8608_v48 }
 0x434   : > { %4174 = vst [vmem:[%s8070_s13 + $0x80] sm:$0xff] %v4142_v7  ;;  %v4145_v25 = vmax.f32 %v4113_v30, 0.0  ;;  %v4111_v39 = vadd.f32 %v8596_v22, %v4035_v45  ;;  %v4056_v18 = vadd.f32 %v5571_v35, %v3895_v12  ;;  %v8610_v12 = vld [vmem:[#allocation56_spill] sm:$0xff]  ;;  %v5451_v7 = vadd.f32 %v8146_v57, %v8134_v63  ;;  %v5459_v45 = vpop.f32.mrf.mxu0 }
 0x435   : > { %v4047_v1 = vpop.f32.mrf.mxu1  ;;  %v3914_v17 = vadd.f32 %v5448_v61, %v8610_v12  ;;  %v3766_v30 = vadd.f32 %v5345_v43, %v8611_v49  ;;  %v3906_v35 = vadd.f32 %v5442_v34, %v8612_v8  ;;  %v5460_v63 = vadd.f32 %v5459_v45, %v5458_v5 }
 0x436   : > { %4177 = vst [vmem:[%s8070_s13 + $0x98] sm:$0xff] %v4145_v25  ;;  %v4143_v46 = vmax.f32 %v4111_v39, 0.0  ;;  %v4116_v55 = vadd.f32 %v8599_v37, %v4056_v18  ;;  %v4048_v44 = vadd.f32 %v4047_v1, %v3887_v4  ;;  %v8614_v25 = vld [vmem:[#allocation58_spill] sm:$0xff]  ;;  %v8615_v18 = vld [vmem:[#allocation25_spill] sm:$0xff] }
 0x437   : > { %v5572_v21 = vpop.f32.mrf.mxu1  ;;  %v5348_v22 = vadd.f32 %v8614_v25, %v8613_v13  ;;  %v8616_v15 = vunpack.c.l.bf16 %v8615_v18  ;;  %v8620_v27 = vunpack.c.h.bf16 %v8615_v18 }
 0x438   : > { %4175 = vst [vmem:[%s8070_s13 + $0x88] sm:$0xff] %v4143_v46  ;;  %v4148_v2 = vmax.f32 %v4116_v55, 0.0  ;;  %v4114_v24 = vadd.f32 %v8603_v36, %v4048_v44  ;;  %v4059_v20 = vadd.f32 %v5572_v21, %v3898_v29  ;;  %v3927_v46 = vadd.f32 %v5457_v23, %v3766_v30  ;;  %v8618_v29 = vld [vmem:[#allocation29_spill] sm:$0xff]  ;;  %v8619_v21 = vld [vmem:[#allocation35_spill] sm:$0xff] }
 0x439   : > { %v4050_v33 = vpop.f32.mrf.mxu1  ;;  %v5454_v44 = vadd.f32 %v8174_v28, %v8162_v53  ;;  %v3919_v16 = vadd.f32 %v5451_v7, %v8618_v29  ;;  %v3769_v59 = vadd.f32 %v5348_v22, %v8619_v21 }
 0x43a   : > { %4180 = vst [vmem:[%s8070_s13 + $0xb0] sm:$0xff] %v4148_v2  ;;  %v4146_v50 = vmax.f32 %v4114_v24, 0.0  ;;  %v4117_v56 = vadd.f32 %v8604_v47, %v4059_v20  ;;  %v4051_v40 = vadd.f32 %v4050_v33, %v3890_v42  ;;  %v8621_v20 = vld [vmem:[#allocation28_spill] sm:$0xff]  ;;  %v8623_v47 = vld [vmem:[#allocation27_spill] sm:$0xff] }
 0x43b   : > { %v5575_v26 = vpop.f32.mrf.mxu1  ;;  %v8622_v33 = vunpack.c.l.bf16 %v8621_v20  ;;  %v3922_v43 = vadd.f32 %v5454_v44, %v8625_v31  ;;  %v8627_v54 = vunpack.c.h.bf16 %v8623_v47 }
 0x43c   : > { %4178 = vst [vmem:[%s8070_s13 + $0xa0] sm:$0xff] %v4146_v50  ;;  %v4149_v52 = vmax.f32 %v4117_v56, 0.0  ;;  %v4115_v58 = vadd.f32 %v8606_v14, %v4051_v40  ;;  %v4072_v38 = vadd.f32 %v5575_v26, %v3911_v32  ;;  %v3930_v32 = vadd.f32 %v5460_v63, %v3769_v59 }
 0x43d   : > { %v4063_v3 = vpop.f32.mrf.mxu1  ;;  %v8624_v56 = vunpack.c.l.bf16 %v8623_v47 }
 0x43e   : > { %4181 = vst [vmem:[%s8070_s13 + $0xb8] sm:$0xff] %v4149_v52  ;;  %v4147_v62 = vmax.f32 %v4115_v58, 0.0  ;;  %v4120_v10 = vadd.f32 %v8609_v19, %v4072_v38  ;;  %v4064_v0 = vadd.f32 %v4063_v3, %v3903_v9  ;;  %v8626_v52 = vunpack.c.h.bf16 %v8621_v20 }
 0x43f   : > { %v5576_v41 = vpop.f32.mrf.mxu1 }
 0x440   : > { %4179 = vst [vmem:[%s8070_s13 + $0xa8] sm:$0xff] %v4147_v62  ;;  %v4152_v39 = vmax.f32 %v4120_v10, 0.0  ;;  %v4118_v4 = vadd.f32 %v8616_v15, %v4064_v0  ;;  %v4075_v60 = vadd.f32 %v5576_v41, %v3914_v17 }
 0x441   : > { %v4066_v1 = vpop.f32.mrf.mxu1 }
 0x442   : > { %4184 = vst [vmem:[%s8070_s13 + $0xd0] sm:$0xff] %v4152_v39  ;;  %v4150_v57 = vmax.f32 %v4118_v4, 0.0  ;;  %v4121_v37 = vadd.f32 %v8617_v51, %v4075_v60  ;;  %v4067_v55 = vadd.f32 %v4066_v1, %v3906_v35 }
 0x443   : > { %v5579_v11 = vpop.f32.mrf.mxu1 }
 0x444   : > { %4182 = vst [vmem:[%s8070_s13 + $0xc0] sm:$0xff] %v4150_v57  ;;  %v4153_v42 = vmax.f32 %v4121_v37, 0.0  ;;  %v4119_v2 = vadd.f32 %v8620_v27, %v4067_v55  ;;  %v4088_v6 = vadd.f32 %v5579_v11, %v3927_v46 }
 0x445   : > { %v4079_v36 = vpop.f32.mrf.mxu1 }
 0x446   : > { %4185 = vst [vmem:[%s8070_s13 + $0xd8] sm:$0xff] %v4153_v42  ;;  %v4151_v24 = vmax.f32 %v4119_v2, 0.0  ;;  %v4124_v53 = vadd.f32 %v8622_v33, %v4088_v6  ;;  %v4080_v28 = vadd.f32 %v4079_v36, %v3919_v16 }
 0x447   : > { %v5580_v61 = vpop.f32.mrf.mxu1 }
 0x448   : > { %4183 = vst [vmem:[%s8070_s13 + $0xc8] sm:$0xff] %v4151_v24  ;;  %v4156_v50 = vmax.f32 %v4124_v53, 0.0  ;;  %v4122_v40 = vadd.f32 %v8624_v56, %v4080_v28  ;;  %v4091_v34 = vadd.f32 %v5580_v61, %v3930_v32 }
 0x449   : > { %v4082_v5 = vpop.f32.mrf.mxu1 }
 0x44a   : > { %4188 = vst [vmem:[%s8070_s13 + $0xf0] sm:$0xff] %v4156_v50  ;;  %v4154_v26 = vmax.f32 %v4122_v40, 0.0  ;;  %v4125_v14 = vadd.f32 %v8626_v52, %v4091_v34  ;;  %v4083_v58 = vadd.f32 %v4082_v5, %v3922_v43 }
 0x44c   : > { %4186 = vst [vmem:[%s8070_s13 + $0xe0] sm:$0xff] %v4154_v26  ;;  %v4157_v38 = vmax.f32 %v4125_v14, 0.0  ;;  %v4123_v9 = vadd.f32 %v8627_v54, %v4083_v58 }
 0x44e   : > { %4189 = vst [vmem:[%s8070_s13 + $0xf8] sm:$0xff] %v4157_v38  ;;  %v4155_v23 = vmax.f32 %v4123_v9, 0.0 }
 0x450   : > { %4187 = vst [vmem:[%s8070_s13 + $0xe8] sm:$0xff] %v4155_v23 }
 0x451   : > { %5892 = shalt.err (!%p5889_p3)
}
 0x452   : > { %s5893_s24 = scalar_lea.hbm %s8261_s17, 4096  ;;  %s5897_s10 = scalar_lea.hbm %s8313_s5, 8192 }
 0x453   : > { %p5894_p11 = scmp.ne.s32.totalorder %s8261_s17, %s5893_s24  ;;  %p5898_p4 = scmp.lt.s32.totalorder %s8261_s17, %s8313_s5 }
 0x454   : > { %p5899_p6 = scmp.lt.s32.totalorder %s5897_s10, %s5893_s24 }
 0x455   : > { %p5895_p9 = pnand %p5894_p11, %p8628_p2 }
 0x456   : > { %p5900_p8 = por %p5899_p6, %p5898_p4 }
 0x457   : > { %p5896_p1 = pneg %p5895_p9 }
 0x459   : > { %p5901_p5 = pnand %p5900_p8, %p5896_p1 }
 0x45b   : > { %5904 = shalt.err (!%p5901_p5)
}
 0x45c   : > { %s5957_s14 = smov 128   ;;  %s5958_s28 = smov 8  }
 0x45d   : > { %5591 = dma.vmem_to_hbm [thread:$0]  (%p8628_p2), %s8263_s7, 4096, %s8261_s17, %s4191_s22, %s5957_s14, %s5957_s14, %s5958_s28  }
 0x45e PF: > { %s4219_s11 = sand.u32 1, %s5935_s18   ;;  %p8629_p7 = scmp.ne.s32.totalorder %s8385_s25, 0 }
 0x45f   : > { %p8630_p12 = scmp.ge.s32.totalorder %s5947_s21, 2  ;;  %s4220_s16 = scalar_lea.sflag [#allocation5], %s4219_s11 }
 0x461   : > { %p5605_p13 = pnand %p8630_p12, %p8629_p7 }
 0x463   : > { %p5606_p0 = pneg %p5605_p13 }
 0x465   : > { %5930 = dma.done.wait (%p5606_p0), %s4220_s16, 4096  }
 0x466   : > { %5932 = vsyncadd (%p5606_p0), %s4220_s16, 4294963200  ;;  %p19_p10 = scmp.ge.s32.totalorder %s6067_s15, 4   ;;  %s8631_s18 = smov %s5939_s19 }
 0x467   : > { %s8632_s19 = smov %s5943_s20  ;;  %s8633_s20 = smov %s6083_s27 }
 0x468   : > { %s8634_s21 = smov %s6067_s15  ;;  %21 = sbr.rel (!%p19_p10) target bundleno = 6 (0x6), region = 94 }
 0x46d   :  { %4225 = vsyncpa [#allocation4], 1 }
 0x46e   :  { %4227 = vsyncpa [#allocation4 + $0x1], 1 }
 0x46f   :  { %4228 = vsyncpa [#allocation7], 1 }
 0x470   :  { %4229 = vsyncpa [#allocation5], 1 }
 0x471   :  { %4231 = vsyncpa [#allocation5 + $0x1], 1 }

</bundles_post_ra>
